<compile_context>
chip_gen: v7x
topology: tpu7x:2x2x1
jax: 0.10.0
libtpu: 0.0.40
codegen_flags: <defaults>
</compile_context>

<pallas_src>
import math

import jax
import jax.numpy as jnp
from jax import lax
from jax.experimental import pallas as pl
from jax.experimental.pallas import tpu as pltpu  # noqa: F401  (TPU backend)

NUM_CLASSES = 16

# ---- fixed args from DeYO.__init__ (model is neither ViT nor ResNet) ----
DEYO_MARGIN   = 3.4538776394910684   # args.deyo_margin
MARGIN_E0     = 2.763102111592855    # args.deyo_margin_e0
PLPD_THRESH   = 0.3                  # default plpd_threshold
PATCH_LEN     = 4                    # args.patch_len, aug_type == 'patch'
FILTER_ENT    = 1
FILTER_PLPD   = 1
REWEIGHT_ENT  = 1
REWEIGHT_PLPD = 1


# --------------------- single fused Pallas kernel ---------------------------
def _deyo_fused_kernel(perm_ref, x_ref, wt_ref, b_ref, out_ref, ent_ref, loss_ref):
    """In-kernel patch shuffle + ONE stacked (2B,D)x(D,K) matmul + DeYO
    entropy/PLPD filtering and reweighting.  Only logits[B,K], ent[B,1] and
    loss[1,1] go back to HBM; x_prime / logits_prime never leave VMEM."""
    B, P = perm_ref.shape              # (8, 16)
    D = x_ref.shape[1]                 # 1024 (patch-major columns)
    F = D // P                         # 64  features per patch
    K = wt_ref.shape[0]                # 16  classes

    x = x_ref[...]                     # (B, D) f32, patch-major column blocks
    perm = perm_ref[...]               # (B, P) int32: output patch p <- patch perm[b,p]

    # ---- per-sample patch shuffle, built in VMEM (no x_prime HBM array) ----
    # Output column block p is a per-row select over the 16 source blocks; all
    # static 64-wide lane slices + VPU selects (guaranteed lowering, no gather).
    x_blocks = [x[:, q * F:(q + 1) * F] for q in range(P)]          # 16 x (B, F)
    xp_blocks = []
    for p in range(P):
        src = perm[:, p:p + 1]                                      # (B, 1) int32
        blk = x_blocks[0]
        for q in range(1, P):
            blk = jnp.where(src == q, x_blocks[q], blk)
        xp_blocks.append(blk)
    x_prime = jnp.concatenate(xp_blocks, axis=1)                    # (B, D) f32

    # ---- ONE stacked matmul for both branches (bf16 MXU inputs, f32 acc) ----
    # wt_ref is the lane-dense (K, D) bf16 weight; contract last axes of both.
    lhs = jnp.concatenate([x, x_prime], axis=0).astype(jnp.bfloat16)  # (2B, D)
    logits_all = lax.dot_general(
        lhs, wt_ref[...],
        dimension_numbers=(((1,), (1,)), ((), ())),
        preferred_element_type=jnp.float32) + b_ref[...]             # bias once
    out_ref[...] = logits_all[:B]                                    # model(x)

    # ---- softmax / entropy / PLPD (all f32, exact reciprocals) -------------
    m = jnp.max(logits_all, axis=1, keepdims=True)
    z = logits_all - m
    e = jnp.exp(z)
    s = jnp.sum(e, axis=1, keepdims=True)
    prob_all = e / s                                 # exact: thresholds are hard cuts
    logp_all = z - jnp.log(s)

    prob   = prob_all[:B]                            # outputs.softmax(1)
    prob_p = prob_all[B:]                            # outputs_prime.softmax(1)
    entropys = -jnp.sum(prob * logp_all[:B], axis=1, keepdims=True)   # (B, 1)

    # filter 1 (entropy)
    if FILTER_ENT:
        mask1 = entropys < DEYO_MARGIN
    else:
        mask1 = entropys <= math.log(1000)

    # argmax straight from the clean logits max (torch first-occurrence tie-break)
    idx = lax.broadcasted_iota(jnp.int32, (B, K), 1)
    cls1 = jnp.min(jnp.where(logits_all[:B] == m[:B], idx, K), axis=1, keepdims=True)
    onehot = (idx == cls1).astype(jnp.float32)
    plpd = jnp.sum((prob - prob_p) * onehot, axis=1, keepdims=True)   # (B, 1)

    # filter 2 (PLPD)
    if FILTER_PLPD:
        mask2 = plpd > PLPD_THRESH
    else:
        mask2 = plpd >= -2.0

    mask = jnp.logical_and(mask1, mask2).astype(jnp.float32)          # (B, 1)

    # reweighting: 1/exp(a) == exp(-a)  ->  EUP exp, no divides
    coeff = (REWEIGHT_ENT * jnp.exp(MARGIN_E0 - entropys)
             + REWEIGHT_PLPD * jnp.exp(plpd))
    weighted = entropys * coeff

    cnt = jnp.sum(mask, keepdims=True)                                # (1, 1)
    total = jnp.sum(weighted * mask, keepdims=True)                   # (1, 1)
    # reference early-returns (no update) when the filtered set is empty -> 0
    loss_ref[...] = jnp.where(cnt > 0.0, total / jnp.maximum(cnt, 1.0),
                              jnp.zeros_like(total))
    # NOTE: SMEM routing of these tiny outputs (perf-review item) was evaluated
    # but kept in VMEM to avoid vector->scalar-store lowering risk; the cost is
    # a couple of masked vst + tiny DMAs.
    ent_ref[...] = entropys


# --------------------- wrapper-side layout helpers ---------------------------
def _patch_major_x(x, patch_len):
    """x [B,C,H,W] -> patch-major flat [B, D] with column order (p1,p2,c,h,w),
    i.e. the rearrange 'b c (p1 h) (p2 w) -> b ((p1 p2) (c h w))'.  H, W are
    multiples of patch_len here, so the reference's Resize pair is the identity.
    TODO(synk): the general (non-divisible) case needs the bilinear Resize pair."""
    B, C, H, W = x.shape
    h, w = H // patch_len, W // patch_len
    xp = x.reshape(B, C, patch_len, h, patch_len, w)
    xp = jnp.transpose(xp, (0, 2, 4, 1, 3, 5))
    return xp.reshape(B, C * H * W)


def prepare_deyo_weights(w, b, C, H, W, patch_len=PATCH_LEN):
    """ONE-TIME (per optimizer step) weight prep, hoisted out of the forward
    path: reorder rows (flat NCHW -> patch-major, folding the inverse patch
    rearrange of x_prime into the weights), transpose to lane-dense (K, D),
    cast to bf16.  Bias -> (1, K) f32."""
    D, K = w.shape
    h, ww = H // patch_len, W // patch_len
    wp = w.reshape(C, patch_len, h, patch_len, ww, K)
    wp = jnp.transpose(wp, (1, 3, 0, 2, 4, 5)).reshape(D, K)
    wT = wp.T.astype(jnp.bfloat16)                  # (K, D): 16 sublanes x 1024 lanes
    b2 = b.reshape(1, K).astype(jnp.float32)
    return wT, b2


# ------------------------------ DeYO forward --------------------------------
@jax.jit
def deyo_forward(x, wT, b2, perm_key):
    B, C, H, W = x.shape
    D = C * H * W
    K = wT.shape[0]
    P = PATCH_LEN * PATCH_LEN

    # Only per-call wrapper work: one patch-major relayout of x (f32, cast to
    # bf16 inside the kernel) and the tiny (B,P) random permutation.
    x_pm = _patch_major_x(x, PATCH_LEN)                                   # (B, D) f32
    perm = jnp.argsort(jax.random.uniform(perm_key, (B, P)),
                       axis=-1).astype(jnp.int32)                        # (B, P) i32

    # One fused pallas_call: one launch, one weight DMA, no x_prime / logits_prime
    # round-trip through HBM.
    # TODO(synk): if B/D grow, add a grid over B marked "parallel" (v7x has 2
    # TensorCores) and tile the D reduction with a VMEM accumulator; re-derive
    # block sizes for v7x's 64 MiB physical / 32 MiB scoped VMEM (set
    # vmem_limit_bytes explicitly) rather than reusing a v5e/v6e-sized tile.
    # Keep K=16 un-split: extra grid steps only add per-step overhead here.
    logits, ent, loss = pl.pallas_call(
        _deyo_fused_kernel,
        out_shape=(
            jax.ShapeDtypeStruct((B, K), jnp.float32),   # outputs = model(x)
            jax.ShapeDtypeStruct((B, 1), jnp.float32),   # entropys
            jax.ShapeDtypeStruct((1, 1), jnp.float32),   # masked-mean loss
        ),
        in_specs=[
            pl.BlockSpec((B, P), lambda: (0, 0)),        # perm (int32)
            pl.BlockSpec((B, D), lambda: (0, 0)),        # x, patch-major f32
            pl.BlockSpec((K, D), lambda: (0, 0)),        # weight, lane-dense bf16
            pl.BlockSpec((1, K), lambda: (0, 0)),        # bias f32
        ],
        out_specs=(
            pl.BlockSpec((B, K), lambda: (0, 0)),
            pl.BlockSpec((B, 1), lambda: (0, 0)),
            pl.BlockSpec((1, 1), lambda: (0, 0)),
        ),
    )(perm, x_pm, wT, b2)

    # TODO(synk): the reference then does loss.backward() + optimizer.step()
    # (in-place training side effect); not implemented here.
    return logits, ent[:, 0], loss[0, 0]


if __name__ == "__main__":
    key = jax.random.PRNGKey(0)
    kx, kw, kp = jax.random.split(key, 3)

    B, C, H, W = 8, 4, 16, 16
    D = C * H * W
    x = jax.random.normal(kx, (B, C, H, W), dtype=jnp.float32)
    w = jax.random.normal(kw, (D, NUM_CLASSES), dtype=jnp.float32) * 0.05
    b = jnp.zeros((NUM_CLASSES,), dtype=jnp.float32)

    # weight reorder / transpose / bf16 cast done ONCE, outside the forward path
    wT, b2 = prepare_deyo_weights(w, b, C, H, W)

    outputs, entropys, loss = deyo_forward(x, wT, b2, kp)
    jax.block_until_ready(outputs)
    jax.block_until_ready(entropys)
    jax.block_until_ready(loss)
    print("KERNEL_OK")
</pallas_src>

<mosaic_0001>
module attributes {stable_mosaic.version = 11 : i64} {
  func.func @_deyo_fused_kernel(%arg0: memref<8x16xi32, #tpu.memory_space<vmem>>, %arg1: memref<8x1024xf32, #tpu.memory_space<vmem>>, %arg2: memref<16x1024xbf16, #tpu.memory_space<vmem>>, %arg3: memref<1x16xf32, #tpu.memory_space<vmem>>, %arg4: memref<8x16xf32, #tpu.memory_space<vmem>>, %arg5: memref<8x1xf32, #tpu.memory_space<vmem>>, %arg6: memref<1x1xf32, #tpu.memory_space<vmem>>) attributes {dimension_semantics = [], scalar_prefetch = 0 : i64, scratch_operands = 0 : i64, tpu.core_type = #tpu.core_type<tc>} {
    %c0 = arith.constant 0 : index
    %c0_0 = arith.constant 0 : index
    %0 = vector.load %arg1[%c0, %c0_0] : memref<8x1024xf32, #tpu.memory_space<vmem>>, vector<8x1024xf32>
    %c0_1 = arith.constant 0 : index
    %c0_2 = arith.constant 0 : index
    %1 = vector.load %arg0[%c0_1, %c0_2] : memref<8x16xi32, #tpu.memory_space<vmem>>, vector<8x16xi32>
    %2 = vector.extract_strided_slice %0 {offsets = [0, 0], sizes = [8, 64], strides = [1, 1]} : vector<8x1024xf32> to vector<8x64xf32>
    %3 = vector.extract_strided_slice %0 {offsets = [0, 64], sizes = [8, 64], strides = [1, 1]} : vector<8x1024xf32> to vector<8x64xf32>
    %4 = vector.extract_strided_slice %0 {offsets = [0, 128], sizes = [8, 64], strides = [1, 1]} : vector<8x1024xf32> to vector<8x64xf32>
    %5 = vector.extract_strided_slice %0 {offsets = [0, 192], sizes = [8, 64], strides = [1, 1]} : vector<8x1024xf32> to vector<8x64xf32>
    %6 = vector.extract_strided_slice %0 {offsets = [0, 256], sizes = [8, 64], strides = [1, 1]} : vector<8x1024xf32> to vector<8x64xf32>
    %7 = vector.extract_strided_slice %0 {offsets = [0, 320], sizes = [8, 64], strides = [1, 1]} : vector<8x1024xf32> to vector<8x64xf32>
    %8 = vector.extract_strided_slice %0 {offsets = [0, 384], sizes = [8, 64], strides = [1, 1]} : vector<8x1024xf32> to vector<8x64xf32>
    %9 = vector.extract_strided_slice %0 {offsets = [0, 448], sizes = [8, 64], strides = [1, 1]} : vector<8x1024xf32> to vector<8x64xf32>
    %10 = vector.extract_strided_slice %0 {offsets = [0, 512], sizes = [8, 64], strides = [1, 1]} : vector<8x1024xf32> to vector<8x64xf32>
    %11 = vector.extract_strided_slice %0 {offsets = [0, 576], sizes = [8, 64], strides = [1, 1]} : vector<8x1024xf32> to vector<8x64xf32>
    %12 = vector.extract_strided_slice %0 {offsets = [0, 640], sizes = [8, 64], strides = [1, 1]} : vector<8x1024xf32> to vector<8x64xf32>
    %13 = vector.extract_strided_slice %0 {offsets = [0, 704], sizes = [8, 64], strides = [1, 1]} : vector<8x1024xf32> to vector<8x64xf32>
    %14 = vector.extract_strided_slice %0 {offsets = [0, 768], sizes = [8, 64], strides = [1, 1]} : vector<8x1024xf32> to vector<8x64xf32>
    %15 = vector.extract_strided_slice %0 {offsets = [0, 832], sizes = [8, 64], strides = [1, 1]} : vector<8x1024xf32> to vector<8x64xf32>
    %16 = vector.extract_strided_slice %0 {offsets = [0, 896], sizes = [8, 64], strides = [1, 1]} : vector<8x1024xf32> to vector<8x64xf32>
    %17 = vector.extract_strided_slice %0 {offsets = [0, 960], sizes = [8, 64], strides = [1, 1]} : vector<8x1024xf32> to vector<8x64xf32>
    %18 = vector.extract_strided_slice %1 {offsets = [0, 0], sizes = [8, 1], strides = [1, 1]} : vector<8x16xi32> to vector<8x1xi32>
    %c1_i32 = arith.constant 1 : i32
    %19 = vector.broadcast %c1_i32 : i32 to vector<8x1xi32>
    %20 = arith.cmpi eq, %18, %19 : vector<8x1xi32>
    %21 = vector.shape_cast %20 : vector<8x1xi1> to vector<8x1xi1>
    %22 = vector.broadcast %21 : vector<8x1xi1> to vector<8x64xi1>
    %23 = arith.select %22, %3, %2 : vector<8x64xi1>, vector<8x64xf32>
    %c2_i32 = arith.constant 2 : i32
    %24 = vector.broadcast %c2_i32 : i32 to vector<8x1xi32>
    %25 = arith.cmpi eq, %18, %24 : vector<8x1xi32>
    %26 = vector.shape_cast %25 : vector<8x1xi1> to vector<8x1xi1>
    %27 = vector.broadcast %26 : vector<8x1xi1> to vector<8x64xi1>
    %28 = arith.select %27, %4, %23 : vector<8x64xi1>, vector<8x64xf32>
    %c3_i32 = arith.constant 3 : i32
    %29 = vector.broadcast %c3_i32 : i32 to vector<8x1xi32>
    %30 = arith.cmpi eq, %18, %29 : vector<8x1xi32>
    %31 = vector.shape_cast %30 : vector<8x1xi1> to vector<8x1xi1>
    %32 = vector.broadcast %31 : vector<8x1xi1> to vector<8x64xi1>
    %33 = arith.select %32, %5, %28 : vector<8x64xi1>, vector<8x64xf32>
    %c4_i32 = arith.constant 4 : i32
    %34 = vector.broadcast %c4_i32 : i32 to vector<8x1xi32>
    %35 = arith.cmpi eq, %18, %34 : vector<8x1xi32>
    %36 = vector.shape_cast %35 : vector<8x1xi1> to vector<8x1xi1>
    %37 = vector.broadcast %36 : vector<8x1xi1> to vector<8x64xi1>
    %38 = arith.select %37, %6, %33 : vector<8x64xi1>, vector<8x64xf32>
    %c5_i32 = arith.constant 5 : i32
    %39 = vector.broadcast %c5_i32 : i32 to vector<8x1xi32>
    %40 = arith.cmpi eq, %18, %39 : vector<8x1xi32>
    %41 = vector.shape_cast %40 : vector<8x1xi1> to vector<8x1xi1>
    %42 = vector.broadcast %41 : vector<8x1xi1> to vector<8x64xi1>
    %43 = arith.select %42, %7, %38 : vector<8x64xi1>, vector<8x64xf32>
    %c6_i32 = arith.constant 6 : i32
    %44 = vector.broadcast %c6_i32 : i32 to vector<8x1xi32>
    %45 = arith.cmpi eq, %18, %44 : vector<8x1xi32>
    %46 = vector.shape_cast %45 : vector<8x1xi1> to vector<8x1xi1>
    %47 = vector.broadcast %46 : vector<8x1xi1> to vector<8x64xi1>
    %48 = arith.select %47, %8, %43 : vector<8x64xi1>, vector<8x64xf32>
    %c7_i32 = arith.constant 7 : i32
    %49 = vector.broadcast %c7_i32 : i32 to vector<8x1xi32>
    %50 = arith.cmpi eq, %18, %49 : vector<8x1xi32>
    %51 = vector.shape_cast %50 : vector<8x1xi1> to vector<8x1xi1>
    %52 = vector.broadcast %51 : vector<8x1xi1> to vector<8x64xi1>
    %53 = arith.select %52, %9, %48 : vector<8x64xi1>, vector<8x64xf32>
    %c8_i32 = arith.constant 8 : i32
    %54 = vector.broadcast %c8_i32 : i32 to vector<8x1xi32>
    %55 = arith.cmpi eq, %18, %54 : vector<8x1xi32>
    %56 = vector.shape_cast %55 : vector<8x1xi1> to vector<8x1xi1>
    %57 = vector.broadcast %56 : vector<8x1xi1> to vector<8x64xi1>
    %58 = arith.select %57, %10, %53 : vector<8x64xi1>, vector<8x64xf32>
    %c9_i32 = arith.constant 9 : i32
    %59 = vector.broadcast %c9_i32 : i32 to vector<8x1xi32>
    %60 = arith.cmpi eq, %18, %59 : vector<8x1xi32>
    %61 = vector.shape_cast %60 : vector<8x1xi1> to vector<8x1xi1>
    %62 = vector.broadcast %61 : vector<8x1xi1> to vector<8x64xi1>
    %63 = arith.select %62, %11, %58 : vector<8x64xi1>, vector<8x64xf32>
    %c10_i32 = arith.constant 10 : i32
    %64 = vector.broadcast %c10_i32 : i32 to vector<8x1xi32>
    %65 = arith.cmpi eq, %18, %64 : vector<8x1xi32>
    %66 = vector.shape_cast %65 : vector<8x1xi1> to vector<8x1xi1>
    %67 = vector.broadcast %66 : vector<8x1xi1> to vector<8x64xi1>
    %68 = arith.select %67, %12, %63 : vector<8x64xi1>, vector<8x64xf32>
    %c11_i32 = arith.constant 11 : i32
    %69 = vector.broadcast %c11_i32 : i32 to vector<8x1xi32>
    %70 = arith.cmpi eq, %18, %69 : vector<8x1xi32>
    %71 = vector.shape_cast %70 : vector<8x1xi1> to vector<8x1xi1>
    %72 = vector.broadcast %71 : vector<8x1xi1> to vector<8x64xi1>
    %73 = arith.select %72, %13, %68 : vector<8x64xi1>, vector<8x64xf32>
    %c12_i32 = arith.constant 12 : i32
    %74 = vector.broadcast %c12_i32 : i32 to vector<8x1xi32>
    %75 = arith.cmpi eq, %18, %74 : vector<8x1xi32>
    %76 = vector.shape_cast %75 : vector<8x1xi1> to vector<8x1xi1>
    %77 = vector.broadcast %76 : vector<8x1xi1> to vector<8x64xi1>
    %78 = arith.select %77, %14, %73 : vector<8x64xi1>, vector<8x64xf32>
    %c13_i32 = arith.constant 13 : i32
    %79 = vector.broadcast %c13_i32 : i32 to vector<8x1xi32>
    %80 = arith.cmpi eq, %18, %79 : vector<8x1xi32>
    %81 = vector.shape_cast %80 : vector<8x1xi1> to vector<8x1xi1>
    %82 = vector.broadcast %81 : vector<8x1xi1> to vector<8x64xi1>
    %83 = arith.select %82, %15, %78 : vector<8x64xi1>, vector<8x64xf32>
    %c14_i32 = arith.constant 14 : i32
    %84 = vector.broadcast %c14_i32 : i32 to vector<8x1xi32>
    %85 = arith.cmpi eq, %18, %84 : vector<8x1xi32>
    %86 = vector.shape_cast %85 : vector<8x1xi1> to vector<8x1xi1>
    %87 = vector.broadcast %86 : vector<8x1xi1> to vector<8x64xi1>
    %88 = arith.select %87, %16, %83 : vector<8x64xi1>, vector<8x64xf32>
    %c15_i32 = arith.constant 15 : i32
    %89 = vector.broadcast %c15_i32 : i32 to vector<8x1xi32>
    %90 = arith.cmpi eq, %18, %89 : vector<8x1xi32>
    %91 = vector.shape_cast %90 : vector<8x1xi1> to vector<8x1xi1>
    %92 = vector.broadcast %91 : vector<8x1xi1> to vector<8x64xi1>
    %93 = arith.select %92, %17, %88 : vector<8x64xi1>, vector<8x64xf32>
    %94 = vector.extract_strided_slice %1 {offsets = [0, 1], sizes = [8, 1], strides = [1, 1]} : vector<8x16xi32> to vector<8x1xi32>
    %c1_i32_3 = arith.constant 1 : i32
    %95 = vector.broadcast %c1_i32_3 : i32 to vector<8x1xi32>
    %96 = arith.cmpi eq, %94, %95 : vector<8x1xi32>
    %97 = vector.shape_cast %96 : vector<8x1xi1> to vector<8x1xi1>
    %98 = vector.broadcast %97 : vector<8x1xi1> to vector<8x64xi1>
    %99 = arith.select %98, %3, %2 : vector<8x64xi1>, vector<8x64xf32>
    %c2_i32_4 = arith.constant 2 : i32
    %100 = vector.broadcast %c2_i32_4 : i32 to vector<8x1xi32>
    %101 = arith.cmpi eq, %94, %100 : vector<8x1xi32>
    %102 = vector.shape_cast %101 : vector<8x1xi1> to vector<8x1xi1>
    %103 = vector.broadcast %102 : vector<8x1xi1> to vector<8x64xi1>
    %104 = arith.select %103, %4, %99 : vector<8x64xi1>, vector<8x64xf32>
    %c3_i32_5 = arith.constant 3 : i32
    %105 = vector.broadcast %c3_i32_5 : i32 to vector<8x1xi32>
    %106 = arith.cmpi eq, %94, %105 : vector<8x1xi32>
    %107 = vector.shape_cast %106 : vector<8x1xi1> to vector<8x1xi1>
    %108 = vector.broadcast %107 : vector<8x1xi1> to vector<8x64xi1>
    %109 = arith.select %108, %5, %104 : vector<8x64xi1>, vector<8x64xf32>
    %c4_i32_6 = arith.constant 4 : i32
    %110 = vector.broadcast %c4_i32_6 : i32 to vector<8x1xi32>
    %111 = arith.cmpi eq, %94, %110 : vector<8x1xi32>
    %112 = vector.shape_cast %111 : vector<8x1xi1> to vector<8x1xi1>
    %113 = vector.broadcast %112 : vector<8x1xi1> to vector<8x64xi1>
    %114 = arith.select %113, %6, %109 : vector<8x64xi1>, vector<8x64xf32>
    %c5_i32_7 = arith.constant 5 : i32
    %115 = vector.broadcast %c5_i32_7 : i32 to vector<8x1xi32>
    %116 = arith.cmpi eq, %94, %115 : vector<8x1xi32>
    %117 = vector.shape_cast %116 : vector<8x1xi1> to vector<8x1xi1>
    %118 = vector.broadcast %117 : vector<8x1xi1> to vector<8x64xi1>
    %119 = arith.select %118, %7, %114 : vector<8x64xi1>, vector<8x64xf32>
    %c6_i32_8 = arith.constant 6 : i32
    %120 = vector.broadcast %c6_i32_8 : i32 to vector<8x1xi32>
    %121 = arith.cmpi eq, %94, %120 : vector<8x1xi32>
    %122 = vector.shape_cast %121 : vector<8x1xi1> to vector<8x1xi1>
    %123 = vector.broadcast %122 : vector<8x1xi1> to vector<8x64xi1>
    %124 = arith.select %123, %8, %119 : vector<8x64xi1>, vector<8x64xf32>
    %c7_i32_9 = arith.constant 7 : i32
    %125 = vector.broadcast %c7_i32_9 : i32 to vector<8x1xi32>
    %126 = arith.cmpi eq, %94, %125 : vector<8x1xi32>
    %127 = vector.shape_cast %126 : vector<8x1xi1> to vector<8x1xi1>
    %128 = vector.broadcast %127 : vector<8x1xi1> to vector<8x64xi1>
    %129 = arith.select %128, %9, %124 : vector<8x64xi1>, vector<8x64xf32>
    %c8_i32_10 = arith.constant 8 : i32
    %130 = vector.broadcast %c8_i32_10 : i32 to vector<8x1xi32>
    %131 = arith.cmpi eq, %94, %130 : vector<8x1xi32>
    %132 = vector.shape_cast %131 : vector<8x1xi1> to vector<8x1xi1>
    %133 = vector.broadcast %132 : vector<8x1xi1> to vector<8x64xi1>
    %134 = arith.select %133, %10, %129 : vector<8x64xi1>, vector<8x64xf32>
    %c9_i32_11 = arith.constant 9 : i32
    %135 = vector.broadcast %c9_i32_11 : i32 to vector<8x1xi32>
    %136 = arith.cmpi eq, %94, %135 : vector<8x1xi32>
    %137 = vector.shape_cast %136 : vector<8x1xi1> to vector<8x1xi1>
    %138 = vector.broadcast %137 : vector<8x1xi1> to vector<8x64xi1>
    %139 = arith.select %138, %11, %134 : vector<8x64xi1>, vector<8x64xf32>
    %c10_i32_12 = arith.constant 10 : i32
    %140 = vector.broadcast %c10_i32_12 : i32 to vector<8x1xi32>
    %141 = arith.cmpi eq, %94, %140 : vector<8x1xi32>
    %142 = vector.shape_cast %141 : vector<8x1xi1> to vector<8x1xi1>
    %143 = vector.broadcast %142 : vector<8x1xi1> to vector<8x64xi1>
    %144 = arith.select %143, %12, %139 : vector<8x64xi1>, vector<8x64xf32>
    %c11_i32_13 = arith.constant 11 : i32
    %145 = vector.broadcast %c11_i32_13 : i32 to vector<8x1xi32>
    %146 = arith.cmpi eq, %94, %145 : vector<8x1xi32>
    %147 = vector.shape_cast %146 : vector<8x1xi1> to vector<8x1xi1>
    %148 = vector.broadcast %147 : vector<8x1xi1> to vector<8x64xi1>
    %149 = arith.select %148, %13, %144 : vector<8x64xi1>, vector<8x64xf32>
    %c12_i32_14 = arith.constant 12 : i32
    %150 = vector.broadcast %c12_i32_14 : i32 to vector<8x1xi32>
    %151 = arith.cmpi eq, %94, %150 : vector<8x1xi32>
    %152 = vector.shape_cast %151 : vector<8x1xi1> to vector<8x1xi1>
    %153 = vector.broadcast %152 : vector<8x1xi1> to vector<8x64xi1>
    %154 = arith.select %153, %14, %149 : vector<8x64xi1>, vector<8x64xf32>
    %c13_i32_15 = arith.constant 13 : i32
    %155 = vector.broadcast %c13_i32_15 : i32 to vector<8x1xi32>
    %156 = arith.cmpi eq, %94, %155 : vector<8x1xi32>
    %157 = vector.shape_cast %156 : vector<8x1xi1> to vector<8x1xi1>
    %158 = vector.broadcast %157 : vector<8x1xi1> to vector<8x64xi1>
    %159 = arith.select %158, %15, %154 : vector<8x64xi1>, vector<8x64xf32>
    %c14_i32_16 = arith.constant 14 : i32
    %160 = vector.broadcast %c14_i32_16 : i32 to vector<8x1xi32>
    %161 = arith.cmpi eq, %94, %160 : vector<8x1xi32>
    %162 = vector.shape_cast %161 : vector<8x1xi1> to vector<8x1xi1>
    %163 = vector.broadcast %162 : vector<8x1xi1> to vector<8x64xi1>
    %164 = arith.select %163, %16, %159 : vector<8x64xi1>, vector<8x64xf32>
    %c15_i32_17 = arith.constant 15 : i32
    %165 = vector.broadcast %c15_i32_17 : i32 to vector<8x1xi32>
    %166 = arith.cmpi eq, %94, %165 : vector<8x1xi32>
    %167 = vector.shape_cast %166 : vector<8x1xi1> to vector<8x1xi1>
    %168 = vector.broadcast %167 : vector<8x1xi1> to vector<8x64xi1>
    %169 = arith.select %168, %17, %164 : vector<8x64xi1>, vector<8x64xf32>
    %170 = vector.extract_strided_slice %1 {offsets = [0, 2], sizes = [8, 1], strides = [1, 1]} : vector<8x16xi32> to vector<8x1xi32>
    %c1_i32_18 = arith.constant 1 : i32
    %171 = vector.broadcast %c1_i32_18 : i32 to vector<8x1xi32>
    %172 = arith.cmpi eq, %170, %171 : vector<8x1xi32>
    %173 = vector.shape_cast %172 : vector<8x1xi1> to vector<8x1xi1>
    %174 = vector.broadcast %173 : vector<8x1xi1> to vector<8x64xi1>
    %175 = arith.select %174, %3, %2 : vector<8x64xi1>, vector<8x64xf32>
    %c2_i32_19 = arith.constant 2 : i32
    %176 = vector.broadcast %c2_i32_19 : i32 to vector<8x1xi32>
    %177 = arith.cmpi eq, %170, %176 : vector<8x1xi32>
    %178 = vector.shape_cast %177 : vector<8x1xi1> to vector<8x1xi1>
    %179 = vector.broadcast %178 : vector<8x1xi1> to vector<8x64xi1>
    %180 = arith.select %179, %4, %175 : vector<8x64xi1>, vector<8x64xf32>
    %c3_i32_20 = arith.constant 3 : i32
    %181 = vector.broadcast %c3_i32_20 : i32 to vector<8x1xi32>
    %182 = arith.cmpi eq, %170, %181 : vector<8x1xi32>
    %183 = vector.shape_cast %182 : vector<8x1xi1> to vector<8x1xi1>
    %184 = vector.broadcast %183 : vector<8x1xi1> to vector<8x64xi1>
    %185 = arith.select %184, %5, %180 : vector<8x64xi1>, vector<8x64xf32>
    %c4_i32_21 = arith.constant 4 : i32
    %186 = vector.broadcast %c4_i32_21 : i32 to vector<8x1xi32>
    %187 = arith.cmpi eq, %170, %186 : vector<8x1xi32>
    %188 = vector.shape_cast %187 : vector<8x1xi1> to vector<8x1xi1>
    %189 = vector.broadcast %188 : vector<8x1xi1> to vector<8x64xi1>
    %190 = arith.select %189, %6, %185 : vector<8x64xi1>, vector<8x64xf32>
    %c5_i32_22 = arith.constant 5 : i32
    %191 = vector.broadcast %c5_i32_22 : i32 to vector<8x1xi32>
    %192 = arith.cmpi eq, %170, %191 : vector<8x1xi32>
    %193 = vector.shape_cast %192 : vector<8x1xi1> to vector<8x1xi1>
    %194 = vector.broadcast %193 : vector<8x1xi1> to vector<8x64xi1>
    %195 = arith.select %194, %7, %190 : vector<8x64xi1>, vector<8x64xf32>
    %c6_i32_23 = arith.constant 6 : i32
    %196 = vector.broadcast %c6_i32_23 : i32 to vector<8x1xi32>
    %197 = arith.cmpi eq, %170, %196 : vector<8x1xi32>
    %198 = vector.shape_cast %197 : vector<8x1xi1> to vector<8x1xi1>
    %199 = vector.broadcast %198 : vector<8x1xi1> to vector<8x64xi1>
    %200 = arith.select %199, %8, %195 : vector<8x64xi1>, vector<8x64xf32>
    %c7_i32_24 = arith.constant 7 : i32
    %201 = vector.broadcast %c7_i32_24 : i32 to vector<8x1xi32>
    %202 = arith.cmpi eq, %170, %201 : vector<8x1xi32>
    %203 = vector.shape_cast %202 : vector<8x1xi1> to vector<8x1xi1>
    %204 = vector.broadcast %203 : vector<8x1xi1> to vector<8x64xi1>
    %205 = arith.select %204, %9, %200 : vector<8x64xi1>, vector<8x64xf32>
    %c8_i32_25 = arith.constant 8 : i32
    %206 = vector.broadcast %c8_i32_25 : i32 to vector<8x1xi32>
    %207 = arith.cmpi eq, %170, %206 : vector<8x1xi32>
    %208 = vector.shape_cast %207 : vector<8x1xi1> to vector<8x1xi1>
    %209 = vector.broadcast %208 : vector<8x1xi1> to vector<8x64xi1>
    %210 = arith.select %209, %10, %205 : vector<8x64xi1>, vector<8x64xf32>
    %c9_i32_26 = arith.constant 9 : i32
    %211 = vector.broadcast %c9_i32_26 : i32 to vector<8x1xi32>
    %212 = arith.cmpi eq, %170, %211 : vector<8x1xi32>
    %213 = vector.shape_cast %212 : vector<8x1xi1> to vector<8x1xi1>
    %214 = vector.broadcast %213 : vector<8x1xi1> to vector<8x64xi1>
    %215 = arith.select %214, %11, %210 : vector<8x64xi1>, vector<8x64xf32>
    %c10_i32_27 = arith.constant 10 : i32
    %216 = vector.broadcast %c10_i32_27 : i32 to vector<8x1xi32>
    %217 = arith.cmpi eq, %170, %216 : vector<8x1xi32>
    %218 = vector.shape_cast %217 : vector<8x1xi1> to vector<8x1xi1>
    %219 = vector.broadcast %218 : vector<8x1xi1> to vector<8x64xi1>
    %220 = arith.select %219, %12, %215 : vector<8x64xi1>, vector<8x64xf32>
    %c11_i32_28 = arith.constant 11 : i32
    %221 = vector.broadcast %c11_i32_28 : i32 to vector<8x1xi32>
    %222 = arith.cmpi eq, %170, %221 : vector<8x1xi32>
    %223 = vector.shape_cast %222 : vector<8x1xi1> to vector<8x1xi1>
    %224 = vector.broadcast %223 : vector<8x1xi1> to vector<8x64xi1>
    %225 = arith.select %224, %13, %220 : vector<8x64xi1>, vector<8x64xf32>
    %c12_i32_29 = arith.constant 12 : i32
    %226 = vector.broadcast %c12_i32_29 : i32 to vector<8x1xi32>
    %227 = arith.cmpi eq, %170, %226 : vector<8x1xi32>
    %228 = vector.shape_cast %227 : vector<8x1xi1> to vector<8x1xi1>
    %229 = vector.broadcast %228 : vector<8x1xi1> to vector<8x64xi1>
    %230 = arith.select %229, %14, %225 : vector<8x64xi1>, vector<8x64xf32>
    %c13_i32_30 = arith.constant 13 : i32
    %231 = vector.broadcast %c13_i32_30 : i32 to vector<8x1xi32>
    %232 = arith.cmpi eq, %170, %231 : vector<8x1xi32>
    %233 = vector.shape_cast %232 : vector<8x1xi1> to vector<8x1xi1>
    %234 = vector.broadcast %233 : vector<8x1xi1> to vector<8x64xi1>
    %235 = arith.select %234, %15, %230 : vector<8x64xi1>, vector<8x64xf32>
    %c14_i32_31 = arith.constant 14 : i32
    %236 = vector.broadcast %c14_i32_31 : i32 to vector<8x1xi32>
    %237 = arith.cmpi eq, %170, %236 : vector<8x1xi32>
    %238 = vector.shape_cast %237 : vector<8x1xi1> to vector<8x1xi1>
    %239 = vector.broadcast %238 : vector<8x1xi1> to vector<8x64xi1>
    %240 = arith.select %239, %16, %235 : vector<8x64xi1>, vector<8x64xf32>
    %c15_i32_32 = arith.constant 15 : i32
    %241 = vector.broadcast %c15_i32_32 : i32 to vector<8x1xi32>
    %242 = arith.cmpi eq, %170, %241 : vector<8x1xi32>
    %243 = vector.shape_cast %242 : vector<8x1xi1> to vector<8x1xi1>
    %244 = vector.broadcast %243 : vector<8x1xi1> to vector<8x64xi1>
    %245 = arith.select %244, %17, %240 : vector<8x64xi1>, vector<8x64xf32>
    %246 = vector.extract_strided_slice %1 {offsets = [0, 3], sizes = [8, 1], strides = [1, 1]} : vector<8x16xi32> to vector<8x1xi32>
    %c1_i32_33 = arith.constant 1 : i32
    %247 = vector.broadcast %c1_i32_33 : i32 to vector<8x1xi32>
    %248 = arith.cmpi eq, %246, %247 : vector<8x1xi32>
    %249 = vector.shape_cast %248 : vector<8x1xi1> to vector<8x1xi1>
    %250 = vector.broadcast %249 : vector<8x1xi1> to vector<8x64xi1>
    %251 = arith.select %250, %3, %2 : vector<8x64xi1>, vector<8x64xf32>
    %c2_i32_34 = arith.constant 2 : i32
    %252 = vector.broadcast %c2_i32_34 : i32 to vector<8x1xi32>
    %253 = arith.cmpi eq, %246, %252 : vector<8x1xi32>
    %254 = vector.shape_cast %253 : vector<8x1xi1> to vector<8x1xi1>
    %255 = vector.broadcast %254 : vector<8x1xi1> to vector<8x64xi1>
    %256 = arith.select %255, %4, %251 : vector<8x64xi1>, vector<8x64xf32>
    %c3_i32_35 = arith.constant 3 : i32
    %257 = vector.broadcast %c3_i32_35 : i32 to vector<8x1xi32>
    %258 = arith.cmpi eq, %246, %257 : vector<8x1xi32>
    %259 = vector.shape_cast %258 : vector<8x1xi1> to vector<8x1xi1>
    %260 = vector.broadcast %259 : vector<8x1xi1> to vector<8x64xi1>
    %261 = arith.select %260, %5, %256 : vector<8x64xi1>, vector<8x64xf32>
    %c4_i32_36 = arith.constant 4 : i32
    %262 = vector.broadcast %c4_i32_36 : i32 to vector<8x1xi32>
    %263 = arith.cmpi eq, %246, %262 : vector<8x1xi32>
    %264 = vector.shape_cast %263 : vector<8x1xi1> to vector<8x1xi1>
    %265 = vector.broadcast %264 : vector<8x1xi1> to vector<8x64xi1>
    %266 = arith.select %265, %6, %261 : vector<8x64xi1>, vector<8x64xf32>
    %c5_i32_37 = arith.constant 5 : i32
    %267 = vector.broadcast %c5_i32_37 : i32 to vector<8x1xi32>
    %268 = arith.cmpi eq, %246, %267 : vector<8x1xi32>
    %269 = vector.shape_cast %268 : vector<8x1xi1> to vector<8x1xi1>
    %270 = vector.broadcast %269 : vector<8x1xi1> to vector<8x64xi1>
    %271 = arith.select %270, %7, %266 : vector<8x64xi1>, vector<8x64xf32>
    %c6_i32_38 = arith.constant 6 : i32
    %272 = vector.broadcast %c6_i32_38 : i32 to vector<8x1xi32>
    %273 = arith.cmpi eq, %246, %272 : vector<8x1xi32>
    %274 = vector.shape_cast %273 : vector<8x1xi1> to vector<8x1xi1>
    %275 = vector.broadcast %274 : vector<8x1xi1> to vector<8x64xi1>
    %276 = arith.select %275, %8, %271 : vector<8x64xi1>, vector<8x64xf32>
    %c7_i32_39 = arith.constant 7 : i32
    %277 = vector.broadcast %c7_i32_39 : i32 to vector<8x1xi32>
    %278 = arith.cmpi eq, %246, %277 : vector<8x1xi32>
    %279 = vector.shape_cast %278 : vector<8x1xi1> to vector<8x1xi1>
    %280 = vector.broadcast %279 : vector<8x1xi1> to vector<8x64xi1>
    %281 = arith.select %280, %9, %276 : vector<8x64xi1>, vector<8x64xf32>
    %c8_i32_40 = arith.constant 8 : i32
    %282 = vector.broadcast %c8_i32_40 : i32 to vector<8x1xi32>
    %283 = arith.cmpi eq, %246, %282 : vector<8x1xi32>
    %284 = vector.shape_cast %283 : vector<8x1xi1> to vector<8x1xi1>
    %285 = vector.broadcast %284 : vector<8x1xi1> to vector<8x64xi1>
    %286 = arith.select %285, %10, %281 : vector<8x64xi1>, vector<8x64xf32>
    %c9_i32_41 = arith.constant 9 : i32
    %287 = vector.broadcast %c9_i32_41 : i32 to vector<8x1xi32>
    %288 = arith.cmpi eq, %246, %287 : vector<8x1xi32>
    %289 = vector.shape_cast %288 : vector<8x1xi1> to vector<8x1xi1>
    %290 = vector.broadcast %289 : vector<8x1xi1> to vector<8x64xi1>
    %291 = arith.select %290, %11, %286 : vector<8x64xi1>, vector<8x64xf32>
    %c10_i32_42 = arith.constant 10 : i32
    %292 = vector.broadcast %c10_i32_42 : i32 to vector<8x1xi32>
    %293 = arith.cmpi eq, %246, %292 : vector<8x1xi32>
    %294 = vector.shape_cast %293 : vector<8x1xi1> to vector<8x1xi1>
    %295 = vector.broadcast %294 : vector<8x1xi1> to vector<8x64xi1>
    %296 = arith.select %295, %12, %291 : vector<8x64xi1>, vector<8x64xf32>
    %c11_i32_43 = arith.constant 11 : i32
    %297 = vector.broadcast %c11_i32_43 : i32 to vector<8x1xi32>
    %298 = arith.cmpi eq, %246, %297 : vector<8x1xi32>
    %299 = vector.shape_cast %298 : vector<8x1xi1> to vector<8x1xi1>
    %300 = vector.broadcast %299 : vector<8x1xi1> to vector<8x64xi1>
    %301 = arith.select %300, %13, %296 : vector<8x64xi1>, vector<8x64xf32>
    %c12_i32_44 = arith.constant 12 : i32
    %302 = vector.broadcast %c12_i32_44 : i32 to vector<8x1xi32>
    %303 = arith.cmpi eq, %246, %302 : vector<8x1xi32>
    %304 = vector.shape_cast %303 : vector<8x1xi1> to vector<8x1xi1>
    %305 = vector.broadcast %304 : vector<8x1xi1> to vector<8x64xi1>
    %306 = arith.select %305, %14, %301 : vector<8x64xi1>, vector<8x64xf32>
    %c13_i32_45 = arith.constant 13 : i32
    %307 = vector.broadcast %c13_i32_45 : i32 to vector<8x1xi32>
    %308 = arith.cmpi eq, %246, %307 : vector<8x1xi32>
    %309 = vector.shape_cast %308 : vector<8x1xi1> to vector<8x1xi1>
    %310 = vector.broadcast %309 : vector<8x1xi1> to vector<8x64xi1>
    %311 = arith.select %310, %15, %306 : vector<8x64xi1>, vector<8x64xf32>
    %c14_i32_46 = arith.constant 14 : i32
    %312 = vector.broadcast %c14_i32_46 : i32 to vector<8x1xi32>
    %313 = arith.cmpi eq, %246, %312 : vector<8x1xi32>
    %314 = vector.shape_cast %313 : vector<8x1xi1> to vector<8x1xi1>
    %315 = vector.broadcast %314 : vector<8x1xi1> to vector<8x64xi1>
    %316 = arith.select %315, %16, %311 : vector<8x64xi1>, vector<8x64xf32>
    %c15_i32_47 = arith.constant 15 : i32
    %317 = vector.broadcast %c15_i32_47 : i32 to vector<8x1xi32>
    %318 = arith.cmpi eq, %246, %317 : vector<8x1xi32>
    %319 = vector.shape_cast %318 : vector<8x1xi1> to vector<8x1xi1>
    %320 = vector.broadcast %319 : vector<8x1xi1> to vector<8x64xi1>
    %321 = arith.select %320, %17, %316 : vector<8x64xi1>, vector<8x64xf32>
    %322 = vector.extract_strided_slice %1 {offsets = [0, 4], sizes = [8, 1], strides = [1, 1]} : vector<8x16xi32> to vector<8x1xi32>
    %c1_i32_48 = arith.constant 1 : i32
    %323 = vector.broadcast %c1_i32_48 : i32 to vector<8x1xi32>
    %324 = arith.cmpi eq, %322, %323 : vector<8x1xi32>
    %325 = vector.shape_cast %324 : vector<8x1xi1> to vector<8x1xi1>
    %326 = vector.broadcast %325 : vector<8x1xi1> to vector<8x64xi1>
    %327 = arith.select %326, %3, %2 : vector<8x64xi1>, vector<8x64xf32>
    %c2_i32_49 = arith.constant 2 : i32
    %328 = vector.broadcast %c2_i32_49 : i32 to vector<8x1xi32>
    %329 = arith.cmpi eq, %322, %328 : vector<8x1xi32>
    %330 = vector.shape_cast %329 : vector<8x1xi1> to vector<8x1xi1>
    %331 = vector.broadcast %330 : vector<8x1xi1> to vector<8x64xi1>
    %332 = arith.select %331, %4, %327 : vector<8x64xi1>, vector<8x64xf32>
    %c3_i32_50 = arith.constant 3 : i32
    %333 = vector.broadcast %c3_i32_50 : i32 to vector<8x1xi32>
    %334 = arith.cmpi eq, %322, %333 : vector<8x1xi32>
    %335 = vector.shape_cast %334 : vector<8x1xi1> to vector<8x1xi1>
    %336 = vector.broadcast %335 : vector<8x1xi1> to vector<8x64xi1>
    %337 = arith.select %336, %5, %332 : vector<8x64xi1>, vector<8x64xf32>
    %c4_i32_51 = arith.constant 4 : i32
    %338 = vector.broadcast %c4_i32_51 : i32 to vector<8x1xi32>
    %339 = arith.cmpi eq, %322, %338 : vector<8x1xi32>
    %340 = vector.shape_cast %339 : vector<8x1xi1> to vector<8x1xi1>
    %341 = vector.broadcast %340 : vector<8x1xi1> to vector<8x64xi1>
    %342 = arith.select %341, %6, %337 : vector<8x64xi1>, vector<8x64xf32>
    %c5_i32_52 = arith.constant 5 : i32
    %343 = vector.broadcast %c5_i32_52 : i32 to vector<8x1xi32>
    %344 = arith.cmpi eq, %322, %343 : vector<8x1xi32>
    %345 = vector.shape_cast %344 : vector<8x1xi1> to vector<8x1xi1>
    %346 = vector.broadcast %345 : vector<8x1xi1> to vector<8x64xi1>
    %347 = arith.select %346, %7, %342 : vector<8x64xi1>, vector<8x64xf32>
    %c6_i32_53 = arith.constant 6 : i32
    %348 = vector.broadcast %c6_i32_53 : i32 to vector<8x1xi32>
    %349 = arith.cmpi eq, %322, %348 : vector<8x1xi32>
    %350 = vector.shape_cast %349 : vector<8x1xi1> to vector<8x1xi1>
    %351 = vector.broadcast %350 : vector<8x1xi1> to vector<8x64xi1>
    %352 = arith.select %351, %8, %347 : vector<8x64xi1>, vector<8x64xf32>
    %c7_i32_54 = arith.constant 7 : i32
    %353 = vector.broadcast %c7_i32_54 : i32 to vector<8x1xi32>
    %354 = arith.cmpi eq, %322, %353 : vector<8x1xi32>
    %355 = vector.shape_cast %354 : vector<8x1xi1> to vector<8x1xi1>
    %356 = vector.broadcast %355 : vector<8x1xi1> to vector<8x64xi1>
    %357 = arith.select %356, %9, %352 : vector<8x64xi1>, vector<8x64xf32>
    %c8_i32_55 = arith.constant 8 : i32
    %358 = vector.broadcast %c8_i32_55 : i32 to vector<8x1xi32>
    %359 = arith.cmpi eq, %322, %358 : vector<8x1xi32>
    %360 = vector.shape_cast %359 : vector<8x1xi1> to vector<8x1xi1>
    %361 = vector.broadcast %360 : vector<8x1xi1> to vector<8x64xi1>
    %362 = arith.select %361, %10, %357 : vector<8x64xi1>, vector<8x64xf32>
    %c9_i32_56 = arith.constant 9 : i32
    %363 = vector.broadcast %c9_i32_56 : i32 to vector<8x1xi32>
    %364 = arith.cmpi eq, %322, %363 : vector<8x1xi32>
    %365 = vector.shape_cast %364 : vector<8x1xi1> to vector<8x1xi1>
    %366 = vector.broadcast %365 : vector<8x1xi1> to vector<8x64xi1>
    %367 = arith.select %366, %11, %362 : vector<8x64xi1>, vector<8x64xf32>
    %c10_i32_57 = arith.constant 10 : i32
    %368 = vector.broadcast %c10_i32_57 : i32 to vector<8x1xi32>
    %369 = arith.cmpi eq, %322, %368 : vector<8x1xi32>
    %370 = vector.shape_cast %369 : vector<8x1xi1> to vector<8x1xi1>
    %371 = vector.broadcast %370 : vector<8x1xi1> to vector<8x64xi1>
    %372 = arith.select %371, %12, %367 : vector<8x64xi1>, vector<8x64xf32>
    %c11_i32_58 = arith.constant 11 : i32
    %373 = vector.broadcast %c11_i32_58 : i32 to vector<8x1xi32>
    %374 = arith.cmpi eq, %322, %373 : vector<8x1xi32>
    %375 = vector.shape_cast %374 : vector<8x1xi1> to vector<8x1xi1>
    %376 = vector.broadcast %375 : vector<8x1xi1> to vector<8x64xi1>
    %377 = arith.select %376, %13, %372 : vector<8x64xi1>, vector<8x64xf32>
    %c12_i32_59 = arith.constant 12 : i32
    %378 = vector.broadcast %c12_i32_59 : i32 to vector<8x1xi32>
    %379 = arith.cmpi eq, %322, %378 : vector<8x1xi32>
    %380 = vector.shape_cast %379 : vector<8x1xi1> to vector<8x1xi1>
    %381 = vector.broadcast %380 : vector<8x1xi1> to vector<8x64xi1>
    %382 = arith.select %381, %14, %377 : vector<8x64xi1>, vector<8x64xf32>
    %c13_i32_60 = arith.constant 13 : i32
    %383 = vector.broadcast %c13_i32_60 : i32 to vector<8x1xi32>
    %384 = arith.cmpi eq, %322, %383 : vector<8x1xi32>
    %385 = vector.shape_cast %384 : vector<8x1xi1> to vector<8x1xi1>
    %386 = vector.broadcast %385 : vector<8x1xi1> to vector<8x64xi1>
    %387 = arith.select %386, %15, %382 : vector<8x64xi1>, vector<8x64xf32>
    %c14_i32_61 = arith.constant 14 : i32
    %388 = vector.broadcast %c14_i32_61 : i32 to vector<8x1xi32>
    %389 = arith.cmpi eq, %322, %388 : vector<8x1xi32>
    %390 = vector.shape_cast %389 : vector<8x1xi1> to vector<8x1xi1>
    %391 = vector.broadcast %390 : vector<8x1xi1> to vector<8x64xi1>
    %392 = arith.select %391, %16, %387 : vector<8x64xi1>, vector<8x64xf32>
    %c15_i32_62 = arith.constant 15 : i32
    %393 = vector.broadcast %c15_i32_62 : i32 to vector<8x1xi32>
    %394 = arith.cmpi eq, %322, %393 : vector<8x1xi32>
    %395 = vector.shape_cast %394 : vector<8x1xi1> to vector<8x1xi1>
    %396 = vector.broadcast %395 : vector<8x1xi1> to vector<8x64xi1>
    %397 = arith.select %396, %17, %392 : vector<8x64xi1>, vector<8x64xf32>
    %398 = vector.extract_strided_slice %1 {offsets = [0, 5], sizes = [8, 1], strides = [1, 1]} : vector<8x16xi32> to vector<8x1xi32>
    %c1_i32_63 = arith.constant 1 : i32
    %399 = vector.broadcast %c1_i32_63 : i32 to vector<8x1xi32>
    %400 = arith.cmpi eq, %398, %399 : vector<8x1xi32>
    %401 = vector.shape_cast %400 : vector<8x1xi1> to vector<8x1xi1>
    %402 = vector.broadcast %401 : vector<8x1xi1> to vector<8x64xi1>
    %403 = arith.select %402, %3, %2 : vector<8x64xi1>, vector<8x64xf32>
    %c2_i32_64 = arith.constant 2 : i32
    %404 = vector.broadcast %c2_i32_64 : i32 to vector<8x1xi32>
    %405 = arith.cmpi eq, %398, %404 : vector<8x1xi32>
    %406 = vector.shape_cast %405 : vector<8x1xi1> to vector<8x1xi1>
    %407 = vector.broadcast %406 : vector<8x1xi1> to vector<8x64xi1>
    %408 = arith.select %407, %4, %403 : vector<8x64xi1>, vector<8x64xf32>
    %c3_i32_65 = arith.constant 3 : i32
    %409 = vector.broadcast %c3_i32_65 : i32 to vector<8x1xi32>
    %410 = arith.cmpi eq, %398, %409 : vector<8x1xi32>
    %411 = vector.shape_cast %410 : vector<8x1xi1> to vector<8x1xi1>
    %412 = vector.broadcast %411 : vector<8x1xi1> to vector<8x64xi1>
    %413 = arith.select %412, %5, %408 : vector<8x64xi1>, vector<8x64xf32>
    %c4_i32_66 = arith.constant 4 : i32
    %414 = vector.broadcast %c4_i32_66 : i32 to vector<8x1xi32>
    %415 = arith.cmpi eq, %398, %414 : vector<8x1xi32>
    %416 = vector.shape_cast %415 : vector<8x1xi1> to vector<8x1xi1>
    %417 = vector.broadcast %416 : vector<8x1xi1> to vector<8x64xi1>
    %418 = arith.select %417, %6, %413 : vector<8x64xi1>, vector<8x64xf32>
    %c5_i32_67 = arith.constant 5 : i32
    %419 = vector.broadcast %c5_i32_67 : i32 to vector<8x1xi32>
    %420 = arith.cmpi eq, %398, %419 : vector<8x1xi32>
    %421 = vector.shape_cast %420 : vector<8x1xi1> to vector<8x1xi1>
    %422 = vector.broadcast %421 : vector<8x1xi1> to vector<8x64xi1>
    %423 = arith.select %422, %7, %418 : vector<8x64xi1>, vector<8x64xf32>
    %c6_i32_68 = arith.constant 6 : i32
    %424 = vector.broadcast %c6_i32_68 : i32 to vector<8x1xi32>
    %425 = arith.cmpi eq, %398, %424 : vector<8x1xi32>
    %426 = vector.shape_cast %425 : vector<8x1xi1> to vector<8x1xi1>
    %427 = vector.broadcast %426 : vector<8x1xi1> to vector<8x64xi1>
    %428 = arith.select %427, %8, %423 : vector<8x64xi1>, vector<8x64xf32>
    %c7_i32_69 = arith.constant 7 : i32
    %429 = vector.broadcast %c7_i32_69 : i32 to vector<8x1xi32>
    %430 = arith.cmpi eq, %398, %429 : vector<8x1xi32>
    %431 = vector.shape_cast %430 : vector<8x1xi1> to vector<8x1xi1>
    %432 = vector.broadcast %431 : vector<8x1xi1> to vector<8x64xi1>
    %433 = arith.select %432, %9, %428 : vector<8x64xi1>, vector<8x64xf32>
    %c8_i32_70 = arith.constant 8 : i32
    %434 = vector.broadcast %c8_i32_70 : i32 to vector<8x1xi32>
    %435 = arith.cmpi eq, %398, %434 : vector<8x1xi32>
    %436 = vector.shape_cast %435 : vector<8x1xi1> to vector<8x1xi1>
    %437 = vector.broadcast %436 : vector<8x1xi1> to vector<8x64xi1>
    %438 = arith.select %437, %10, %433 : vector<8x64xi1>, vector<8x64xf32>
    %c9_i32_71 = arith.constant 9 : i32
    %439 = vector.broadcast %c9_i32_71 : i32 to vector<8x1xi32>
    %440 = arith.cmpi eq, %398, %439 : vector<8x1xi32>
    %441 = vector.shape_cast %440 : vector<8x1xi1> to vector<8x1xi1>
    %442 = vector.broadcast %441 : vector<8x1xi1> to vector<8x64xi1>
    %443 = arith.select %442, %11, %438 : vector<8x64xi1>, vector<8x64xf32>
    %c10_i32_72 = arith.constant 10 : i32
    %444 = vector.broadcast %c10_i32_72 : i32 to vector<8x1xi32>
    %445 = arith.cmpi eq, %398, %444 : vector<8x1xi32>
    %446 = vector.shape_cast %445 : vector<8x1xi1> to vector<8x1xi1>
    %447 = vector.broadcast %446 : vector<8x1xi1> to vector<8x64xi1>
    %448 = arith.select %447, %12, %443 : vector<8x64xi1>, vector<8x64xf32>
    %c11_i32_73 = arith.constant 11 : i32
    %449 = vector.broadcast %c11_i32_73 : i32 to vector<8x1xi32>
    %450 = arith.cmpi eq, %398, %449 : vector<8x1xi32>
    %451 = vector.shape_cast %450 : vector<8x1xi1> to vector<8x1xi1>
    %452 = vector.broadcast %451 : vector<8x1xi1> to vector<8x64xi1>
    %453 = arith.select %452, %13, %448 : vector<8x64xi1>, vector<8x64xf32>
    %c12_i32_74 = arith.constant 12 : i32
    %454 = vector.broadcast %c12_i32_74 : i32 to vector<8x1xi32>
    %455 = arith.cmpi eq, %398, %454 : vector<8x1xi32>
    %456 = vector.shape_cast %455 : vector<8x1xi1> to vector<8x1xi1>
    %457 = vector.broadcast %456 : vector<8x1xi1> to vector<8x64xi1>
    %458 = arith.select %457, %14, %453 : vector<8x64xi1>, vector<8x64xf32>
    %c13_i32_75 = arith.constant 13 : i32
    %459 = vector.broadcast %c13_i32_75 : i32 to vector<8x1xi32>
    %460 = arith.cmpi eq, %398, %459 : vector<8x1xi32>
    %461 = vector.shape_cast %460 : vector<8x1xi1> to vector<8x1xi1>
    %462 = vector.broadcast %461 : vector<8x1xi1> to vector<8x64xi1>
    %463 = arith.select %462, %15, %458 : vector<8x64xi1>, vector<8x64xf32>
    %c14_i32_76 = arith.constant 14 : i32
    %464 = vector.broadcast %c14_i32_76 : i32 to vector<8x1xi32>
    %465 = arith.cmpi eq, %398, %464 : vector<8x1xi32>
    %466 = vector.shape_cast %465 : vector<8x1xi1> to vector<8x1xi1>
    %467 = vector.broadcast %466 : vector<8x1xi1> to vector<8x64xi1>
    %468 = arith.select %467, %16, %463 : vector<8x64xi1>, vector<8x64xf32>
    %c15_i32_77 = arith.constant 15 : i32
    %469 = vector.broadcast %c15_i32_77 : i32 to vector<8x1xi32>
    %470 = arith.cmpi eq, %398, %469 : vector<8x1xi32>
    %471 = vector.shape_cast %470 : vector<8x1xi1> to vector<8x1xi1>
    %472 = vector.broadcast %471 : vector<8x1xi1> to vector<8x64xi1>
    %473 = arith.select %472, %17, %468 : vector<8x64xi1>, vector<8x64xf32>
    %474 = vector.extract_strided_slice %1 {offsets = [0, 6], sizes = [8, 1], strides = [1, 1]} : vector<8x16xi32> to vector<8x1xi32>
    %c1_i32_78 = arith.constant 1 : i32
    %475 = vector.broadcast %c1_i32_78 : i32 to vector<8x1xi32>
    %476 = arith.cmpi eq, %474, %475 : vector<8x1xi32>
    %477 = vector.shape_cast %476 : vector<8x1xi1> to vector<8x1xi1>
    %478 = vector.broadcast %477 : vector<8x1xi1> to vector<8x64xi1>
    %479 = arith.select %478, %3, %2 : vector<8x64xi1>, vector<8x64xf32>
    %c2_i32_79 = arith.constant 2 : i32
    %480 = vector.broadcast %c2_i32_79 : i32 to vector<8x1xi32>
    %481 = arith.cmpi eq, %474, %480 : vector<8x1xi32>
    %482 = vector.shape_cast %481 : vector<8x1xi1> to vector<8x1xi1>
    %483 = vector.broadcast %482 : vector<8x1xi1> to vector<8x64xi1>
    %484 = arith.select %483, %4, %479 : vector<8x64xi1>, vector<8x64xf32>
    %c3_i32_80 = arith.constant 3 : i32
    %485 = vector.broadcast %c3_i32_80 : i32 to vector<8x1xi32>
    %486 = arith.cmpi eq, %474, %485 : vector<8x1xi32>
    %487 = vector.shape_cast %486 : vector<8x1xi1> to vector<8x1xi1>
    %488 = vector.broadcast %487 : vector<8x1xi1> to vector<8x64xi1>
    %489 = arith.select %488, %5, %484 : vector<8x64xi1>, vector<8x64xf32>
    %c4_i32_81 = arith.constant 4 : i32
    %490 = vector.broadcast %c4_i32_81 : i32 to vector<8x1xi32>
    %491 = arith.cmpi eq, %474, %490 : vector<8x1xi32>
    %492 = vector.shape_cast %491 : vector<8x1xi1> to vector<8x1xi1>
    %493 = vector.broadcast %492 : vector<8x1xi1> to vector<8x64xi1>
    %494 = arith.select %493, %6, %489 : vector<8x64xi1>, vector<8x64xf32>
    %c5_i32_82 = arith.constant 5 : i32
    %495 = vector.broadcast %c5_i32_82 : i32 to vector<8x1xi32>
    %496 = arith.cmpi eq, %474, %495 : vector<8x1xi32>
    %497 = vector.shape_cast %496 : vector<8x1xi1> to vector<8x1xi1>
    %498 = vector.broadcast %497 : vector<8x1xi1> to vector<8x64xi1>
    %499 = arith.select %498, %7, %494 : vector<8x64xi1>, vector<8x64xf32>
    %c6_i32_83 = arith.constant 6 : i32
    %500 = vector.broadcast %c6_i32_83 : i32 to vector<8x1xi32>
    %501 = arith.cmpi eq, %474, %500 : vector<8x1xi32>
    %502 = vector.shape_cast %501 : vector<8x1xi1> to vector<8x1xi1>
    %503 = vector.broadcast %502 : vector<8x1xi1> to vector<8x64xi1>
    %504 = arith.select %503, %8, %499 : vector<8x64xi1>, vector<8x64xf32>
    %c7_i32_84 = arith.constant 7 : i32
    %505 = vector.broadcast %c7_i32_84 : i32 to vector<8x1xi32>
    %506 = arith.cmpi eq, %474, %505 : vector<8x1xi32>
    %507 = vector.shape_cast %506 : vector<8x1xi1> to vector<8x1xi1>
    %508 = vector.broadcast %507 : vector<8x1xi1> to vector<8x64xi1>
    %509 = arith.select %508, %9, %504 : vector<8x64xi1>, vector<8x64xf32>
    %c8_i32_85 = arith.constant 8 : i32
    %510 = vector.broadcast %c8_i32_85 : i32 to vector<8x1xi32>
    %511 = arith.cmpi eq, %474, %510 : vector<8x1xi32>
    %512 = vector.shape_cast %511 : vector<8x1xi1> to vector<8x1xi1>
    %513 = vector.broadcast %512 : vector<8x1xi1> to vector<8x64xi1>
    %514 = arith.select %513, %10, %509 : vector<8x64xi1>, vector<8x64xf32>
    %c9_i32_86 = arith.constant 9 : i32
    %515 = vector.broadcast %c9_i32_86 : i32 to vector<8x1xi32>
    %516 = arith.cmpi eq, %474, %515 : vector<8x1xi32>
    %517 = vector.shape_cast %516 : vector<8x1xi1> to vector<8x1xi1>
    %518 = vector.broadcast %517 : vector<8x1xi1> to vector<8x64xi1>
    %519 = arith.select %518, %11, %514 : vector<8x64xi1>, vector<8x64xf32>
    %c10_i32_87 = arith.constant 10 : i32
    %520 = vector.broadcast %c10_i32_87 : i32 to vector<8x1xi32>
    %521 = arith.cmpi eq, %474, %520 : vector<8x1xi32>
    %522 = vector.shape_cast %521 : vector<8x1xi1> to vector<8x1xi1>
    %523 = vector.broadcast %522 : vector<8x1xi1> to vector<8x64xi1>
    %524 = arith.select %523, %12, %519 : vector<8x64xi1>, vector<8x64xf32>
    %c11_i32_88 = arith.constant 11 : i32
    %525 = vector.broadcast %c11_i32_88 : i32 to vector<8x1xi32>
    %526 = arith.cmpi eq, %474, %525 : vector<8x1xi32>
    %527 = vector.shape_cast %526 : vector<8x1xi1> to vector<8x1xi1>
    %528 = vector.broadcast %527 : vector<8x1xi1> to vector<8x64xi1>
    %529 = arith.select %528, %13, %524 : vector<8x64xi1>, vector<8x64xf32>
    %c12_i32_89 = arith.constant 12 : i32
    %530 = vector.broadcast %c12_i32_89 : i32 to vector<8x1xi32>
    %531 = arith.cmpi eq, %474, %530 : vector<8x1xi32>
    %532 = vector.shape_cast %531 : vector<8x1xi1> to vector<8x1xi1>
    %533 = vector.broadcast %532 : vector<8x1xi1> to vector<8x64xi1>
    %534 = arith.select %533, %14, %529 : vector<8x64xi1>, vector<8x64xf32>
    %c13_i32_90 = arith.constant 13 : i32
    %535 = vector.broadcast %c13_i32_90 : i32 to vector<8x1xi32>
    %536 = arith.cmpi eq, %474, %535 : vector<8x1xi32>
    %537 = vector.shape_cast %536 : vector<8x1xi1> to vector<8x1xi1>
    %538 = vector.broadcast %537 : vector<8x1xi1> to vector<8x64xi1>
    %539 = arith.select %538, %15, %534 : vector<8x64xi1>, vector<8x64xf32>
    %c14_i32_91 = arith.constant 14 : i32
    %540 = vector.broadcast %c14_i32_91 : i32 to vector<8x1xi32>
    %541 = arith.cmpi eq, %474, %540 : vector<8x1xi32>
    %542 = vector.shape_cast %541 : vector<8x1xi1> to vector<8x1xi1>
    %543 = vector.broadcast %542 : vector<8x1xi1> to vector<8x64xi1>
    %544 = arith.select %543, %16, %539 : vector<8x64xi1>, vector<8x64xf32>
    %c15_i32_92 = arith.constant 15 : i32
    %545 = vector.broadcast %c15_i32_92 : i32 to vector<8x1xi32>
    %546 = arith.cmpi eq, %474, %545 : vector<8x1xi32>
    %547 = vector.shape_cast %546 : vector<8x1xi1> to vector<8x1xi1>
    %548 = vector.broadcast %547 : vector<8x1xi1> to vector<8x64xi1>
    %549 = arith.select %548, %17, %544 : vector<8x64xi1>, vector<8x64xf32>
    %550 = vector.extract_strided_slice %1 {offsets = [0, 7], sizes = [8, 1], strides = [1, 1]} : vector<8x16xi32> to vector<8x1xi32>
    %c1_i32_93 = arith.constant 1 : i32
    %551 = vector.broadcast %c1_i32_93 : i32 to vector<8x1xi32>
    %552 = arith.cmpi eq, %550, %551 : vector<8x1xi32>
    %553 = vector.shape_cast %552 : vector<8x1xi1> to vector<8x1xi1>
    %554 = vector.broadcast %553 : vector<8x1xi1> to vector<8x64xi1>
    %555 = arith.select %554, %3, %2 : vector<8x64xi1>, vector<8x64xf32>
    %c2_i32_94 = arith.constant 2 : i32
    %556 = vector.broadcast %c2_i32_94 : i32 to vector<8x1xi32>
    %557 = arith.cmpi eq, %550, %556 : vector<8x1xi32>
    %558 = vector.shape_cast %557 : vector<8x1xi1> to vector<8x1xi1>
    %559 = vector.broadcast %558 : vector<8x1xi1> to vector<8x64xi1>
    %560 = arith.select %559, %4, %555 : vector<8x64xi1>, vector<8x64xf32>
    %c3_i32_95 = arith.constant 3 : i32
    %561 = vector.broadcast %c3_i32_95 : i32 to vector<8x1xi32>
    %562 = arith.cmpi eq, %550, %561 : vector<8x1xi32>
    %563 = vector.shape_cast %562 : vector<8x1xi1> to vector<8x1xi1>
    %564 = vector.broadcast %563 : vector<8x1xi1> to vector<8x64xi1>
    %565 = arith.select %564, %5, %560 : vector<8x64xi1>, vector<8x64xf32>
    %c4_i32_96 = arith.constant 4 : i32
    %566 = vector.broadcast %c4_i32_96 : i32 to vector<8x1xi32>
    %567 = arith.cmpi eq, %550, %566 : vector<8x1xi32>
    %568 = vector.shape_cast %567 : vector<8x1xi1> to vector<8x1xi1>
    %569 = vector.broadcast %568 : vector<8x1xi1> to vector<8x64xi1>
    %570 = arith.select %569, %6, %565 : vector<8x64xi1>, vector<8x64xf32>
    %c5_i32_97 = arith.constant 5 : i32
    %571 = vector.broadcast %c5_i32_97 : i32 to vector<8x1xi32>
    %572 = arith.cmpi eq, %550, %571 : vector<8x1xi32>
    %573 = vector.shape_cast %572 : vector<8x1xi1> to vector<8x1xi1>
    %574 = vector.broadcast %573 : vector<8x1xi1> to vector<8x64xi1>
    %575 = arith.select %574, %7, %570 : vector<8x64xi1>, vector<8x64xf32>
    %c6_i32_98 = arith.constant 6 : i32
    %576 = vector.broadcast %c6_i32_98 : i32 to vector<8x1xi32>
    %577 = arith.cmpi eq, %550, %576 : vector<8x1xi32>
    %578 = vector.shape_cast %577 : vector<8x1xi1> to vector<8x1xi1>
    %579 = vector.broadcast %578 : vector<8x1xi1> to vector<8x64xi1>
    %580 = arith.select %579, %8, %575 : vector<8x64xi1>, vector<8x64xf32>
    %c7_i32_99 = arith.constant 7 : i32
    %581 = vector.broadcast %c7_i32_99 : i32 to vector<8x1xi32>
    %582 = arith.cmpi eq, %550, %581 : vector<8x1xi32>
    %583 = vector.shape_cast %582 : vector<8x1xi1> to vector<8x1xi1>
    %584 = vector.broadcast %583 : vector<8x1xi1> to vector<8x64xi1>
    %585 = arith.select %584, %9, %580 : vector<8x64xi1>, vector<8x64xf32>
    %c8_i32_100 = arith.constant 8 : i32
    %586 = vector.broadcast %c8_i32_100 : i32 to vector<8x1xi32>
    %587 = arith.cmpi eq, %550, %586 : vector<8x1xi32>
    %588 = vector.shape_cast %587 : vector<8x1xi1> to vector<8x1xi1>
    %589 = vector.broadcast %588 : vector<8x1xi1> to vector<8x64xi1>
    %590 = arith.select %589, %10, %585 : vector<8x64xi1>, vector<8x64xf32>
    %c9_i32_101 = arith.constant 9 : i32
    %591 = vector.broadcast %c9_i32_101 : i32 to vector<8x1xi32>
    %592 = arith.cmpi eq, %550, %591 : vector<8x1xi32>
    %593 = vector.shape_cast %592 : vector<8x1xi1> to vector<8x1xi1>
    %594 = vector.broadcast %593 : vector<8x1xi1> to vector<8x64xi1>
    %595 = arith.select %594, %11, %590 : vector<8x64xi1>, vector<8x64xf32>
    %c10_i32_102 = arith.constant 10 : i32
    %596 = vector.broadcast %c10_i32_102 : i32 to vector<8x1xi32>
    %597 = arith.cmpi eq, %550, %596 : vector<8x1xi32>
    %598 = vector.shape_cast %597 : vector<8x1xi1> to vector<8x1xi1>
    %599 = vector.broadcast %598 : vector<8x1xi1> to vector<8x64xi1>
    %600 = arith.select %599, %12, %595 : vector<8x64xi1>, vector<8x64xf32>
    %c11_i32_103 = arith.constant 11 : i32
    %601 = vector.broadcast %c11_i32_103 : i32 to vector<8x1xi32>
    %602 = arith.cmpi eq, %550, %601 : vector<8x1xi32>
    %603 = vector.shape_cast %602 : vector<8x1xi1> to vector<8x1xi1>
    %604 = vector.broadcast %603 : vector<8x1xi1> to vector<8x64xi1>
    %605 = arith.select %604, %13, %600 : vector<8x64xi1>, vector<8x64xf32>
    %c12_i32_104 = arith.constant 12 : i32
    %606 = vector.broadcast %c12_i32_104 : i32 to vector<8x1xi32>
    %607 = arith.cmpi eq, %550, %606 : vector<8x1xi32>
    %608 = vector.shape_cast %607 : vector<8x1xi1> to vector<8x1xi1>
    %609 = vector.broadcast %608 : vector<8x1xi1> to vector<8x64xi1>
    %610 = arith.select %609, %14, %605 : vector<8x64xi1>, vector<8x64xf32>
    %c13_i32_105 = arith.constant 13 : i32
    %611 = vector.broadcast %c13_i32_105 : i32 to vector<8x1xi32>
    %612 = arith.cmpi eq, %550, %611 : vector<8x1xi32>
    %613 = vector.shape_cast %612 : vector<8x1xi1> to vector<8x1xi1>
    %614 = vector.broadcast %613 : vector<8x1xi1> to vector<8x64xi1>
    %615 = arith.select %614, %15, %610 : vector<8x64xi1>, vector<8x64xf32>
    %c14_i32_106 = arith.constant 14 : i32
    %616 = vector.broadcast %c14_i32_106 : i32 to vector<8x1xi32>
    %617 = arith.cmpi eq, %550, %616 : vector<8x1xi32>
    %618 = vector.shape_cast %617 : vector<8x1xi1> to vector<8x1xi1>
    %619 = vector.broadcast %618 : vector<8x1xi1> to vector<8x64xi1>
    %620 = arith.select %619, %16, %615 : vector<8x64xi1>, vector<8x64xf32>
    %c15_i32_107 = arith.constant 15 : i32
    %621 = vector.broadcast %c15_i32_107 : i32 to vector<8x1xi32>
    %622 = arith.cmpi eq, %550, %621 : vector<8x1xi32>
    %623 = vector.shape_cast %622 : vector<8x1xi1> to vector<8x1xi1>
    %624 = vector.broadcast %623 : vector<8x1xi1> to vector<8x64xi1>
    %625 = arith.select %624, %17, %620 : vector<8x64xi1>, vector<8x64xf32>
    %626 = vector.extract_strided_slice %1 {offsets = [0, 8], sizes = [8, 1], strides = [1, 1]} : vector<8x16xi32> to vector<8x1xi32>
    %c1_i32_108 = arith.constant 1 : i32
    %627 = vector.broadcast %c1_i32_108 : i32 to vector<8x1xi32>
    %628 = arith.cmpi eq, %626, %627 : vector<8x1xi32>
    %629 = vector.shape_cast %628 : vector<8x1xi1> to vector<8x1xi1>
    %630 = vector.broadcast %629 : vector<8x1xi1> to vector<8x64xi1>
    %631 = arith.select %630, %3, %2 : vector<8x64xi1>, vector<8x64xf32>
    %c2_i32_109 = arith.constant 2 : i32
    %632 = vector.broadcast %c2_i32_109 : i32 to vector<8x1xi32>
    %633 = arith.cmpi eq, %626, %632 : vector<8x1xi32>
    %634 = vector.shape_cast %633 : vector<8x1xi1> to vector<8x1xi1>
    %635 = vector.broadcast %634 : vector<8x1xi1> to vector<8x64xi1>
    %636 = arith.select %635, %4, %631 : vector<8x64xi1>, vector<8x64xf32>
    %c3_i32_110 = arith.constant 3 : i32
    %637 = vector.broadcast %c3_i32_110 : i32 to vector<8x1xi32>
    %638 = arith.cmpi eq, %626, %637 : vector<8x1xi32>
    %639 = vector.shape_cast %638 : vector<8x1xi1> to vector<8x1xi1>
    %640 = vector.broadcast %639 : vector<8x1xi1> to vector<8x64xi1>
    %641 = arith.select %640, %5, %636 : vector<8x64xi1>, vector<8x64xf32>
    %c4_i32_111 = arith.constant 4 : i32
    %642 = vector.broadcast %c4_i32_111 : i32 to vector<8x1xi32>
    %643 = arith.cmpi eq, %626, %642 : vector<8x1xi32>
    %644 = vector.shape_cast %643 : vector<8x1xi1> to vector<8x1xi1>
    %645 = vector.broadcast %644 : vector<8x1xi1> to vector<8x64xi1>
    %646 = arith.select %645, %6, %641 : vector<8x64xi1>, vector<8x64xf32>
    %c5_i32_112 = arith.constant 5 : i32
    %647 = vector.broadcast %c5_i32_112 : i32 to vector<8x1xi32>
    %648 = arith.cmpi eq, %626, %647 : vector<8x1xi32>
    %649 = vector.shape_cast %648 : vector<8x1xi1> to vector<8x1xi1>
    %650 = vector.broadcast %649 : vector<8x1xi1> to vector<8x64xi1>
    %651 = arith.select %650, %7, %646 : vector<8x64xi1>, vector<8x64xf32>
    %c6_i32_113 = arith.constant 6 : i32
    %652 = vector.broadcast %c6_i32_113 : i32 to vector<8x1xi32>
    %653 = arith.cmpi eq, %626, %652 : vector<8x1xi32>
    %654 = vector.shape_cast %653 : vector<8x1xi1> to vector<8x1xi1>
    %655 = vector.broadcast %654 : vector<8x1xi1> to vector<8x64xi1>
    %656 = arith.select %655, %8, %651 : vector<8x64xi1>, vector<8x64xf32>
    %c7_i32_114 = arith.constant 7 : i32
    %657 = vector.broadcast %c7_i32_114 : i32 to vector<8x1xi32>
    %658 = arith.cmpi eq, %626, %657 : vector<8x1xi32>
    %659 = vector.shape_cast %658 : vector<8x1xi1> to vector<8x1xi1>
    %660 = vector.broadcast %659 : vector<8x1xi1> to vector<8x64xi1>
    %661 = arith.select %660, %9, %656 : vector<8x64xi1>, vector<8x64xf32>
    %c8_i32_115 = arith.constant 8 : i32
    %662 = vector.broadcast %c8_i32_115 : i32 to vector<8x1xi32>
    %663 = arith.cmpi eq, %626, %662 : vector<8x1xi32>
    %664 = vector.shape_cast %663 : vector<8x1xi1> to vector<8x1xi1>
    %665 = vector.broadcast %664 : vector<8x1xi1> to vector<8x64xi1>
    %666 = arith.select %665, %10, %661 : vector<8x64xi1>, vector<8x64xf32>
    %c9_i32_116 = arith.constant 9 : i32
    %667 = vector.broadcast %c9_i32_116 : i32 to vector<8x1xi32>
    %668 = arith.cmpi eq, %626, %667 : vector<8x1xi32>
    %669 = vector.shape_cast %668 : vector<8x1xi1> to vector<8x1xi1>
    %670 = vector.broadcast %669 : vector<8x1xi1> to vector<8x64xi1>
    %671 = arith.select %670, %11, %666 : vector<8x64xi1>, vector<8x64xf32>
    %c10_i32_117 = arith.constant 10 : i32
    %672 = vector.broadcast %c10_i32_117 : i32 to vector<8x1xi32>
    %673 = arith.cmpi eq, %626, %672 : vector<8x1xi32>
    %674 = vector.shape_cast %673 : vector<8x1xi1> to vector<8x1xi1>
    %675 = vector.broadcast %674 : vector<8x1xi1> to vector<8x64xi1>
    %676 = arith.select %675, %12, %671 : vector<8x64xi1>, vector<8x64xf32>
    %c11_i32_118 = arith.constant 11 : i32
    %677 = vector.broadcast %c11_i32_118 : i32 to vector<8x1xi32>
    %678 = arith.cmpi eq, %626, %677 : vector<8x1xi32>
    %679 = vector.shape_cast %678 : vector<8x1xi1> to vector<8x1xi1>
    %680 = vector.broadcast %679 : vector<8x1xi1> to vector<8x64xi1>
    %681 = arith.select %680, %13, %676 : vector<8x64xi1>, vector<8x64xf32>
    %c12_i32_119 = arith.constant 12 : i32
    %682 = vector.broadcast %c12_i32_119 : i32 to vector<8x1xi32>
    %683 = arith.cmpi eq, %626, %682 : vector<8x1xi32>
    %684 = vector.shape_cast %683 : vector<8x1xi1> to vector<8x1xi1>
    %685 = vector.broadcast %684 : vector<8x1xi1> to vector<8x64xi1>
    %686 = arith.select %685, %14, %681 : vector<8x64xi1>, vector<8x64xf32>
    %c13_i32_120 = arith.constant 13 : i32
    %687 = vector.broadcast %c13_i32_120 : i32 to vector<8x1xi32>
    %688 = arith.cmpi eq, %626, %687 : vector<8x1xi32>
    %689 = vector.shape_cast %688 : vector<8x1xi1> to vector<8x1xi1>
    %690 = vector.broadcast %689 : vector<8x1xi1> to vector<8x64xi1>
    %691 = arith.select %690, %15, %686 : vector<8x64xi1>, vector<8x64xf32>
    %c14_i32_121 = arith.constant 14 : i32
    %692 = vector.broadcast %c14_i32_121 : i32 to vector<8x1xi32>
    %693 = arith.cmpi eq, %626, %692 : vector<8x1xi32>
    %694 = vector.shape_cast %693 : vector<8x1xi1> to vector<8x1xi1>
    %695 = vector.broadcast %694 : vector<8x1xi1> to vector<8x64xi1>
    %696 = arith.select %695, %16, %691 : vector<8x64xi1>, vector<8x64xf32>
    %c15_i32_122 = arith.constant 15 : i32
    %697 = vector.broadcast %c15_i32_122 : i32 to vector<8x1xi32>
    %698 = arith.cmpi eq, %626, %697 : vector<8x1xi32>
    %699 = vector.shape_cast %698 : vector<8x1xi1> to vector<8x1xi1>
    %700 = vector.broadcast %699 : vector<8x1xi1> to vector<8x64xi1>
    %701 = arith.select %700, %17, %696 : vector<8x64xi1>, vector<8x64xf32>
    %702 = vector.extract_strided_slice %1 {offsets = [0, 9], sizes = [8, 1], strides = [1, 1]} : vector<8x16xi32> to vector<8x1xi32>
    %c1_i32_123 = arith.constant 1 : i32
    %703 = vector.broadcast %c1_i32_123 : i32 to vector<8x1xi32>
    %704 = arith.cmpi eq, %702, %703 : vector<8x1xi32>
    %705 = vector.shape_cast %704 : vector<8x1xi1> to vector<8x1xi1>
    %706 = vector.broadcast %705 : vector<8x1xi1> to vector<8x64xi1>
    %707 = arith.select %706, %3, %2 : vector<8x64xi1>, vector<8x64xf32>
    %c2_i32_124 = arith.constant 2 : i32
    %708 = vector.broadcast %c2_i32_124 : i32 to vector<8x1xi32>
    %709 = arith.cmpi eq, %702, %708 : vector<8x1xi32>
    %710 = vector.shape_cast %709 : vector<8x1xi1> to vector<8x1xi1>
    %711 = vector.broadcast %710 : vector<8x1xi1> to vector<8x64xi1>
    %712 = arith.select %711, %4, %707 : vector<8x64xi1>, vector<8x64xf32>
    %c3_i32_125 = arith.constant 3 : i32
    %713 = vector.broadcast %c3_i32_125 : i32 to vector<8x1xi32>
    %714 = arith.cmpi eq, %702, %713 : vector<8x1xi32>
    %715 = vector.shape_cast %714 : vector<8x1xi1> to vector<8x1xi1>
    %716 = vector.broadcast %715 : vector<8x1xi1> to vector<8x64xi1>
    %717 = arith.select %716, %5, %712 : vector<8x64xi1>, vector<8x64xf32>
    %c4_i32_126 = arith.constant 4 : i32
    %718 = vector.broadcast %c4_i32_126 : i32 to vector<8x1xi32>
    %719 = arith.cmpi eq, %702, %718 : vector<8x1xi32>
    %720 = vector.shape_cast %719 : vector<8x1xi1> to vector<8x1xi1>
    %721 = vector.broadcast %720 : vector<8x1xi1> to vector<8x64xi1>
    %722 = arith.select %721, %6, %717 : vector<8x64xi1>, vector<8x64xf32>
    %c5_i32_127 = arith.constant 5 : i32
    %723 = vector.broadcast %c5_i32_127 : i32 to vector<8x1xi32>
    %724 = arith.cmpi eq, %702, %723 : vector<8x1xi32>
    %725 = vector.shape_cast %724 : vector<8x1xi1> to vector<8x1xi1>
    %726 = vector.broadcast %725 : vector<8x1xi1> to vector<8x64xi1>
    %727 = arith.select %726, %7, %722 : vector<8x64xi1>, vector<8x64xf32>
    %c6_i32_128 = arith.constant 6 : i32
    %728 = vector.broadcast %c6_i32_128 : i32 to vector<8x1xi32>
    %729 = arith.cmpi eq, %702, %728 : vector<8x1xi32>
    %730 = vector.shape_cast %729 : vector<8x1xi1> to vector<8x1xi1>
    %731 = vector.broadcast %730 : vector<8x1xi1> to vector<8x64xi1>
    %732 = arith.select %731, %8, %727 : vector<8x64xi1>, vector<8x64xf32>
    %c7_i32_129 = arith.constant 7 : i32
    %733 = vector.broadcast %c7_i32_129 : i32 to vector<8x1xi32>
    %734 = arith.cmpi eq, %702, %733 : vector<8x1xi32>
    %735 = vector.shape_cast %734 : vector<8x1xi1> to vector<8x1xi1>
    %736 = vector.broadcast %735 : vector<8x1xi1> to vector<8x64xi1>
    %737 = arith.select %736, %9, %732 : vector<8x64xi1>, vector<8x64xf32>
    %c8_i32_130 = arith.constant 8 : i32
    %738 = vector.broadcast %c8_i32_130 : i32 to vector<8x1xi32>
    %739 = arith.cmpi eq, %702, %738 : vector<8x1xi32>
    %740 = vector.shape_cast %739 : vector<8x1xi1> to vector<8x1xi1>
    %741 = vector.broadcast %740 : vector<8x1xi1> to vector<8x64xi1>
    %742 = arith.select %741, %10, %737 : vector<8x64xi1>, vector<8x64xf32>
    %c9_i32_131 = arith.constant 9 : i32
    %743 = vector.broadcast %c9_i32_131 : i32 to vector<8x1xi32>
    %744 = arith.cmpi eq, %702, %743 : vector<8x1xi32>
    %745 = vector.shape_cast %744 : vector<8x1xi1> to vector<8x1xi1>
    %746 = vector.broadcast %745 : vector<8x1xi1> to vector<8x64xi1>
    %747 = arith.select %746, %11, %742 : vector<8x64xi1>, vector<8x64xf32>
    %c10_i32_132 = arith.constant 10 : i32
    %748 = vector.broadcast %c10_i32_132 : i32 to vector<8x1xi32>
    %749 = arith.cmpi eq, %702, %748 : vector<8x1xi32>
    %750 = vector.shape_cast %749 : vector<8x1xi1> to vector<8x1xi1>
    %751 = vector.broadcast %750 : vector<8x1xi1> to vector<8x64xi1>
    %752 = arith.select %751, %12, %747 : vector<8x64xi1>, vector<8x64xf32>
    %c11_i32_133 = arith.constant 11 : i32
    %753 = vector.broadcast %c11_i32_133 : i32 to vector<8x1xi32>
    %754 = arith.cmpi eq, %702, %753 : vector<8x1xi32>
    %755 = vector.shape_cast %754 : vector<8x1xi1> to vector<8x1xi1>
    %756 = vector.broadcast %755 : vector<8x1xi1> to vector<8x64xi1>
    %757 = arith.select %756, %13, %752 : vector<8x64xi1>, vector<8x64xf32>
    %c12_i32_134 = arith.constant 12 : i32
    %758 = vector.broadcast %c12_i32_134 : i32 to vector<8x1xi32>
    %759 = arith.cmpi eq, %702, %758 : vector<8x1xi32>
    %760 = vector.shape_cast %759 : vector<8x1xi1> to vector<8x1xi1>
    %761 = vector.broadcast %760 : vector<8x1xi1> to vector<8x64xi1>
    %762 = arith.select %761, %14, %757 : vector<8x64xi1>, vector<8x64xf32>
    %c13_i32_135 = arith.constant 13 : i32
    %763 = vector.broadcast %c13_i32_135 : i32 to vector<8x1xi32>
    %764 = arith.cmpi eq, %702, %763 : vector<8x1xi32>
    %765 = vector.shape_cast %764 : vector<8x1xi1> to vector<8x1xi1>
    %766 = vector.broadcast %765 : vector<8x1xi1> to vector<8x64xi1>
    %767 = arith.select %766, %15, %762 : vector<8x64xi1>, vector<8x64xf32>
    %c14_i32_136 = arith.constant 14 : i32
    %768 = vector.broadcast %c14_i32_136 : i32 to vector<8x1xi32>
    %769 = arith.cmpi eq, %702, %768 : vector<8x1xi32>
    %770 = vector.shape_cast %769 : vector<8x1xi1> to vector<8x1xi1>
    %771 = vector.broadcast %770 : vector<8x1xi1> to vector<8x64xi1>
    %772 = arith.select %771, %16, %767 : vector<8x64xi1>, vector<8x64xf32>
    %c15_i32_137 = arith.constant 15 : i32
    %773 = vector.broadcast %c15_i32_137 : i32 to vector<8x1xi32>
    %774 = arith.cmpi eq, %702, %773 : vector<8x1xi32>
    %775 = vector.shape_cast %774 : vector<8x1xi1> to vector<8x1xi1>
    %776 = vector.broadcast %775 : vector<8x1xi1> to vector<8x64xi1>
    %777 = arith.select %776, %17, %772 : vector<8x64xi1>, vector<8x64xf32>
    %778 = vector.extract_strided_slice %1 {offsets = [0, 10], sizes = [8, 1], strides = [1, 1]} : vector<8x16xi32> to vector<8x1xi32>
    %c1_i32_138 = arith.constant 1 : i32
    %779 = vector.broadcast %c1_i32_138 : i32 to vector<8x1xi32>
    %780 = arith.cmpi eq, %778, %779 : vector<8x1xi32>
    %781 = vector.shape_cast %780 : vector<8x1xi1> to vector<8x1xi1>
    %782 = vector.broadcast %781 : vector<8x1xi1> to vector<8x64xi1>
    %783 = arith.select %782, %3, %2 : vector<8x64xi1>, vector<8x64xf32>
    %c2_i32_139 = arith.constant 2 : i32
    %784 = vector.broadcast %c2_i32_139 : i32 to vector<8x1xi32>
    %785 = arith.cmpi eq, %778, %784 : vector<8x1xi32>
    %786 = vector.shape_cast %785 : vector<8x1xi1> to vector<8x1xi1>
    %787 = vector.broadcast %786 : vector<8x1xi1> to vector<8x64xi1>
    %788 = arith.select %787, %4, %783 : vector<8x64xi1>, vector<8x64xf32>
    %c3_i32_140 = arith.constant 3 : i32
    %789 = vector.broadcast %c3_i32_140 : i32 to vector<8x1xi32>
    %790 = arith.cmpi eq, %778, %789 : vector<8x1xi32>
    %791 = vector.shape_cast %790 : vector<8x1xi1> to vector<8x1xi1>
    %792 = vector.broadcast %791 : vector<8x1xi1> to vector<8x64xi1>
    %793 = arith.select %792, %5, %788 : vector<8x64xi1>, vector<8x64xf32>
    %c4_i32_141 = arith.constant 4 : i32
    %794 = vector.broadcast %c4_i32_141 : i32 to vector<8x1xi32>
    %795 = arith.cmpi eq, %778, %794 : vector<8x1xi32>
    %796 = vector.shape_cast %795 : vector<8x1xi1> to vector<8x1xi1>
    %797 = vector.broadcast %796 : vector<8x1xi1> to vector<8x64xi1>
    %798 = arith.select %797, %6, %793 : vector<8x64xi1>, vector<8x64xf32>
    %c5_i32_142 = arith.constant 5 : i32
    %799 = vector.broadcast %c5_i32_142 : i32 to vector<8x1xi32>
    %800 = arith.cmpi eq, %778, %799 : vector<8x1xi32>
    %801 = vector.shape_cast %800 : vector<8x1xi1> to vector<8x1xi1>
    %802 = vector.broadcast %801 : vector<8x1xi1> to vector<8x64xi1>
    %803 = arith.select %802, %7, %798 : vector<8x64xi1>, vector<8x64xf32>
    %c6_i32_143 = arith.constant 6 : i32
    %804 = vector.broadcast %c6_i32_143 : i32 to vector<8x1xi32>
    %805 = arith.cmpi eq, %778, %804 : vector<8x1xi32>
    %806 = vector.shape_cast %805 : vector<8x1xi1> to vector<8x1xi1>
    %807 = vector.broadcast %806 : vector<8x1xi1> to vector<8x64xi1>
    %808 = arith.select %807, %8, %803 : vector<8x64xi1>, vector<8x64xf32>
    %c7_i32_144 = arith.constant 7 : i32
    %809 = vector.broadcast %c7_i32_144 : i32 to vector<8x1xi32>
    %810 = arith.cmpi eq, %778, %809 : vector<8x1xi32>
    %811 = vector.shape_cast %810 : vector<8x1xi1> to vector<8x1xi1>
    %812 = vector.broadcast %811 : vector<8x1xi1> to vector<8x64xi1>
    %813 = arith.select %812, %9, %808 : vector<8x64xi1>, vector<8x64xf32>
    %c8_i32_145 = arith.constant 8 : i32
    %814 = vector.broadcast %c8_i32_145 : i32 to vector<8x1xi32>
    %815 = arith.cmpi eq, %778, %814 : vector<8x1xi32>
    %816 = vector.shape_cast %815 : vector<8x1xi1> to vector<8x1xi1>
    %817 = vector.broadcast %816 : vector<8x1xi1> to vector<8x64xi1>
    %818 = arith.select %817, %10, %813 : vector<8x64xi1>, vector<8x64xf32>
    %c9_i32_146 = arith.constant 9 : i32
    %819 = vector.broadcast %c9_i32_146 : i32 to vector<8x1xi32>
    %820 = arith.cmpi eq, %778, %819 : vector<8x1xi32>
    %821 = vector.shape_cast %820 : vector<8x1xi1> to vector<8x1xi1>
    %822 = vector.broadcast %821 : vector<8x1xi1> to vector<8x64xi1>
    %823 = arith.select %822, %11, %818 : vector<8x64xi1>, vector<8x64xf32>
    %c10_i32_147 = arith.constant 10 : i32
    %824 = vector.broadcast %c10_i32_147 : i32 to vector<8x1xi32>
    %825 = arith.cmpi eq, %778, %824 : vector<8x1xi32>
    %826 = vector.shape_cast %825 : vector<8x1xi1> to vector<8x1xi1>
    %827 = vector.broadcast %826 : vector<8x1xi1> to vector<8x64xi1>
    %828 = arith.select %827, %12, %823 : vector<8x64xi1>, vector<8x64xf32>
    %c11_i32_148 = arith.constant 11 : i32
    %829 = vector.broadcast %c11_i32_148 : i32 to vector<8x1xi32>
    %830 = arith.cmpi eq, %778, %829 : vector<8x1xi32>
    %831 = vector.shape_cast %830 : vector<8x1xi1> to vector<8x1xi1>
    %832 = vector.broadcast %831 : vector<8x1xi1> to vector<8x64xi1>
    %833 = arith.select %832, %13, %828 : vector<8x64xi1>, vector<8x64xf32>
    %c12_i32_149 = arith.constant 12 : i32
    %834 = vector.broadcast %c12_i32_149 : i32 to vector<8x1xi32>
    %835 = arith.cmpi eq, %778, %834 : vector<8x1xi32>
    %836 = vector.shape_cast %835 : vector<8x1xi1> to vector<8x1xi1>
    %837 = vector.broadcast %836 : vector<8x1xi1> to vector<8x64xi1>
    %838 = arith.select %837, %14, %833 : vector<8x64xi1>, vector<8x64xf32>
    %c13_i32_150 = arith.constant 13 : i32
    %839 = vector.broadcast %c13_i32_150 : i32 to vector<8x1xi32>
    %840 = arith.cmpi eq, %778, %839 : vector<8x1xi32>
    %841 = vector.shape_cast %840 : vector<8x1xi1> to vector<8x1xi1>
    %842 = vector.broadcast %841 : vector<8x1xi1> to vector<8x64xi1>
    %843 = arith.select %842, %15, %838 : vector<8x64xi1>, vector<8x64xf32>
    %c14_i32_151 = arith.constant 14 : i32
    %844 = vector.broadcast %c14_i32_151 : i32 to vector<8x1xi32>
    %845 = arith.cmpi eq, %778, %844 : vector<8x1xi32>
    %846 = vector.shape_cast %845 : vector<8x1xi1> to vector<8x1xi1>
    %847 = vector.broadcast %846 : vector<8x1xi1> to vector<8x64xi1>
    %848 = arith.select %847, %16, %843 : vector<8x64xi1>, vector<8x64xf32>
    %c15_i32_152 = arith.constant 15 : i32
    %849 = vector.broadcast %c15_i32_152 : i32 to vector<8x1xi32>
    %850 = arith.cmpi eq, %778, %849 : vector<8x1xi32>
    %851 = vector.shape_cast %850 : vector<8x1xi1> to vector<8x1xi1>
    %852 = vector.broadcast %851 : vector<8x1xi1> to vector<8x64xi1>
    %853 = arith.select %852, %17, %848 : vector<8x64xi1>, vector<8x64xf32>
    %854 = vector.extract_strided_slice %1 {offsets = [0, 11], sizes = [8, 1], strides = [1, 1]} : vector<8x16xi32> to vector<8x1xi32>
    %c1_i32_153 = arith.constant 1 : i32
    %855 = vector.broadcast %c1_i32_153 : i32 to vector<8x1xi32>
    %856 = arith.cmpi eq, %854, %855 : vector<8x1xi32>
    %857 = vector.shape_cast %856 : vector<8x1xi1> to vector<8x1xi1>
    %858 = vector.broadcast %857 : vector<8x1xi1> to vector<8x64xi1>
    %859 = arith.select %858, %3, %2 : vector<8x64xi1>, vector<8x64xf32>
    %c2_i32_154 = arith.constant 2 : i32
    %860 = vector.broadcast %c2_i32_154 : i32 to vector<8x1xi32>
    %861 = arith.cmpi eq, %854, %860 : vector<8x1xi32>
    %862 = vector.shape_cast %861 : vector<8x1xi1> to vector<8x1xi1>
    %863 = vector.broadcast %862 : vector<8x1xi1> to vector<8x64xi1>
    %864 = arith.select %863, %4, %859 : vector<8x64xi1>, vector<8x64xf32>
    %c3_i32_155 = arith.constant 3 : i32
    %865 = vector.broadcast %c3_i32_155 : i32 to vector<8x1xi32>
    %866 = arith.cmpi eq, %854, %865 : vector<8x1xi32>
    %867 = vector.shape_cast %866 : vector<8x1xi1> to vector<8x1xi1>
    %868 = vector.broadcast %867 : vector<8x1xi1> to vector<8x64xi1>
    %869 = arith.select %868, %5, %864 : vector<8x64xi1>, vector<8x64xf32>
    %c4_i32_156 = arith.constant 4 : i32
    %870 = vector.broadcast %c4_i32_156 : i32 to vector<8x1xi32>
    %871 = arith.cmpi eq, %854, %870 : vector<8x1xi32>
    %872 = vector.shape_cast %871 : vector<8x1xi1> to vector<8x1xi1>
    %873 = vector.broadcast %872 : vector<8x1xi1> to vector<8x64xi1>
    %874 = arith.select %873, %6, %869 : vector<8x64xi1>, vector<8x64xf32>
    %c5_i32_157 = arith.constant 5 : i32
    %875 = vector.broadcast %c5_i32_157 : i32 to vector<8x1xi32>
    %876 = arith.cmpi eq, %854, %875 : vector<8x1xi32>
    %877 = vector.shape_cast %876 : vector<8x1xi1> to vector<8x1xi1>
    %878 = vector.broadcast %877 : vector<8x1xi1> to vector<8x64xi1>
    %879 = arith.select %878, %7, %874 : vector<8x64xi1>, vector<8x64xf32>
    %c6_i32_158 = arith.constant 6 : i32
    %880 = vector.broadcast %c6_i32_158 : i32 to vector<8x1xi32>
    %881 = arith.cmpi eq, %854, %880 : vector<8x1xi32>
    %882 = vector.shape_cast %881 : vector<8x1xi1> to vector<8x1xi1>
    %883 = vector.broadcast %882 : vector<8x1xi1> to vector<8x64xi1>
    %884 = arith.select %883, %8, %879 : vector<8x64xi1>, vector<8x64xf32>
    %c7_i32_159 = arith.constant 7 : i32
    %885 = vector.broadcast %c7_i32_159 : i32 to vector<8x1xi32>
    %886 = arith.cmpi eq, %854, %885 : vector<8x1xi32>
    %887 = vector.shape_cast %886 : vector<8x1xi1> to vector<8x1xi1>
    %888 = vector.broadcast %887 : vector<8x1xi1> to vector<8x64xi1>
    %889 = arith.select %888, %9, %884 : vector<8x64xi1>, vector<8x64xf32>
    %c8_i32_160 = arith.constant 8 : i32
    %890 = vector.broadcast %c8_i32_160 : i32 to vector<8x1xi32>
    %891 = arith.cmpi eq, %854, %890 : vector<8x1xi32>
    %892 = vector.shape_cast %891 : vector<8x1xi1> to vector<8x1xi1>
    %893 = vector.broadcast %892 : vector<8x1xi1> to vector<8x64xi1>
    %894 = arith.select %893, %10, %889 : vector<8x64xi1>, vector<8x64xf32>
    %c9_i32_161 = arith.constant 9 : i32
    %895 = vector.broadcast %c9_i32_161 : i32 to vector<8x1xi32>
    %896 = arith.cmpi eq, %854, %895 : vector<8x1xi32>
    %897 = vector.shape_cast %896 : vector<8x1xi1> to vector<8x1xi1>
    %898 = vector.broadcast %897 : vector<8x1xi1> to vector<8x64xi1>
    %899 = arith.select %898, %11, %894 : vector<8x64xi1>, vector<8x64xf32>
    %c10_i32_162 = arith.constant 10 : i32
    %900 = vector.broadcast %c10_i32_162 : i32 to vector<8x1xi32>
    %901 = arith.cmpi eq, %854, %900 : vector<8x1xi32>
    %902 = vector.shape_cast %901 : vector<8x1xi1> to vector<8x1xi1>
    %903 = vector.broadcast %902 : vector<8x1xi1> to vector<8x64xi1>
    %904 = arith.select %903, %12, %899 : vector<8x64xi1>, vector<8x64xf32>
    %c11_i32_163 = arith.constant 11 : i32
    %905 = vector.broadcast %c11_i32_163 : i32 to vector<8x1xi32>
    %906 = arith.cmpi eq, %854, %905 : vector<8x1xi32>
    %907 = vector.shape_cast %906 : vector<8x1xi1> to vector<8x1xi1>
    %908 = vector.broadcast %907 : vector<8x1xi1> to vector<8x64xi1>
    %909 = arith.select %908, %13, %904 : vector<8x64xi1>, vector<8x64xf32>
    %c12_i32_164 = arith.constant 12 : i32
    %910 = vector.broadcast %c12_i32_164 : i32 to vector<8x1xi32>
    %911 = arith.cmpi eq, %854, %910 : vector<8x1xi32>
    %912 = vector.shape_cast %911 : vector<8x1xi1> to vector<8x1xi1>
    %913 = vector.broadcast %912 : vector<8x1xi1> to vector<8x64xi1>
    %914 = arith.select %913, %14, %909 : vector<8x64xi1>, vector<8x64xf32>
    %c13_i32_165 = arith.constant 13 : i32
    %915 = vector.broadcast %c13_i32_165 : i32 to vector<8x1xi32>
    %916 = arith.cmpi eq, %854, %915 : vector<8x1xi32>
    %917 = vector.shape_cast %916 : vector<8x1xi1> to vector<8x1xi1>
    %918 = vector.broadcast %917 : vector<8x1xi1> to vector<8x64xi1>
    %919 = arith.select %918, %15, %914 : vector<8x64xi1>, vector<8x64xf32>
    %c14_i32_166 = arith.constant 14 : i32
    %920 = vector.broadcast %c14_i32_166 : i32 to vector<8x1xi32>
    %921 = arith.cmpi eq, %854, %920 : vector<8x1xi32>
    %922 = vector.shape_cast %921 : vector<8x1xi1> to vector<8x1xi1>
    %923 = vector.broadcast %922 : vector<8x1xi1> to vector<8x64xi1>
    %924 = arith.select %923, %16, %919 : vector<8x64xi1>, vector<8x64xf32>
    %c15_i32_167 = arith.constant 15 : i32
    %925 = vector.broadcast %c15_i32_167 : i32 to vector<8x1xi32>
    %926 = arith.cmpi eq, %854, %925 : vector<8x1xi32>
    %927 = vector.shape_cast %926 : vector<8x1xi1> to vector<8x1xi1>
    %928 = vector.broadcast %927 : vector<8x1xi1> to vector<8x64xi1>
    %929 = arith.select %928, %17, %924 : vector<8x64xi1>, vector<8x64xf32>
    %930 = vector.extract_strided_slice %1 {offsets = [0, 12], sizes = [8, 1], strides = [1, 1]} : vector<8x16xi32> to vector<8x1xi32>
    %c1_i32_168 = arith.constant 1 : i32
    %931 = vector.broadcast %c1_i32_168 : i32 to vector<8x1xi32>
    %932 = arith.cmpi eq, %930, %931 : vector<8x1xi32>
    %933 = vector.shape_cast %932 : vector<8x1xi1> to vector<8x1xi1>
    %934 = vector.broadcast %933 : vector<8x1xi1> to vector<8x64xi1>
    %935 = arith.select %934, %3, %2 : vector<8x64xi1>, vector<8x64xf32>
    %c2_i32_169 = arith.constant 2 : i32
    %936 = vector.broadcast %c2_i32_169 : i32 to vector<8x1xi32>
    %937 = arith.cmpi eq, %930, %936 : vector<8x1xi32>
    %938 = vector.shape_cast %937 : vector<8x1xi1> to vector<8x1xi1>
    %939 = vector.broadcast %938 : vector<8x1xi1> to vector<8x64xi1>
    %940 = arith.select %939, %4, %935 : vector<8x64xi1>, vector<8x64xf32>
    %c3_i32_170 = arith.constant 3 : i32
    %941 = vector.broadcast %c3_i32_170 : i32 to vector<8x1xi32>
    %942 = arith.cmpi eq, %930, %941 : vector<8x1xi32>
    %943 = vector.shape_cast %942 : vector<8x1xi1> to vector<8x1xi1>
    %944 = vector.broadcast %943 : vector<8x1xi1> to vector<8x64xi1>
    %945 = arith.select %944, %5, %940 : vector<8x64xi1>, vector<8x64xf32>
    %c4_i32_171 = arith.constant 4 : i32
    %946 = vector.broadcast %c4_i32_171 : i32 to vector<8x1xi32>
    %947 = arith.cmpi eq, %930, %946 : vector<8x1xi32>
    %948 = vector.shape_cast %947 : vector<8x1xi1> to vector<8x1xi1>
    %949 = vector.broadcast %948 : vector<8x1xi1> to vector<8x64xi1>
    %950 = arith.select %949, %6, %945 : vector<8x64xi1>, vector<8x64xf32>
    %c5_i32_172 = arith.constant 5 : i32
    %951 = vector.broadcast %c5_i32_172 : i32 to vector<8x1xi32>
    %952 = arith.cmpi eq, %930, %951 : vector<8x1xi32>
    %953 = vector.shape_cast %952 : vector<8x1xi1> to vector<8x1xi1>
    %954 = vector.broadcast %953 : vector<8x1xi1> to vector<8x64xi1>
    %955 = arith.select %954, %7, %950 : vector<8x64xi1>, vector<8x64xf32>
    %c6_i32_173 = arith.constant 6 : i32
    %956 = vector.broadcast %c6_i32_173 : i32 to vector<8x1xi32>
    %957 = arith.cmpi eq, %930, %956 : vector<8x1xi32>
    %958 = vector.shape_cast %957 : vector<8x1xi1> to vector<8x1xi1>
    %959 = vector.broadcast %958 : vector<8x1xi1> to vector<8x64xi1>
    %960 = arith.select %959, %8, %955 : vector<8x64xi1>, vector<8x64xf32>
    %c7_i32_174 = arith.constant 7 : i32
    %961 = vector.broadcast %c7_i32_174 : i32 to vector<8x1xi32>
    %962 = arith.cmpi eq, %930, %961 : vector<8x1xi32>
    %963 = vector.shape_cast %962 : vector<8x1xi1> to vector<8x1xi1>
    %964 = vector.broadcast %963 : vector<8x1xi1> to vector<8x64xi1>
    %965 = arith.select %964, %9, %960 : vector<8x64xi1>, vector<8x64xf32>
    %c8_i32_175 = arith.constant 8 : i32
    %966 = vector.broadcast %c8_i32_175 : i32 to vector<8x1xi32>
    %967 = arith.cmpi eq, %930, %966 : vector<8x1xi32>
    %968 = vector.shape_cast %967 : vector<8x1xi1> to vector<8x1xi1>
    %969 = vector.broadcast %968 : vector<8x1xi1> to vector<8x64xi1>
    %970 = arith.select %969, %10, %965 : vector<8x64xi1>, vector<8x64xf32>
    %c9_i32_176 = arith.constant 9 : i32
    %971 = vector.broadcast %c9_i32_176 : i32 to vector<8x1xi32>
    %972 = arith.cmpi eq, %930, %971 : vector<8x1xi32>
    %973 = vector.shape_cast %972 : vector<8x1xi1> to vector<8x1xi1>
    %974 = vector.broadcast %973 : vector<8x1xi1> to vector<8x64xi1>
    %975 = arith.select %974, %11, %970 : vector<8x64xi1>, vector<8x64xf32>
    %c10_i32_177 = arith.constant 10 : i32
    %976 = vector.broadcast %c10_i32_177 : i32 to vector<8x1xi32>
    %977 = arith.cmpi eq, %930, %976 : vector<8x1xi32>
    %978 = vector.shape_cast %977 : vector<8x1xi1> to vector<8x1xi1>
    %979 = vector.broadcast %978 : vector<8x1xi1> to vector<8x64xi1>
    %980 = arith.select %979, %12, %975 : vector<8x64xi1>, vector<8x64xf32>
    %c11_i32_178 = arith.constant 11 : i32
    %981 = vector.broadcast %c11_i32_178 : i32 to vector<8x1xi32>
    %982 = arith.cmpi eq, %930, %981 : vector<8x1xi32>
    %983 = vector.shape_cast %982 : vector<8x1xi1> to vector<8x1xi1>
    %984 = vector.broadcast %983 : vector<8x1xi1> to vector<8x64xi1>
    %985 = arith.select %984, %13, %980 : vector<8x64xi1>, vector<8x64xf32>
    %c12_i32_179 = arith.constant 12 : i32
    %986 = vector.broadcast %c12_i32_179 : i32 to vector<8x1xi32>
    %987 = arith.cmpi eq, %930, %986 : vector<8x1xi32>
    %988 = vector.shape_cast %987 : vector<8x1xi1> to vector<8x1xi1>
    %989 = vector.broadcast %988 : vector<8x1xi1> to vector<8x64xi1>
    %990 = arith.select %989, %14, %985 : vector<8x64xi1>, vector<8x64xf32>
    %c13_i32_180 = arith.constant 13 : i32
    %991 = vector.broadcast %c13_i32_180 : i32 to vector<8x1xi32>
    %992 = arith.cmpi eq, %930, %991 : vector<8x1xi32>
    %993 = vector.shape_cast %992 : vector<8x1xi1> to vector<8x1xi1>
    %994 = vector.broadcast %993 : vector<8x1xi1> to vector<8x64xi1>
    %995 = arith.select %994, %15, %990 : vector<8x64xi1>, vector<8x64xf32>
    %c14_i32_181 = arith.constant 14 : i32
    %996 = vector.broadcast %c14_i32_181 : i32 to vector<8x1xi32>
    %997 = arith.cmpi eq, %930, %996 : vector<8x1xi32>
    %998 = vector.shape_cast %997 : vector<8x1xi1> to vector<8x1xi1>
    %999 = vector.broadcast %998 : vector<8x1xi1> to vector<8x64xi1>
    %1000 = arith.select %999, %16, %995 : vector<8x64xi1>, vector<8x64xf32>
    %c15_i32_182 = arith.constant 15 : i32
    %1001 = vector.broadcast %c15_i32_182 : i32 to vector<8x1xi32>
    %1002 = arith.cmpi eq, %930, %1001 : vector<8x1xi32>
    %1003 = vector.shape_cast %1002 : vector<8x1xi1> to vector<8x1xi1>
    %1004 = vector.broadcast %1003 : vector<8x1xi1> to vector<8x64xi1>
    %1005 = arith.select %1004, %17, %1000 : vector<8x64xi1>, vector<8x64xf32>
    %1006 = vector.extract_strided_slice %1 {offsets = [0, 13], sizes = [8, 1], strides = [1, 1]} : vector<8x16xi32> to vector<8x1xi32>
    %c1_i32_183 = arith.constant 1 : i32
    %1007 = vector.broadcast %c1_i32_183 : i32 to vector<8x1xi32>
    %1008 = arith.cmpi eq, %1006, %1007 : vector<8x1xi32>
    %1009 = vector.shape_cast %1008 : vector<8x1xi1> to vector<8x1xi1>
    %1010 = vector.broadcast %1009 : vector<8x1xi1> to vector<8x64xi1>
    %1011 = arith.select %1010, %3, %2 : vector<8x64xi1>, vector<8x64xf32>
    %c2_i32_184 = arith.constant 2 : i32
    %1012 = vector.broadcast %c2_i32_184 : i32 to vector<8x1xi32>
    %1013 = arith.cmpi eq, %1006, %1012 : vector<8x1xi32>
    %1014 = vector.shape_cast %1013 : vector<8x1xi1> to vector<8x1xi1>
    %1015 = vector.broadcast %1014 : vector<8x1xi1> to vector<8x64xi1>
    %1016 = arith.select %1015, %4, %1011 : vector<8x64xi1>, vector<8x64xf32>
    %c3_i32_185 = arith.constant 3 : i32
    %1017 = vector.broadcast %c3_i32_185 : i32 to vector<8x1xi32>
    %1018 = arith.cmpi eq, %1006, %1017 : vector<8x1xi32>
    %1019 = vector.shape_cast %1018 : vector<8x1xi1> to vector<8x1xi1>
    %1020 = vector.broadcast %1019 : vector<8x1xi1> to vector<8x64xi1>
    %1021 = arith.select %1020, %5, %1016 : vector<8x64xi1>, vector<8x64xf32>
    %c4_i32_186 = arith.constant 4 : i32
    %1022 = vector.broadcast %c4_i32_186 : i32 to vector<8x1xi32>
    %1023 = arith.cmpi eq, %1006, %1022 : vector<8x1xi32>
    %1024 = vector.shape_cast %1023 : vector<8x1xi1> to vector<8x1xi1>
    %1025 = vector.broadcast %1024 : vector<8x1xi1> to vector<8x64xi1>
    %1026 = arith.select %1025, %6, %1021 : vector<8x64xi1>, vector<8x64xf32>
    %c5_i32_187 = arith.constant 5 : i32
    %1027 = vector.broadcast %c5_i32_187 : i32 to vector<8x1xi32>
    %1028 = arith.cmpi eq, %1006, %1027 : vector<8x1xi32>
    %1029 = vector.shape_cast %1028 : vector<8x1xi1> to vector<8x1xi1>
    %1030 = vector.broadcast %1029 : vector<8x1xi1> to vector<8x64xi1>
    %1031 = arith.select %1030, %7, %1026 : vector<8x64xi1>, vector<8x64xf32>
    %c6_i32_188 = arith.constant 6 : i32
    %1032 = vector.broadcast %c6_i32_188 : i32 to vector<8x1xi32>
    %1033 = arith.cmpi eq, %1006, %1032 : vector<8x1xi32>
    %1034 = vector.shape_cast %1033 : vector<8x1xi1> to vector<8x1xi1>
    %1035 = vector.broadcast %1034 : vector<8x1xi1> to vector<8x64xi1>
    %1036 = arith.select %1035, %8, %1031 : vector<8x64xi1>, vector<8x64xf32>
    %c7_i32_189 = arith.constant 7 : i32
    %1037 = vector.broadcast %c7_i32_189 : i32 to vector<8x1xi32>
    %1038 = arith.cmpi eq, %1006, %1037 : vector<8x1xi32>
    %1039 = vector.shape_cast %1038 : vector<8x1xi1> to vector<8x1xi1>
    %1040 = vector.broadcast %1039 : vector<8x1xi1> to vector<8x64xi1>
    %1041 = arith.select %1040, %9, %1036 : vector<8x64xi1>, vector<8x64xf32>
    %c8_i32_190 = arith.constant 8 : i32
    %1042 = vector.broadcast %c8_i32_190 : i32 to vector<8x1xi32>
    %1043 = arith.cmpi eq, %1006, %1042 : vector<8x1xi32>
    %1044 = vector.shape_cast %1043 : vector<8x1xi1> to vector<8x1xi1>
    %1045 = vector.broadcast %1044 : vector<8x1xi1> to vector<8x64xi1>
    %1046 = arith.select %1045, %10, %1041 : vector<8x64xi1>, vector<8x64xf32>
    %c9_i32_191 = arith.constant 9 : i32
    %1047 = vector.broadcast %c9_i32_191 : i32 to vector<8x1xi32>
    %1048 = arith.cmpi eq, %1006, %1047 : vector<8x1xi32>
    %1049 = vector.shape_cast %1048 : vector<8x1xi1> to vector<8x1xi1>
    %1050 = vector.broadcast %1049 : vector<8x1xi1> to vector<8x64xi1>
    %1051 = arith.select %1050, %11, %1046 : vector<8x64xi1>, vector<8x64xf32>
    %c10_i32_192 = arith.constant 10 : i32
    %1052 = vector.broadcast %c10_i32_192 : i32 to vector<8x1xi32>
    %1053 = arith.cmpi eq, %1006, %1052 : vector<8x1xi32>
    %1054 = vector.shape_cast %1053 : vector<8x1xi1> to vector<8x1xi1>
    %1055 = vector.broadcast %1054 : vector<8x1xi1> to vector<8x64xi1>
    %1056 = arith.select %1055, %12, %1051 : vector<8x64xi1>, vector<8x64xf32>
    %c11_i32_193 = arith.constant 11 : i32
    %1057 = vector.broadcast %c11_i32_193 : i32 to vector<8x1xi32>
    %1058 = arith.cmpi eq, %1006, %1057 : vector<8x1xi32>
    %1059 = vector.shape_cast %1058 : vector<8x1xi1> to vector<8x1xi1>
    %1060 = vector.broadcast %1059 : vector<8x1xi1> to vector<8x64xi1>
    %1061 = arith.select %1060, %13, %1056 : vector<8x64xi1>, vector<8x64xf32>
    %c12_i32_194 = arith.constant 12 : i32
    %1062 = vector.broadcast %c12_i32_194 : i32 to vector<8x1xi32>
    %1063 = arith.cmpi eq, %1006, %1062 : vector<8x1xi32>
    %1064 = vector.shape_cast %1063 : vector<8x1xi1> to vector<8x1xi1>
    %1065 = vector.broadcast %1064 : vector<8x1xi1> to vector<8x64xi1>
    %1066 = arith.select %1065, %14, %1061 : vector<8x64xi1>, vector<8x64xf32>
    %c13_i32_195 = arith.constant 13 : i32
    %1067 = vector.broadcast %c13_i32_195 : i32 to vector<8x1xi32>
    %1068 = arith.cmpi eq, %1006, %1067 : vector<8x1xi32>
    %1069 = vector.shape_cast %1068 : vector<8x1xi1> to vector<8x1xi1>
    %1070 = vector.broadcast %1069 : vector<8x1xi1> to vector<8x64xi1>
    %1071 = arith.select %1070, %15, %1066 : vector<8x64xi1>, vector<8x64xf32>
    %c14_i32_196 = arith.constant 14 : i32
    %1072 = vector.broadcast %c14_i32_196 : i32 to vector<8x1xi32>
    %1073 = arith.cmpi eq, %1006, %1072 : vector<8x1xi32>
    %1074 = vector.shape_cast %1073 : vector<8x1xi1> to vector<8x1xi1>
    %1075 = vector.broadcast %1074 : vector<8x1xi1> to vector<8x64xi1>
    %1076 = arith.select %1075, %16, %1071 : vector<8x64xi1>, vector<8x64xf32>
    %c15_i32_197 = arith.constant 15 : i32
    %1077 = vector.broadcast %c15_i32_197 : i32 to vector<8x1xi32>
    %1078 = arith.cmpi eq, %1006, %1077 : vector<8x1xi32>
    %1079 = vector.shape_cast %1078 : vector<8x1xi1> to vector<8x1xi1>
    %1080 = vector.broadcast %1079 : vector<8x1xi1> to vector<8x64xi1>
    %1081 = arith.select %1080, %17, %1076 : vector<8x64xi1>, vector<8x64xf32>
    %1082 = vector.extract_strided_slice %1 {offsets = [0, 14], sizes = [8, 1], strides = [1, 1]} : vector<8x16xi32> to vector<8x1xi32>
    %c1_i32_198 = arith.constant 1 : i32
    %1083 = vector.broadcast %c1_i32_198 : i32 to vector<8x1xi32>
    %1084 = arith.cmpi eq, %1082, %1083 : vector<8x1xi32>
    %1085 = vector.shape_cast %1084 : vector<8x1xi1> to vector<8x1xi1>
    %1086 = vector.broadcast %1085 : vector<8x1xi1> to vector<8x64xi1>
    %1087 = arith.select %1086, %3, %2 : vector<8x64xi1>, vector<8x64xf32>
    %c2_i32_199 = arith.constant 2 : i32
    %1088 = vector.broadcast %c2_i32_199 : i32 to vector<8x1xi32>
    %1089 = arith.cmpi eq, %1082, %1088 : vector<8x1xi32>
    %1090 = vector.shape_cast %1089 : vector<8x1xi1> to vector<8x1xi1>
    %1091 = vector.broadcast %1090 : vector<8x1xi1> to vector<8x64xi1>
    %1092 = arith.select %1091, %4, %1087 : vector<8x64xi1>, vector<8x64xf32>
    %c3_i32_200 = arith.constant 3 : i32
    %1093 = vector.broadcast %c3_i32_200 : i32 to vector<8x1xi32>
    %1094 = arith.cmpi eq, %1082, %1093 : vector<8x1xi32>
    %1095 = vector.shape_cast %1094 : vector<8x1xi1> to vector<8x1xi1>
    %1096 = vector.broadcast %1095 : vector<8x1xi1> to vector<8x64xi1>
    %1097 = arith.select %1096, %5, %1092 : vector<8x64xi1>, vector<8x64xf32>
    %c4_i32_201 = arith.constant 4 : i32
    %1098 = vector.broadcast %c4_i32_201 : i32 to vector<8x1xi32>
    %1099 = arith.cmpi eq, %1082, %1098 : vector<8x1xi32>
    %1100 = vector.shape_cast %1099 : vector<8x1xi1> to vector<8x1xi1>
    %1101 = vector.broadcast %1100 : vector<8x1xi1> to vector<8x64xi1>
    %1102 = arith.select %1101, %6, %1097 : vector<8x64xi1>, vector<8x64xf32>
    %c5_i32_202 = arith.constant 5 : i32
    %1103 = vector.broadcast %c5_i32_202 : i32 to vector<8x1xi32>
    %1104 = arith.cmpi eq, %1082, %1103 : vector<8x1xi32>
    %1105 = vector.shape_cast %1104 : vector<8x1xi1> to vector<8x1xi1>
    %1106 = vector.broadcast %1105 : vector<8x1xi1> to vector<8x64xi1>
    %1107 = arith.select %1106, %7, %1102 : vector<8x64xi1>, vector<8x64xf32>
    %c6_i32_203 = arith.constant 6 : i32
    %1108 = vector.broadcast %c6_i32_203 : i32 to vector<8x1xi32>
    %1109 = arith.cmpi eq, %1082, %1108 : vector<8x1xi32>
    %1110 = vector.shape_cast %1109 : vector<8x1xi1> to vector<8x1xi1>
    %1111 = vector.broadcast %1110 : vector<8x1xi1> to vector<8x64xi1>
    %1112 = arith.select %1111, %8, %1107 : vector<8x64xi1>, vector<8x64xf32>
    %c7_i32_204 = arith.constant 7 : i32
    %1113 = vector.broadcast %c7_i32_204 : i32 to vector<8x1xi32>
    %1114 = arith.cmpi eq, %1082, %1113 : vector<8x1xi32>
    %1115 = vector.shape_cast %1114 : vector<8x1xi1> to vector<8x1xi1>
    %1116 = vector.broadcast %1115 : vector<8x1xi1> to vector<8x64xi1>
    %1117 = arith.select %1116, %9, %1112 : vector<8x64xi1>, vector<8x64xf32>
    %c8_i32_205 = arith.constant 8 : i32
    %1118 = vector.broadcast %c8_i32_205 : i32 to vector<8x1xi32>
    %1119 = arith.cmpi eq, %1082, %1118 : vector<8x1xi32>
    %1120 = vector.shape_cast %1119 : vector<8x1xi1> to vector<8x1xi1>
    %1121 = vector.broadcast %1120 : vector<8x1xi1> to vector<8x64xi1>
    %1122 = arith.select %1121, %10, %1117 : vector<8x64xi1>, vector<8x64xf32>
    %c9_i32_206 = arith.constant 9 : i32
    %1123 = vector.broadcast %c9_i32_206 : i32 to vector<8x1xi32>
    %1124 = arith.cmpi eq, %1082, %1123 : vector<8x1xi32>
    %1125 = vector.shape_cast %1124 : vector<8x1xi1> to vector<8x1xi1>
    %1126 = vector.broadcast %1125 : vector<8x1xi1> to vector<8x64xi1>
    %1127 = arith.select %1126, %11, %1122 : vector<8x64xi1>, vector<8x64xf32>
    %c10_i32_207 = arith.constant 10 : i32
    %1128 = vector.broadcast %c10_i32_207 : i32 to vector<8x1xi32>
    %1129 = arith.cmpi eq, %1082, %1128 : vector<8x1xi32>
    %1130 = vector.shape_cast %1129 : vector<8x1xi1> to vector<8x1xi1>
    %1131 = vector.broadcast %1130 : vector<8x1xi1> to vector<8x64xi1>
    %1132 = arith.select %1131, %12, %1127 : vector<8x64xi1>, vector<8x64xf32>
    %c11_i32_208 = arith.constant 11 : i32
    %1133 = vector.broadcast %c11_i32_208 : i32 to vector<8x1xi32>
    %1134 = arith.cmpi eq, %1082, %1133 : vector<8x1xi32>
    %1135 = vector.shape_cast %1134 : vector<8x1xi1> to vector<8x1xi1>
    %1136 = vector.broadcast %1135 : vector<8x1xi1> to vector<8x64xi1>
    %1137 = arith.select %1136, %13, %1132 : vector<8x64xi1>, vector<8x64xf32>
    %c12_i32_209 = arith.constant 12 : i32
    %1138 = vector.broadcast %c12_i32_209 : i32 to vector<8x1xi32>
    %1139 = arith.cmpi eq, %1082, %1138 : vector<8x1xi32>
    %1140 = vector.shape_cast %1139 : vector<8x1xi1> to vector<8x1xi1>
    %1141 = vector.broadcast %1140 : vector<8x1xi1> to vector<8x64xi1>
    %1142 = arith.select %1141, %14, %1137 : vector<8x64xi1>, vector<8x64xf32>
    %c13_i32_210 = arith.constant 13 : i32
    %1143 = vector.broadcast %c13_i32_210 : i32 to vector<8x1xi32>
    %1144 = arith.cmpi eq, %1082, %1143 : vector<8x1xi32>
    %1145 = vector.shape_cast %1144 : vector<8x1xi1> to vector<8x1xi1>
    %1146 = vector.broadcast %1145 : vector<8x1xi1> to vector<8x64xi1>
    %1147 = arith.select %1146, %15, %1142 : vector<8x64xi1>, vector<8x64xf32>
    %c14_i32_211 = arith.constant 14 : i32
    %1148 = vector.broadcast %c14_i32_211 : i32 to vector<8x1xi32>
    %1149 = arith.cmpi eq, %1082, %1148 : vector<8x1xi32>
    %1150 = vector.shape_cast %1149 : vector<8x1xi1> to vector<8x1xi1>
    %1151 = vector.broadcast %1150 : vector<8x1xi1> to vector<8x64xi1>
    %1152 = arith.select %1151, %16, %1147 : vector<8x64xi1>, vector<8x64xf32>
    %c15_i32_212 = arith.constant 15 : i32
    %1153 = vector.broadcast %c15_i32_212 : i32 to vector<8x1xi32>
    %1154 = arith.cmpi eq, %1082, %1153 : vector<8x1xi32>
    %1155 = vector.shape_cast %1154 : vector<8x1xi1> to vector<8x1xi1>
    %1156 = vector.broadcast %1155 : vector<8x1xi1> to vector<8x64xi1>
    %1157 = arith.select %1156, %17, %1152 : vector<8x64xi1>, vector<8x64xf32>
    %1158 = vector.extract_strided_slice %1 {offsets = [0, 15], sizes = [8, 1], strides = [1, 1]} : vector<8x16xi32> to vector<8x1xi32>
    %c1_i32_213 = arith.constant 1 : i32
    %1159 = vector.broadcast %c1_i32_213 : i32 to vector<8x1xi32>
    %1160 = arith.cmpi eq, %1158, %1159 : vector<8x1xi32>
    %1161 = vector.shape_cast %1160 : vector<8x1xi1> to vector<8x1xi1>
    %1162 = vector.broadcast %1161 : vector<8x1xi1> to vector<8x64xi1>
    %1163 = arith.select %1162, %3, %2 : vector<8x64xi1>, vector<8x64xf32>
    %c2_i32_214 = arith.constant 2 : i32
    %1164 = vector.broadcast %c2_i32_214 : i32 to vector<8x1xi32>
    %1165 = arith.cmpi eq, %1158, %1164 : vector<8x1xi32>
    %1166 = vector.shape_cast %1165 : vector<8x1xi1> to vector<8x1xi1>
    %1167 = vector.broadcast %1166 : vector<8x1xi1> to vector<8x64xi1>
    %1168 = arith.select %1167, %4, %1163 : vector<8x64xi1>, vector<8x64xf32>
    %c3_i32_215 = arith.constant 3 : i32
    %1169 = vector.broadcast %c3_i32_215 : i32 to vector<8x1xi32>
    %1170 = arith.cmpi eq, %1158, %1169 : vector<8x1xi32>
    %1171 = vector.shape_cast %1170 : vector<8x1xi1> to vector<8x1xi1>
    %1172 = vector.broadcast %1171 : vector<8x1xi1> to vector<8x64xi1>
    %1173 = arith.select %1172, %5, %1168 : vector<8x64xi1>, vector<8x64xf32>
    %c4_i32_216 = arith.constant 4 : i32
    %1174 = vector.broadcast %c4_i32_216 : i32 to vector<8x1xi32>
    %1175 = arith.cmpi eq, %1158, %1174 : vector<8x1xi32>
    %1176 = vector.shape_cast %1175 : vector<8x1xi1> to vector<8x1xi1>
    %1177 = vector.broadcast %1176 : vector<8x1xi1> to vector<8x64xi1>
    %1178 = arith.select %1177, %6, %1173 : vector<8x64xi1>, vector<8x64xf32>
    %c5_i32_217 = arith.constant 5 : i32
    %1179 = vector.broadcast %c5_i32_217 : i32 to vector<8x1xi32>
    %1180 = arith.cmpi eq, %1158, %1179 : vector<8x1xi32>
    %1181 = vector.shape_cast %1180 : vector<8x1xi1> to vector<8x1xi1>
    %1182 = vector.broadcast %1181 : vector<8x1xi1> to vector<8x64xi1>
    %1183 = arith.select %1182, %7, %1178 : vector<8x64xi1>, vector<8x64xf32>
    %c6_i32_218 = arith.constant 6 : i32
    %1184 = vector.broadcast %c6_i32_218 : i32 to vector<8x1xi32>
    %1185 = arith.cmpi eq, %1158, %1184 : vector<8x1xi32>
    %1186 = vector.shape_cast %1185 : vector<8x1xi1> to vector<8x1xi1>
    %1187 = vector.broadcast %1186 : vector<8x1xi1> to vector<8x64xi1>
    %1188 = arith.select %1187, %8, %1183 : vector<8x64xi1>, vector<8x64xf32>
    %c7_i32_219 = arith.constant 7 : i32
    %1189 = vector.broadcast %c7_i32_219 : i32 to vector<8x1xi32>
    %1190 = arith.cmpi eq, %1158, %1189 : vector<8x1xi32>
    %1191 = vector.shape_cast %1190 : vector<8x1xi1> to vector<8x1xi1>
    %1192 = vector.broadcast %1191 : vector<8x1xi1> to vector<8x64xi1>
    %1193 = arith.select %1192, %9, %1188 : vector<8x64xi1>, vector<8x64xf32>
    %c8_i32_220 = arith.constant 8 : i32
    %1194 = vector.broadcast %c8_i32_220 : i32 to vector<8x1xi32>
    %1195 = arith.cmpi eq, %1158, %1194 : vector<8x1xi32>
    %1196 = vector.shape_cast %1195 : vector<8x1xi1> to vector<8x1xi1>
    %1197 = vector.broadcast %1196 : vector<8x1xi1> to vector<8x64xi1>
    %1198 = arith.select %1197, %10, %1193 : vector<8x64xi1>, vector<8x64xf32>
    %c9_i32_221 = arith.constant 9 : i32
    %1199 = vector.broadcast %c9_i32_221 : i32 to vector<8x1xi32>
    %1200 = arith.cmpi eq, %1158, %1199 : vector<8x1xi32>
    %1201 = vector.shape_cast %1200 : vector<8x1xi1> to vector<8x1xi1>
    %1202 = vector.broadcast %1201 : vector<8x1xi1> to vector<8x64xi1>
    %1203 = arith.select %1202, %11, %1198 : vector<8x64xi1>, vector<8x64xf32>
    %c10_i32_222 = arith.constant 10 : i32
    %1204 = vector.broadcast %c10_i32_222 : i32 to vector<8x1xi32>
    %1205 = arith.cmpi eq, %1158, %1204 : vector<8x1xi32>
    %1206 = vector.shape_cast %1205 : vector<8x1xi1> to vector<8x1xi1>
    %1207 = vector.broadcast %1206 : vector<8x1xi1> to vector<8x64xi1>
    %1208 = arith.select %1207, %12, %1203 : vector<8x64xi1>, vector<8x64xf32>
    %c11_i32_223 = arith.constant 11 : i32
    %1209 = vector.broadcast %c11_i32_223 : i32 to vector<8x1xi32>
    %1210 = arith.cmpi eq, %1158, %1209 : vector<8x1xi32>
    %1211 = vector.shape_cast %1210 : vector<8x1xi1> to vector<8x1xi1>
    %1212 = vector.broadcast %1211 : vector<8x1xi1> to vector<8x64xi1>
    %1213 = arith.select %1212, %13, %1208 : vector<8x64xi1>, vector<8x64xf32>
    %c12_i32_224 = arith.constant 12 : i32
    %1214 = vector.broadcast %c12_i32_224 : i32 to vector<8x1xi32>
    %1215 = arith.cmpi eq, %1158, %1214 : vector<8x1xi32>
    %1216 = vector.shape_cast %1215 : vector<8x1xi1> to vector<8x1xi1>
    %1217 = vector.broadcast %1216 : vector<8x1xi1> to vector<8x64xi1>
    %1218 = arith.select %1217, %14, %1213 : vector<8x64xi1>, vector<8x64xf32>
    %c13_i32_225 = arith.constant 13 : i32
    %1219 = vector.broadcast %c13_i32_225 : i32 to vector<8x1xi32>
    %1220 = arith.cmpi eq, %1158, %1219 : vector<8x1xi32>
    %1221 = vector.shape_cast %1220 : vector<8x1xi1> to vector<8x1xi1>
    %1222 = vector.broadcast %1221 : vector<8x1xi1> to vector<8x64xi1>
    %1223 = arith.select %1222, %15, %1218 : vector<8x64xi1>, vector<8x64xf32>
    %c14_i32_226 = arith.constant 14 : i32
    %1224 = vector.broadcast %c14_i32_226 : i32 to vector<8x1xi32>
    %1225 = arith.cmpi eq, %1158, %1224 : vector<8x1xi32>
    %1226 = vector.shape_cast %1225 : vector<8x1xi1> to vector<8x1xi1>
    %1227 = vector.broadcast %1226 : vector<8x1xi1> to vector<8x64xi1>
    %1228 = arith.select %1227, %16, %1223 : vector<8x64xi1>, vector<8x64xf32>
    %c15_i32_227 = arith.constant 15 : i32
    %1229 = vector.broadcast %c15_i32_227 : i32 to vector<8x1xi32>
    %1230 = arith.cmpi eq, %1158, %1229 : vector<8x1xi32>
    %1231 = vector.shape_cast %1230 : vector<8x1xi1> to vector<8x1xi1>
    %1232 = vector.broadcast %1231 : vector<8x1xi1> to vector<8x64xi1>
    %1233 = arith.select %1232, %17, %1228 : vector<8x64xi1>, vector<8x64xf32>
    %1234 = tpu.concatenate %93, %169, %245, %321, %397, %473, %549, %625, %701, %777, %853, %929, %1005, %1081, %1157, %1233 in 1 : vector<8x64xf32>, vector<8x64xf32>, vector<8x64xf32>, vector<8x64xf32>, vector<8x64xf32>, vector<8x64xf32>, vector<8x64xf32>, vector<8x64xf32>, vector<8x64xf32>, vector<8x64xf32>, vector<8x64xf32>, vector<8x64xf32>, vector<8x64xf32>, vector<8x64xf32>, vector<8x64xf32>, vector<8x64xf32> -> vector<8x1024xf32>
    %1235 = tpu.concatenate %0, %1234 in 0 : vector<8x1024xf32>, vector<8x1024xf32> -> vector<16x1024xf32>
    %1236 = arith.truncf %1235 : vector<16x1024xf32> to vector<16x1024xbf16>
    %c0_228 = arith.constant 0 : index
    %c0_229 = arith.constant 0 : index
    %1237 = vector.load %arg2[%c0_228, %c0_229] : memref<16x1024xbf16, #tpu.memory_space<vmem>>, vector<16x1024xbf16>
    %cst = arith.constant dense<0.000000e+00> : vector<16x16xf32>
    %1238 = tpu.matmul %1236, %1237, %cst {dimension_numbers = #tpu.dot_dimension_numbers<[1], [1], [0], [0], [0, 0, 1, 0], [], []>} : vector<16x1024xbf16>, vector<16x1024xbf16>, vector<16x16xf32> -> vector<16x16xf32>
    %c0_230 = arith.constant 0 : index
    %c0_231 = arith.constant 0 : index
    %1239 = vector.load %arg3[%c0_230, %c0_231] : memref<1x16xf32, #tpu.memory_space<vmem>>, vector<1x16xf32>
    %1240 = vector.broadcast %1239 : vector<1x16xf32> to vector<16x16xf32>
    %1241 = arith.addf %1238, %1240 : vector<16x16xf32>
    %1242 = vector.extract_strided_slice %1241 {offsets = [0, 0], sizes = [8, 16], strides = [1, 1]} : vector<16x16xf32> to vector<8x16xf32>
    %c0_232 = arith.constant 0 : index
    %c0_233 = arith.constant 0 : index
    %1243 = vector.load %arg4[%c0_232, %c0_233] : memref<8x16xf32, #tpu.memory_space<vmem>>, vector<8x16xf32>
    tpu.vector_store %arg4[%c0_232, %c0_233], %1242 {strides = array<i32>} : memref<8x16xf32, #tpu.memory_space<vmem>>, vector<8x16xf32>,
    %cst_234 = arith.constant dense<0xFF800000> : vector<16xf32>
    %1244 = vector.multi_reduction <maximumf>, %1241, %cst_234 [1] : vector<16x16xf32> to vector<16xf32>
    %1245 = vector.shape_cast %1244 : vector<16xf32> to vector<16x1xf32>
    %1246 = vector.broadcast %1245 : vector<16x1xf32> to vector<16x16xf32>
    %1247 = arith.subf %1241, %1246 : vector<16x16xf32>
    %1248 = math.exp %1247 : vector<16x16xf32>
    %cst_235 = arith.constant dense<0.000000e+00> : vector<16xf32>
    %1249 = vector.multi_reduction <add>, %1248, %cst_235 [1] : vector<16x16xf32> to vector<16xf32>
    %1250 = vector.shape_cast %1249 : vector<16xf32> to vector<16x1xf32>
    %1251 = vector.broadcast %1250 : vector<16x1xf32> to vector<16x16xf32>
    %1252 = arith.divf %1248, %1251 : vector<16x16xf32>
    %1253 = math.log %1250 : vector<16x1xf32>
    %1254 = vector.broadcast %1253 : vector<16x1xf32> to vector<16x16xf32>
    %1255 = arith.subf %1247, %1254 : vector<16x16xf32>
    %1256 = vector.extract_strided_slice %1252 {offsets = [0, 0], sizes = [8, 16], strides = [1, 1]} : vector<16x16xf32> to vector<8x16xf32>
    %1257 = vector.extract_strided_slice %1252 {offsets = [8, 0], sizes = [8, 16], strides = [1, 1]} : vector<16x16xf32> to vector<8x16xf32>
    %1258 = vector.extract_strided_slice %1255 {offsets = [0, 0], sizes = [8, 16], strides = [1, 1]} : vector<16x16xf32> to vector<8x16xf32>
    %1259 = arith.mulf %1256, %1258 : vector<8x16xf32>
    %cst_236 = arith.constant dense<0.000000e+00> : vector<8xf32>
    %1260 = vector.multi_reduction <add>, %1259, %cst_236 [1] : vector<8x16xf32> to vector<8xf32>
    %1261 = vector.shape_cast %1260 : vector<8xf32> to vector<8x1xf32>
    %cst_237 = arith.constant 0.000000e+00 : f32
    %1262 = vector.broadcast %cst_237 : f32 to vector<8x1xf32>
    %1263 = arith.subf %1262, %1261 : vector<8x1xf32>
    %cst_238 = arith.constant 3.45387769 : f32
    %1264 = vector.broadcast %cst_238 : f32 to vector<8x1xf32>
    %1265 = arith.cmpf olt, %1263, %1264 : vector<8x1xf32>
    %1266 = tpu.iota {dimensions = array<i32: 1>} : vector<8x16xi32>
    %1267 = vector.extract_strided_slice %1241 {offsets = [0, 0], sizes = [8, 16], strides = [1, 1]} : vector<16x16xf32> to vector<8x16xf32>
    %1268 = vector.extract_strided_slice %1245 {offsets = [0, 0], sizes = [8, 1], strides = [1, 1]} : vector<16x1xf32> to vector<8x1xf32>
    %1269 = vector.broadcast %1268 : vector<8x1xf32> to vector<8x16xf32>
    %1270 = arith.cmpf oeq, %1267, %1269 : vector<8x16xf32>
    %c16_i32 = arith.constant 16 : i32
    %1271 = vector.broadcast %c16_i32 : i32 to vector<8x16xi32>
    %1272 = arith.select %1270, %1266, %1271 : vector<8x16xi1>, vector<8x16xi32>
    %cst_239 = arith.constant dense<2147483647> : vector<8xi32>
    %1273 = vector.multi_reduction <minsi>, %1272, %cst_239 [1] : vector<8x16xi32> to vector<8xi32>
    %1274 = vector.shape_cast %1273 : vector<8xi32> to vector<8x1xi32>
    %1275 = vector.broadcast %1274 : vector<8x1xi32> to vector<8x16xi32>
    %1276 = arith.cmpi eq, %1266, %1275 : vector<8x16xi32>
    %1277 = arith.extui %1276 : vector<8x16xi1> to vector<8x16xi32>
    %1278 = arith.sitofp %1277 : vector<8x16xi32> to vector<8x16xf32>
    %1279 = arith.subf %1256, %1257 : vector<8x16xf32>
    %1280 = arith.mulf %1279, %1278 : vector<8x16xf32>
    %cst_240 = arith.constant dense<0.000000e+00> : vector<8xf32>
    %1281 = vector.multi_reduction <add>, %1280, %cst_240 [1] : vector<8x16xf32> to vector<8xf32>
    %1282 = vector.shape_cast %1281 : vector<8xf32> to vector<8x1xf32>
    %cst_241 = arith.constant 3.000000e-01 : f32
    %1283 = vector.broadcast %cst_241 : f32 to vector<8x1xf32>
    %1284 = arith.cmpf ogt, %1282, %1283 : vector<8x1xf32>
    %1285 = arith.andi %1265, %1284 : vector<8x1xi1>
    %1286 = arith.extui %1285 : vector<8x1xi1> to vector<8x1xi32>
    %1287 = arith.sitofp %1286 : vector<8x1xi32> to vector<8x1xf32>
    %cst_242 = arith.constant 2.76310205 : f32
    %1288 = vector.broadcast %cst_242 : f32 to vector<8x1xf32>
    %1289 = arith.subf %1288, %1263 : vector<8x1xf32>
    %1290 = math.exp %1289 : vector<8x1xf32>
    %cst_243 = arith.constant 1.000000e+00 : f32
    %1291 = vector.broadcast %cst_243 : f32 to vector<8x1xf32>
    %1292 = arith.mulf %1291, %1290 : vector<8x1xf32>
    %1293 = math.exp %1282 : vector<8x1xf32>
    %cst_244 = arith.constant 1.000000e+00 : f32
    %1294 = vector.broadcast %cst_244 : f32 to vector<8x1xf32>
    %1295 = arith.mulf %1294, %1293 : vector<8x1xf32>
    %1296 = arith.addf %1292, %1295 : vector<8x1xf32>
    %1297 = arith.mulf %1263, %1296 : vector<8x1xf32>
    %1298 = vector.shape_cast %1287 : vector<8x1xf32> to vector<1x8x1xf32>
    %cst_245 = arith.constant dense<0.000000e+00> : vector<1xf32>
    %1299 = vector.multi_reduction <add>, %1298, %cst_245 [1, 2] : vector<1x8x1xf32> to vector<1xf32>
    %1300 = vector.shape_cast %1299 : vector<1xf32> to vector<1x1x1xf32>
    %1301 = vector.extract %1300[0, 0, 0] : f32 from vector<1x1x1xf32>
    %1302 = vector.broadcast %1301 : f32 to vector<1x1xf32>
    %1303 = arith.mulf %1297, %1287 : vector<8x1xf32>
    %1304 = vector.shape_cast %1303 : vector<8x1xf32> to vector<1x8x1xf32>
    %cst_246 = arith.constant dense<0.000000e+00> : vector<1xf32>
    %1305 = vector.multi_reduction <add>, %1304, %cst_246 [1, 2] : vector<1x8x1xf32> to vector<1xf32>
    %1306 = vector.shape_cast %1305 : vector<1xf32> to vector<1x1x1xf32>
    %1307 = vector.extract %1306[0, 0, 0] : f32 from vector<1x1x1xf32>
    %1308 = vector.broadcast %1307 : f32 to vector<1x1xf32>
    %cst_247 = arith.constant 0.000000e+00 : f32
    %1309 = vector.broadcast %cst_247 : f32 to vector<1x1xf32>
    %1310 = arith.cmpf ogt, %1302, %1309 : vector<1x1xf32>
    %cst_248 = arith.constant 1.000000e+00 : f32
    %1311 = vector.broadcast %cst_248 : f32 to vector<1x1xf32>
    %1312 = arith.maximumf %1302, %1311 : vector<1x1xf32>
    %1313 = arith.divf %1308, %1312 : vector<1x1xf32>
    %cst_249 = arith.constant 0.000000e+00 : f32
    %1314 = vector.broadcast %cst_249 : f32 to vector<1x1xf32>
    %1315 = arith.select %1310, %1313, %1314 : vector<1x1xi1>, vector<1x1xf32>
    %c0_250 = arith.constant 0 : index
    %c0_251 = arith.constant 0 : index
    %1316 = vector.load %arg6[%c0_250, %c0_251] : memref<1x1xf32, #tpu.memory_space<vmem>>, vector<1x1xf32>
    tpu.vector_store %arg6[%c0_250, %c0_251], %1315 {strides = array<i32>} : memref<1x1xf32, #tpu.memory_space<vmem>>, vector<1x1xf32>,
    %c0_252 = arith.constant 0 : index
    %c0_253 = arith.constant 0 : index
    %1317 = vector.load %arg5[%c0_252, %c0_253] : memref<8x1xf32, #tpu.memory_space<vmem>>, vector<8x1xf32>
    tpu.vector_store %arg5[%c0_252, %c0_253], %1263 {strides = array<i32>} : memref<8x1xf32, #tpu.memory_space<vmem>>, vector<8x1xf32>,
    return
  }
}

</mosaic_0001>

<bundles_post_ra>
// kernel: deyo_forward.1
= control target key start
LH: loop header
LB: loop body
LE: loop exit
PB: predicated region body
PF: predicated region fallthrough
CT: control target
= control target key end

     0   :  { %12 = vsyncpa [#allocation3], 0  ;;  %v3504_v1 = vmov 10   ;;  %v3505_v2 = vmov 2   ;;  %v3506_v3 = vmov 0   ;;  %s4994_s0 = inlined_call_operand.vmem [shape: s32[8,16], index: 0, kind: input, shape index: {}]   ;;  %s4995_s1 = inlined_call_operand.vmem [shape: f32[8,1024], index: 1, kind: input, shape index: {}]   ;;  %s4996_s2 = inlined_call_operand.vmem [shape: bf16[16,1024], index: 2, kind: input, shape index: {}]   ;;  %s4997_s3 = inlined_call_operand.vmem [shape: f32[1,16], index: 3, kind: input, shape index: {}]   ;;  %s4998_s4 = inlined_call_operand.hbm [shape: f32[8,16], index: 4, kind: output, shape index: {0}]   ;;  %s4999_s5 = inlined_call_operand.vmem [shape: f32[8,1], index: 5, kind: output, shape index: {1}]   ;;  %s5000_s6 = inlined_call_operand.hbm [shape: f32[1,1], index: 6, kind: output, shape index: {2}]  }
   0x1   :  { %v3562_v0 = vld [vmem:[%s4994_s0] sm:$0xff]  ;;  %2614 = vset.pattern.permute.xlu1 %v3504_v1  ;;  %2612 = vset.pattern.permute.xlu0 %v3505_v2 }
   0x2   :  { %vm32_vm0 = vcmp.eq.s32.totalorder %v3562_v0, 1 }
   0x3   :  { %v33_v4 = vsel %vm32_vm0, 1, %v3506_v3 }
   0x4   :  { %13 = vsyncpa [#allocation5], 0  ;;  %1377 = vperm.xlu1 %2614, %v33_v4   ;;  %329 = vperm.xlu0 %2612, %v33_v4   ;;  %v3507_v5 = vmov 8   ;;  %v3573_v6 = vld [vmem:[%s4995_s1] sm:$0xff]  ;;  %v3508_v7 = vmov 6   ;;  %s3509_s25 = smov 64  }
   0x5   :  { %v3510_v8 = vmov 4   ;;  %v3511_v9 = vmov 12   ;;  %vm43_vm1 = vcmp.eq.s32.totalorder %v3562_v0, 2  ;;  %v3512_v10 = vmov 14  }
   0x6   :  { %v3583_v11 = vsel %vm43_vm1, 1, %v3506_v3  ;;  %v3513_v12 = vmov 3   ;;  %v3514_v13 = vmov 9   ;;  %v3515_v14 = vmov 1  }
   0x7   :  { %v3516_v15 = vmov 7   ;;  %v3517_v16 = vmov 11   ;;  %v3518_v17 = vmov 5   ;;  %v3519_v18 = vmov 15  }
   0x8   :  { %2615 = vset.pattern.permute.xlu1 %v3507_v5  ;;  %2613 = vset.pattern.permute.xlu0 %v3506_v3  ;;  %v3520_v19 = vmov 13   ;;  %vm54_vm6 = vcmp.eq.s32.totalorder %v3562_v0, 3 }
   0x9   :  { %1115 = vperm.xlu1 %2615, %v33_v4   ;;  %35 = vperm.xlu0 %2613, %v33_v4   ;;  %v3625_v33 = vsel %vm54_vm6, 1, %v3506_v3 }
   0xd   :  { %2616 = vset.pattern.permute.xlu0 %v3508_v7  ;;  %39 = vrot.lane.b32.xlu1 %v3573_v6, %s3509_s25 }
   0xe   :  { %853 = vperm.xlu0 %2616, %v33_v4   ;;  %2617 = vset.pattern.permute.xlu1 %v3510_v8 }
  0x11   :  { %591 = vperm.xlu1 %2617, %v33_v4  }
  0x12   :  { %2619 = vset.pattern.permute.xlu0 %v3511_v9 }
  0x13   :  { %1639 = vperm.xlu0 %2619, %v33_v4  }
  0x15   :  { %2618 = vset.pattern.permute.xlu1 %v3512_v10 }
  0x16   :  { %1901 = vperm.xlu1 %2618, %v33_v4  }
  0x17   :  { %2622 = vset.pattern.permute.xlu0 %v3505_v2 }
  0x18   :  { %334 = vperm.xlu0 %2622, %v3583_v11  }
  0x1a   :  { %2620 = vset.pattern.permute.xlu1 %v3513_v12 }
  0x1b   :  { %460 = vperm.xlu1 %2620, %v33_v4  }
  0x1c   :  { %2625 = vset.pattern.permute.xlu0 %v3514_v13 }
  0x1d   :  { %1246 = vperm.xlu0 %2625, %v33_v4  }
  0x1f   :  { %2621 = vset.pattern.permute.xlu1 %v3515_v14 }
  0x20   :  { %198 = vperm.xlu1 %2621, %v33_v4  }
  0x21   :  { %2628 = vset.pattern.permute.xlu0 %v3516_v15 }
  0x22   :  { %984 = vperm.xlu0 %2628, %v33_v4  }
  0x24   :  { %2623 = vset.pattern.permute.xlu1 %v3506_v3 }
  0x25   :  { %46 = vperm.xlu1 %2623, %v3583_v11  }
  0x26   :  { %2631 = vset.pattern.permute.xlu0 %v3510_v8 }
  0x27   :  { %596 = vperm.xlu0 %2631, %v3583_v11  }
  0x29   :  { %2624 = vset.pattern.permute.xlu1 %v3517_v16 }
  0x2a   :  { %1508 = vperm.xlu1 %2624, %v33_v4  }
  0x2b   :  { %2639 = vset.pattern.permute.xlu0 %v3512_v10 }
  0x2e   :  { %2626 = vset.pattern.permute.xlu1 %v3504_v1 }
  0x2f   :  { %1382 = vperm.xlu1 %2626, %v3583_v11  }
  0x33   :  { %2627 = vset.pattern.permute.xlu1 %v3507_v5 }
  0x34   :  { %1120 = vperm.xlu1 %2627, %v3583_v11  }
  0x38   :  { %2629 = vset.pattern.permute.xlu1 %v3518_v17 }
  0x39   :  { %722 = vperm.xlu1 %2629, %v33_v4  }
  0x3d   :  { %2630 = vset.pattern.permute.xlu1 %v3508_v7 }
  0x3e   :  { %858 = vperm.xlu1 %2630, %v3583_v11  }
  0x42   :  { %2632 = vset.pattern.permute.xlu1 %v3519_v18 }
  0x43   :  { %2032 = vperm.xlu1 %2632, %v33_v4  }
  0x47   :  { %2633 = vset.pattern.permute.xlu1 %v3520_v19 }
  0x48   :  { %1770 = vperm.xlu1 %2633, %v33_v4  }
  0x4c   :  { %2640 = vset.pattern.permute.xlu1 %v3511_v9 }
  0x4d   :  { %1644 = vperm.xlu1 %2640, %v3583_v11  }
  0x51   :  { %2641 = vset.pattern.permute.xlu1 %v3513_v12 }
  0x52   :  { %465 = vperm.xlu1 %2641, %v3583_v11  }
  0x56   :  { %2648 = vset.pattern.permute.xlu1 %v3505_v2 }
  0x83   :  { %v1378_v20 = vpop.permute.xlu1 %1377  ;;  %v330_v21 = vpop.permute.xlu0 %329 }
  0x84   :  { %vm1379_vm3 = vcmp.eq.s32.totalorder %v1378_v20, 1  ;;  %vm331_vm4 = vcmp.eq.s32.totalorder %v330_v21, 1 }
  0x88   :  { %v1116_v22 = vpop.permute.xlu1 %1115  ;;  %v36_v23 = vpop.permute.xlu0 %35 }
  0x89   :  { %vm37_vm2 = vcmp.eq.s32.totalorder %v36_v23, 1  ;;  %vm1117_vm5 = vcmp.eq.s32.totalorder %v1116_v22, 1 }
  0x8c   :  { %v3611_v24 = vpop.permute.xlu1 %39 }
  0x8d   :  { %v1118_v25 = vsel %vm1117_vm5, %v3573_v6, %v3611_v24  ;;  %v1380_v26 = vsel %vm1379_vm3, %v3573_v6, %v3611_v24  ;;  %v42_v27 = vsel %vm37_vm2, %v3573_v6, %v3611_v24  ;;  %v332_v28 = vsel %vm331_vm4, %v3573_v6, %v3611_v24  ;;  %v854_v29 = vpop.permute.xlu0 %853 }
  0x8e   :  { %v2643_v30 = vpack.i.bf16 %v1118_v25, %v1380_v26  ;;  %v2634_v31 = vpack.i.bf16 %v42_v27, %v332_v28  ;;  %vm855_vm9 = vcmp.eq.s32.totalorder %v854_v29, 1  ;;  %v3704_v27 = vld [vmem:[%s4995_s1 + $0x8] sm:$0xff] }
  0x8f   :  { %v856_v38 = vsel %vm855_vm9, %v3573_v6, %v3611_v24 }
  0x90   :  { %2644 = vrot.lane.b32.xlu1 %v2643_v30, %s3509_s25  ;;  %2635 = vrot.lane.b32.xlu0 %v2634_v31, %s3509_s25  ;;  %v592_v32 = vpop.permute.xlu1 %591 }
  0x91   :  { %vm593_vm7 = vcmp.eq.s32.totalorder %v592_v32, 1 }
  0x92   :  { %v1640_v34 = vpop.permute.xlu0 %1639  ;;  %v594_v36 = vsel %vm593_vm7, %v3573_v6, %v3611_v24  ;;  %vm65_vm7 = vcmp.eq.s32.totalorder %v3562_v0, 4 }
  0x93   :  { %vm1641_vm10 = vcmp.eq.s32.totalorder %v1640_v34, 1  ;;  %v2650_v41 = vpack.i.bf16 %v594_v36, %v856_v38 }
  0x94   :  { %343 = vperm.xlu1 %2648, %v3625_v33   ;;  %1906 = vperm.xlu0 %2639, %v3583_v11   ;;  %v1642_v39 = vsel %vm1641_vm10, %v3573_v6, %v3611_v24 }
  0x95   :  { %v1902_v35 = vpop.permute.xlu1 %1901 }
  0x96   :  { %vm1903_vm8 = vcmp.eq.s32.totalorder %v1902_v35, 1 }
  0x97   :  { %v1904_v37 = vsel %vm1903_vm8, %v3573_v6, %v3611_v24  ;;  %v3653_v45 = vpop.permute.xlu0 %334 }
  0x98   :  { %2649 = vset.pattern.permute.xlu1 %v3506_v3  ;;  %2642 = vset.pattern.permute.xlu0 %v3515_v14  ;;  %v2655_v42 = vpack.i.bf16 %v1642_v39, %v1904_v37  ;;  %vm336_vm3 = vcmp.eq.s32.totalorder %v3653_v45, 1  ;;  %v3718_v37 = vsel %vm65_vm7, 1, %v3506_v3 }
  0x99   :  { %57 = vperm.xlu1 %2649, %v3625_v33   ;;  %203 = vperm.xlu0 %2642, %v3583_v11  }
  0x9a   :  { %v461_v40 = vpop.permute.xlu1 %460 }
  0x9b   :  { %vm462_vm14 = vcmp.eq.s32.totalorder %v461_v40, 1 }
  0x9c   :  { %v1247_v48 = vpop.permute.xlu0 %1246  ;;  %v463_v57 = vsel %vm462_vm14, %v3573_v6, %v3611_v24 }
  0x9d   :  { %2651 = vrot.lane.b32.xlu1 %v2650_v41, %s3509_s25  ;;  %2656 = vrot.lane.b32.xlu0 %v2655_v42, %s3509_s25  ;;  %vm1248_vm12 = vcmp.eq.s32.totalorder %v1247_v48, 1 }
  0x9e   :  { %2661 = vset.pattern.permute.xlu1 %v3514_v13  ;;  %2660 = vset.pattern.permute.xlu0 %v3517_v16  ;;  %v1249_v51 = vsel %vm1248_vm12, %v3573_v6, %v3611_v24 }
  0x9f   :  { %v199_v43 = vpop.permute.xlu1 %198 }
  0xa0   :  { %vm200_vm13 = vcmp.eq.s32.totalorder %v199_v43, 1 }
  0xa1   :  { %1251 = vperm.xlu1 %2661, %v3583_v11   ;;  %1513 = vperm.xlu0 %2660, %v3583_v11   ;;  %v201_v55 = vsel %vm200_vm13, %v3573_v6, %v3611_v24  ;;  %v985_v56 = vpop.permute.xlu0 %984 }
  0xa2   :  { %vm986_vm0 = vcmp.eq.s32.totalorder %v985_v56, 1  ;;  %v2672_v58 = vpack.i.bf16 %v201_v55, %v463_v57 }
  0xa3   :  { %v987_v61 = vsel %vm986_vm0, %v3573_v6, %v3611_v24 }
  0xa4   :  { %v3647_v44 = vpop.permute.xlu1 %46 }
  0xa5   :  { %2662 = vset.pattern.permute.xlu1 %v3504_v1  ;;  %2663 = vset.pattern.permute.xlu0 %v3507_v5  ;;  %vm48_vm4 = vcmp.eq.s32.totalorder %v3647_v44, 1 }
  0xa6   :  { %1391 = vperm.xlu1 %2662, %v3625_v33   ;;  %1129 = vperm.xlu0 %2663, %v3625_v33   ;;  %v597_v22 = vpop.permute.xlu0 %596 }
  0xa7   :  { %vm598_vm9 = vcmp.eq.s32.totalorder %v597_v22, 1 }
  0xa9   :  { %v1509_v46 = vpop.permute.xlu1 %1508 }
  0xaa   :  { %2665 = vset.pattern.permute.xlu1 %v3518_v17  ;;  %2664 = vset.pattern.permute.xlu0 %v3516_v15  ;;  %vm1510_vm11 = vcmp.eq.s32.totalorder %v1509_v46, 1 }
  0xab   :  { %727 = vperm.xlu1 %2665, %v3583_v11   ;;  %989 = vperm.xlu0 %2664, %v3583_v11   ;;  %v1511_v50 = vsel %vm1510_vm11, %v3573_v6, %v3611_v24 }
  0xac   :  { %v2677_v52 = vpack.i.bf16 %v1249_v51, %v1511_v50 }
  0xae   :  { %v3659_v47 = vpop.permute.xlu1 %1382 }
  0xaf   :  { %2666 = vset.pattern.permute.xlu1 %v3508_v7  ;;  %2667 = vset.pattern.permute.xlu0 %v3510_v8  ;;  %vm1384_vm5 = vcmp.eq.s32.totalorder %v3659_v47, 1 }
  0xb0   :  { %867 = vperm.xlu1 %2666, %v3625_v33   ;;  %605 = vperm.xlu0 %2667, %v3625_v33  }
  0xb3   :  { %v1121_v49 = vpop.permute.xlu1 %1120 }
  0xb4   :  { %2668 = vset.pattern.permute.xlu1 %v3519_v18  ;;  %2670 = vset.pattern.permute.xlu0 %v3512_v10  ;;  %vm1122_vm6 = vcmp.eq.s32.totalorder %v1121_v49, 1 }
  0xb5   :  { %2037 = vperm.xlu1 %2668, %v3583_v11   ;;  %1915 = vperm.xlu0 %2670, %v3625_v33  }
  0xb8   :  { %v723_v53 = vpop.permute.xlu1 %722 }
  0xb9   :  { %2669 = vset.pattern.permute.xlu1 %v3520_v19  ;;  %2678 = vrot.lane.b32.xlu0 %v2677_v52, %s3509_s25  ;;  %vm724_vm15 = vcmp.eq.s32.totalorder %v723_v53, 1 }
  0xba   :  { %1775 = vperm.xlu1 %2669, %v3583_v11   ;;  %2703 = vset.pattern.permute.xlu0 %v3515_v14  ;;  %v725_v59 = vsel %vm724_vm15, %v3573_v6, %v3611_v24 }
  0xbb   :  { %v2682_v62 = vpack.i.bf16 %v725_v59, %v987_v61 }
  0xbd   :  { %v3677_v54 = vpop.permute.xlu1 %858  ;;  %212 = vperm.xlu0 %2703, %v3625_v33  }
  0xbe   :  { %2671 = vset.pattern.permute.xlu1 %v3511_v9  ;;  %vm860_vm8 = vcmp.eq.s32.totalorder %v3677_v54, 1 }
  0xbf   :  { %1653 = vperm.xlu1 %2671, %v3625_v33  }
  0xc1   :  { %2716 = vset.pattern.permute.xlu0 %v3517_v16 }
  0xc2   :  { %v2033_v60 = vpop.permute.xlu1 %2032 }
  0xc3   :  { %2673 = vrot.lane.b32.xlu1 %v2672_v58, %s3509_s25  ;;  %vm2034_vm1 = vcmp.eq.s32.totalorder %v2033_v60, 1 }
  0xc4   :  { %2702 = vset.pattern.permute.xlu1 %v3513_v12  ;;  %v2035_v4 = vsel %vm2034_vm1, %v3573_v6, %v3611_v24 }
  0xc7   :  { %2683 = vrot.lane.b32.xlu1 %v2682_v62, %s3509_s25  ;;  %v1771_v63 = vpop.permute.xlu1 %1770 }
  0xc8   :  { %vm1772_vm2 = vcmp.eq.s32.totalorder %v1771_v63, 1 }
  0xc9   :  { %v1773_v11 = vsel %vm1772_vm2, %v3573_v6, %v3611_v24 }
  0xca   :  { %v2687_v20 = vpack.i.bf16 %v1773_v11, %v2035_v4 }
  0xcc   :  { %2688 = vrot.lane.b32.xlu1 %v2687_v20, %s3509_s25  ;;  %v1645_v21 = vpop.permute.xlu1 %1644 }
  0xcd   :  { %vm1646_vm10 = vcmp.eq.s32.totalorder %v1645_v21, 1 }
  0xd1   :  { %v3699_v23 = vpop.permute.xlu1 %465 }
  0xd2   :  { %vm467_vm14 = vcmp.eq.s32.totalorder %v3699_v23, 1 }
 0x102   :  { %v2636_v25 = vpop.permute.xlu0 %2635  ;;  %v2645_v26 = vpop.permute.xlu1 %2644 }
 0x103   :  { %v2638_v28 = vunpack.i.h.bf16 %v2636_v25  ;;  %v2637_v29 = vunpack.i.l.bf16 %v2636_v25  ;;  %v2647_v30 = vunpack.i.h.bf16 %v2645_v26  ;;  %v2646_v31 = vunpack.i.l.bf16 %v2645_v26 }
 0x105   :  { %v53_v6 = vsel %vm48_vm4, %v3704_v27, %v2638_v28  ;;  %v341_v24 = vsel %vm336_vm3, %v3704_v27, %v2637_v29  ;;  %v1127_v34 = vsel %vm1122_vm6, %v3704_v27, %v2647_v30  ;;  %v1389_v35 = vsel %vm1384_vm5, %v3704_v27, %v2646_v31 }
 0x106   :  { %v2692_v32 = vpack.i.bf16 %v53_v6, %v341_v24  ;;  %v2697_v36 = vpack.i.bf16 %v1127_v34, %v1389_v35 }
 0x108   :  { %2693 = vrot.lane.b32.xlu1 %v2692_v32, %s3509_s25 }
 0x10c   :  { %2698 = vrot.lane.b32.xlu1 %v2697_v36, %s3509_s25 }
 0x110   :  { %474 = vperm.xlu1 %2702, %v3625_v33  }
 0x113   :  { %v1907_v38 = vpop.permute.xlu0 %1906  ;;  %v3720_v39 = vpop.permute.xlu1 %343 }
 0x114   :  { %2704 = vset.pattern.permute.xlu1 %v3505_v2  ;;  %vm1908_vm11 = vcmp.eq.s32.totalorder %v1907_v38, 1  ;;  %vm345_vm4 = vcmp.eq.s32.totalorder %v3720_v39, 1 }
 0x115   :  { %352 = vperm.xlu1 %2704, %v3718_v37  }
 0x118   :  { %v3724_v40 = vpop.permute.xlu0 %203  ;;  %v3726_v41 = vpop.permute.xlu1 %57 }
 0x119   :  { %2705 = vset.pattern.permute.xlu1 %v3506_v3  ;;  %vm205_vm15 = vcmp.eq.s32.totalorder %v3724_v40, 1  ;;  %vm59_vm5 = vcmp.eq.s32.totalorder %v3726_v41, 1 }
 0x11a   :  { %68 = vperm.xlu1 %2705, %v3718_v37  }
 0x11c   :  { %v2657_v42 = vpop.permute.xlu0 %2656  ;;  %v2652_v43 = vpop.permute.xlu1 %2651 }
 0x11d   :  { %v2659_v44 = vunpack.i.h.bf16 %v2657_v42  ;;  %v2658_v45 = vunpack.i.l.bf16 %v2657_v42  ;;  %v2654_v46 = vunpack.i.h.bf16 %v2652_v43  ;;  %v2653_v47 = vunpack.i.l.bf16 %v2652_v43 }
 0x11e   :  { %2717 = vset.pattern.permute.xlu1 %v3514_v13 }
 0x11f   :  { %1260 = vperm.xlu1 %2717, %v3625_v33   ;;  %v603_v48 = vsel %vm598_vm9, %v3704_v27, %v2654_v46  ;;  %v865_v49 = vsel %vm860_vm8, %v3704_v27, %v2653_v47  ;;  %v1651_v53 = vsel %vm1646_vm10, %v3704_v27, %v2659_v44  ;;  %v1913_v55 = vsel %vm1908_vm11, %v3704_v27, %v2658_v45 }
 0x120   :  { %v2706_v50 = vpack.i.bf16 %v603_v48, %v865_v49  ;;  %v1514_v51 = vpop.permute.xlu0 %1513  ;;  %v1252_v52 = vpop.permute.xlu1 %1251  ;;  %v2711_v54 = vpack.i.bf16 %v1651_v53, %v1913_v55  ;;  %vm76_vm8 = vcmp.eq.s32.totalorder %v3562_v0, 5 }
 0x121   :  { %vm1515_vm12 = vcmp.eq.s32.totalorder %v1514_v51, 1  ;;  %vm1253_vm13 = vcmp.eq.s32.totalorder %v1252_v52, 1  ;;  %v3801_v41 = vsel %vm76_vm8, 1, %v3506_v3 }
 0x122   :  { %2707 = vrot.lane.b32.xlu0 %v2706_v50, %s3509_s25 }
 0x123   :  { %2718 = vset.pattern.permute.xlu1 %v3504_v1 }
 0x124   :  { %1400 = vperm.xlu1 %2718, %v3718_v37  }
 0x125   :  { %v3740_v56 = vpop.permute.xlu0 %1129  ;;  %v3742_v57 = vpop.permute.xlu1 %1391 }
 0x126   :  { %2712 = vrot.lane.b32.xlu0 %v2711_v54, %s3509_s25  ;;  %vm1131_vm6 = vcmp.eq.s32.totalorder %v3740_v56, 1  ;;  %vm1393_vm7 = vcmp.eq.s32.totalorder %v3742_v57, 1 }
 0x128   :  { %2721 = vset.pattern.permute.xlu1 %v3518_v17 }
 0x129   :  { %736 = vperm.xlu1 %2721, %v3625_v33  }
 0x12a   :  { %1522 = vperm.xlu0 %2716, %v3625_v33   ;;  %v990_v58 = vpop.permute.xlu0 %989  ;;  %v728_v59 = vpop.permute.xlu1 %727 }
 0x12b   :  { %vm991_vm0 = vcmp.eq.s32.totalorder %v990_v58, 1  ;;  %vm729_vm1 = vcmp.eq.s32.totalorder %v728_v59, 1 }
 0x12d   :  { %2722 = vset.pattern.permute.xlu1 %v3508_v7 }
 0x12e   :  { %2719 = vset.pattern.permute.xlu0 %v3507_v5  ;;  %876 = vperm.xlu1 %2722, %v3718_v37  }
 0x12f   :  { %1138 = vperm.xlu0 %2719, %v3718_v37   ;;  %v3752_v60 = vpop.permute.xlu0 %605  ;;  %v3754_v61 = vpop.permute.xlu1 %867 }
 0x130   :  { %vm607_vm9 = vcmp.eq.s32.totalorder %v3752_v60, 1  ;;  %vm869_vm10 = vcmp.eq.s32.totalorder %v3754_v61, 1 }
 0x132   :  { %2724 = vset.pattern.permute.xlu1 %v3519_v18 }
 0x133   :  { %2720 = vset.pattern.permute.xlu0 %v3516_v15  ;;  %2046 = vperm.xlu1 %2724, %v3625_v33  }
 0x134   :  { %v3759_v62 = vpop.permute.xlu0 %1915  ;;  %998 = vperm.xlu0 %2720, %v3625_v33   ;;  %v2038_v63 = vpop.permute.xlu1 %2037 }
 0x135   :  { %vm2039_vm2 = vcmp.eq.s32.totalorder %v2038_v63, 1  ;;  %vm1917_vm11 = vcmp.eq.s32.totalorder %v3759_v62, 1 }
 0x137   :  { %2725 = vset.pattern.permute.xlu1 %v3520_v19 }
 0x138   :  { %v2679_v4 = vpop.permute.xlu0 %2678  ;;  %2723 = vset.pattern.permute.xlu0 %v3510_v8  ;;  %1784 = vperm.xlu1 %2725, %v3625_v33  }
 0x139   :  { %v2681_v11 = vunpack.i.h.bf16 %v2679_v4  ;;  %v2680_v20 = vunpack.i.l.bf16 %v2679_v4  ;;  %614 = vperm.xlu0 %2723, %v3718_v37   ;;  %v1776_v21 = vpop.permute.xlu1 %1775 }
 0x13a   :  { %vm1777_vm3 = vcmp.eq.s32.totalorder %v1776_v21, 1 }
 0x13b   :  { %v1258_v22 = vsel %vm1253_vm13, %v3704_v27, %v2681_v11  ;;  %v1520_v25 = vsel %vm1515_vm12, %v3704_v27, %v2680_v20 }
 0x13c   :  { %2727 = vset.pattern.permute.xlu1 %v3511_v9  ;;  %v2733_v33 = vpack.i.bf16 %v1258_v22, %v1520_v25  ;;  %v3805_v56 = vpop.permute.xlu0 %212 }
 0x13d   :  { %2726 = vset.pattern.permute.xlu0 %v3512_v10  ;;  %1662 = vperm.xlu1 %2727, %v3718_v37  }
 0x13e   :  { %v3771_v26 = vpop.permute.xlu1 %1653  ;;  %1924 = vperm.xlu0 %2726, %v3718_v37  }
 0x13f   :  { %vm1655_vm12 = vcmp.eq.s32.totalorder %v3771_v26, 1 }
 0x141   :  { %2758 = vset.pattern.permute.xlu1 %v3513_v12 }
 0x142   :  { %v2674_v28 = vpop.permute.xlu1 %2673  ;;  %2734 = vrot.lane.b32.xlu0 %v2733_v33, %s3509_s25 }
 0x143   :  { %v2676_v29 = vunpack.i.h.bf16 %v2674_v28  ;;  %v2675_v30 = vunpack.i.l.bf16 %v2674_v28  ;;  %2771 = vset.pattern.permute.xlu0 %v3517_v16 }
 0x145   :  { %v210_v31 = vsel %vm205_vm15, %v3704_v27, %v2676_v29  ;;  %v472_v6 = vsel %vm467_vm14, %v3704_v27, %v2675_v30  ;;  %vm214_vm14 = vcmp.eq.s32.totalorder %v3805_v56, 1 }
 0x146   :  { %v2684_v24 = vpop.permute.xlu1 %2683  ;;  %v2728_v32 = vpack.i.bf16 %v210_v31, %v472_v6 }
 0x147   :  { %v2686_v34 = vunpack.i.h.bf16 %v2684_v24  ;;  %v2685_v35 = vunpack.i.l.bf16 %v2684_v24 }
 0x148   :  { %2729 = vrot.lane.b32.xlu1 %v2728_v32, %s3509_s25 }
 0x149   :  { %v734_v36 = vsel %vm729_vm1, %v3704_v27, %v2686_v34  ;;  %v996_v38 = vsel %vm991_vm0, %v3704_v27, %v2685_v35 }
 0x14a   :  { %v2689_v23 = vpop.permute.xlu1 %2688  ;;  %v2738_v40 = vpack.i.bf16 %v734_v36, %v996_v38 }
 0x14b   :  { %v2691_v42 = vunpack.i.h.bf16 %v2689_v23  ;;  %v2690_v43 = vunpack.i.l.bf16 %v2689_v23 }
 0x14c   :  { %2739 = vrot.lane.b32.xlu1 %v2738_v40, %s3509_s25 }
 0x14d   :  { %v1782_v44 = vsel %vm1777_vm3, %v3704_v27, %v2691_v42  ;;  %v2044_v45 = vsel %vm2039_vm2, %v3704_v27, %v2690_v43 }
 0x14e   :  { %v2743_v46 = vpack.i.bf16 %v1782_v44, %v2044_v45 }
 0x150   :  { %2744 = vrot.lane.b32.xlu1 %v2743_v46, %s3509_s25 }
 0x17a   :  { %v2694_v47 = vpop.permute.xlu1 %2693 }
 0x17b   :  { %v2696_v48 = vunpack.i.h.bf16 %v2694_v47  ;;  %v2695_v49 = vunpack.i.l.bf16 %v2694_v47 }
 0x17d   :  { %v64_v50 = vsel %vm59_vm5, %v3704_v27, %v2696_v48  ;;  %v350_v51 = vsel %vm345_vm4, %v3704_v27, %v2695_v49 }
 0x17e   :  { %v2699_v52 = vpop.permute.xlu1 %2698  ;;  %v2748_v53 = vpack.i.bf16 %v64_v50, %v350_v51 }
 0x17f   :  { %v2701_v55 = vunpack.i.h.bf16 %v2699_v52  ;;  %v2700_v54 = vunpack.i.l.bf16 %v2699_v52 }
 0x180   :  { %2749 = vrot.lane.b32.xlu1 %v2748_v53, %s3509_s25 }
 0x181   :  { %v1136_v58 = vsel %vm1131_vm6, %v3704_v27, %v2701_v55  ;;  %v1398_v39 = vsel %vm1393_vm7, %v3704_v27, %v2700_v54 }
 0x182   :  { %v2753_v59 = vpack.i.bf16 %v1136_v58, %v1398_v39 }
 0x184   :  { %2754 = vrot.lane.b32.xlu1 %v2753_v59, %s3509_s25 }
 0x188   :  { %483 = vperm.xlu1 %2758, %v3718_v37  }
 0x18c   :  { %2759 = vset.pattern.permute.xlu1 %v3505_v2 }
 0x18d   :  { %361 = vperm.xlu1 %2759, %v3801_v41  }
 0x18f   :  { %v3807_v57 = vpop.permute.xlu1 %474 }
 0x190   :  { %vm476_vm15 = vcmp.eq.s32.totalorder %v3807_v57, 1 }
 0x191   :  { %2760 = vset.pattern.permute.xlu1 %v3506_v3 }
 0x192   :  { %79 = vperm.xlu1 %2760, %v3801_v41  }
 0x194   :  { %v2708_v63 = vpop.permute.xlu0 %2707  ;;  %v3811_v4 = vpop.permute.xlu1 %352 }
 0x195   :  { %v2710_v11 = vunpack.i.h.bf16 %v2708_v63  ;;  %v2709_v20 = vunpack.i.l.bf16 %v2708_v63  ;;  %v3882_v63 = vld [vmem:[%s4995_s1 + $0x10] sm:$0xff]  ;;  %vm354_vm3 = vcmp.eq.s32.totalorder %v3811_v4, 1 }
 0x196   :  { %2772 = vset.pattern.permute.xlu1 %v3514_v13 }
 0x197   :  { %1269 = vperm.xlu1 %2772, %v3718_v37   ;;  %v612_v21 = vsel %vm607_vm9, %v3704_v27, %v2710_v11  ;;  %v874_v22 = vsel %vm869_vm10, %v3704_v27, %v2709_v20  ;;  %vm87_vm9 = vcmp.eq.s32.totalorder %v3562_v0, 6 }
 0x198   :  { %v2713_v25 = vpop.permute.xlu0 %2712  ;;  %v2761_v33 = vpack.i.bf16 %v612_v21, %v874_v22 }
 0x199   :  { %v2715_v28 = vunpack.i.h.bf16 %v2713_v25  ;;  %v2714_v29 = vunpack.i.l.bf16 %v2713_v25  ;;  %v3819_v30 = vpop.permute.xlu1 %68 }
 0x19a   :  { %2762 = vrot.lane.b32.xlu0 %v2761_v33, %s3509_s25  ;;  %vm70_vm4 = vcmp.eq.s32.totalorder %v3819_v30, 1 }
 0x19b   :  { %2773 = vset.pattern.permute.xlu1 %v3504_v1  ;;  %v1660_v60 = vsel %vm1655_vm12, %v3704_v27, %v2715_v28  ;;  %v1922_v61 = vsel %vm1917_vm11, %v3704_v27, %v2714_v29 }
 0x19c   :  { %1409 = vperm.xlu1 %2773, %v3801_v41   ;;  %v2766_v31 = vpack.i.bf16 %v1660_v60, %v1922_v61 }
 0x19e   :  { %2767 = vrot.lane.b32.xlu0 %v2766_v31, %s3509_s25  ;;  %v1261_v6 = vpop.permute.xlu1 %1260 }
 0x19f   :  { %vm1262_vm0 = vcmp.eq.s32.totalorder %v1261_v6, 1 }
 0x1a0   :  { %2776 = vset.pattern.permute.xlu1 %v3518_v17 }
 0x1a1   :  { %745 = vperm.xlu1 %2776, %v3718_v37  }
 0x1a2   :  { %1531 = vperm.xlu0 %2771, %v3718_v37  }
 0x1a3   :  { %v3832_v62 = vpop.permute.xlu1 %1400 }
 0x1a4   :  { %vm1402_vm5 = vcmp.eq.s32.totalorder %v3832_v62, 1  ;;  %v3901_v62 = vsel %vm87_vm9, 1, %v3506_v3 }
 0x1a5   :  { %2777 = vset.pattern.permute.xlu1 %v3508_v7 }
 0x1a6   :  { %2774 = vset.pattern.permute.xlu0 %v3507_v5  ;;  %885 = vperm.xlu1 %2777, %v3801_v41  }
 0x1a7   :  { %1147 = vperm.xlu0 %2774, %v3801_v41  }
 0x1a8   :  { %v737_v26 = vpop.permute.xlu1 %736 }
 0x1a9   :  { %v1523_v24 = vpop.permute.xlu0 %1522  ;;  %vm738_vm1 = vcmp.eq.s32.totalorder %v737_v26, 1 }
 0x1aa   :  { %2779 = vset.pattern.permute.xlu1 %v3519_v18  ;;  %vm1524_vm13 = vcmp.eq.s32.totalorder %v1523_v24, 1 }
 0x1ab   :  { %2775 = vset.pattern.permute.xlu0 %v3516_v15  ;;  %2055 = vperm.xlu1 %2779, %v3718_v37  }
 0x1ac   :  { %1007 = vperm.xlu0 %2775, %v3718_v37  }
 0x1ad   :  { %v3842_v32 = vpop.permute.xlu1 %876 }
 0x1ae   :  { %v3844_v34 = vpop.permute.xlu0 %1138  ;;  %vm878_vm10 = vcmp.eq.s32.totalorder %v3842_v32, 1 }
 0x1af   :  { %2780 = vset.pattern.permute.xlu1 %v3520_v19  ;;  %vm1140_vm6 = vcmp.eq.s32.totalorder %v3844_v34, 1 }
 0x1b0   :  { %2778 = vset.pattern.permute.xlu0 %v3510_v8  ;;  %1793 = vperm.xlu1 %2780, %v3718_v37  }
 0x1b1   :  { %623 = vperm.xlu0 %2778, %v3801_v41  }
 0x1b2   :  { %v3850_v35 = vpop.permute.xlu1 %2046 }
 0x1b3   :  { %v999_v36 = vpop.permute.xlu0 %998  ;;  %vm2048_vm7 = vcmp.eq.s32.totalorder %v3850_v35, 1 }
 0x1b4   :  { %2783 = vset.pattern.permute.xlu1 %v3511_v9  ;;  %vm1000_vm2 = vcmp.eq.s32.totalorder %v999_v36, 1 }
 0x1b5   :  { %2781 = vset.pattern.permute.xlu0 %v3512_v10  ;;  %1671 = vperm.xlu1 %2783, %v3801_v41  }
 0x1b6   :  { %1933 = vperm.xlu0 %2781, %v3801_v41  }
 0x1b7   :  { %v1785_v38 = vpop.permute.xlu1 %1784 }
 0x1b8   :  { %v3856_v23 = vpop.permute.xlu0 %614  ;;  %vm1786_vm8 = vcmp.eq.s32.totalorder %v1785_v38, 1 }
 0x1b9   :  { %2814 = vset.pattern.permute.xlu1 %v3513_v12  ;;  %vm616_vm11 = vcmp.eq.s32.totalorder %v3856_v23, 1 }
 0x1ba   :  { %2782 = vset.pattern.permute.xlu0 %v3515_v14 }
 0x1bb   :  { %221 = vperm.xlu0 %2782, %v3718_v37  }
 0x1bc   :  { %v3861_v40 = vpop.permute.xlu1 %1662 }
 0x1bd   :  { %v3863_v42 = vpop.permute.xlu0 %1924  ;;  %vm1664_vm12 = vcmp.eq.s32.totalorder %v3861_v40, 1 }
 0x1c0   :  { %v2730_v43 = vpop.permute.xlu1 %2729 }
 0x1c1   :  { %v2732_v44 = vunpack.i.h.bf16 %v2730_v43  ;;  %v2731_v45 = vunpack.i.l.bf16 %v2730_v43  ;;  %v2735_v46 = vpop.permute.xlu0 %2734 }
 0x1c2   :  { %v2737_v47 = vunpack.i.h.bf16 %v2735_v46  ;;  %v2736_v48 = vunpack.i.l.bf16 %v2735_v46 }
 0x1c3   :  { %v219_v49 = vsel %vm214_vm14, %v3704_v27, %v2732_v44  ;;  %v481_v37 = vsel %vm476_vm15, %v3704_v27, %v2731_v45 }
 0x1c4   :  { %v2740_v50 = vpop.permute.xlu1 %2739  ;;  %v2784_v51 = vpack.i.bf16 %v219_v49, %v481_v37  ;;  %v1267_v52 = vsel %vm1262_vm0, %v3704_v27, %v2737_v47  ;;  %v1529_v53 = vsel %vm1524_vm13, %v3704_v27, %v2736_v48  ;;  %vm1926_vm13 = vcmp.eq.s32.totalorder %v3863_v42, 1 }
 0x1c5   :  { %v2742_v55 = vunpack.i.h.bf16 %v2740_v50  ;;  %v2741_v54 = vunpack.i.l.bf16 %v2740_v50  ;;  %v2789_v58 = vpack.i.bf16 %v1267_v52, %v1529_v53 }
 0x1c6   :  { %2785 = vrot.lane.b32.xlu1 %v2784_v51, %s3509_s25 }
 0x1c7   :  { %v743_v39 = vsel %vm738_vm1, %v3704_v27, %v2742_v55  ;;  %v1005_v59 = vsel %vm1000_vm2, %v3704_v27, %v2741_v54  ;;  %2790 = vrot.lane.b32.xlu0 %v2789_v58, %s3509_s25 }
 0x1c8   :  { %v2794_v56 = vpack.i.bf16 %v743_v39, %v1005_v59  ;;  %v2745_v57 = vpop.permute.xlu1 %2744 }
 0x1c9   :  { %v2747_v29 = vunpack.i.h.bf16 %v2745_v57  ;;  %v2746_v60 = vunpack.i.l.bf16 %v2745_v57 }
 0x1ca   :  { %2795 = vrot.lane.b32.xlu1 %v2794_v56, %s3509_s25 }
 0x1cb   :  { %230 = vperm.xlu0 %2782, %v3801_v41   ;;  %v1791_v26 = vsel %vm1786_vm8, %v3704_v27, %v2747_v29  ;;  %v2053_v24 = vsel %vm2048_vm7, %v3704_v27, %v2746_v60 }
 0x1cc   :  { %v2809_v36 = vpack.i.bf16 %v1791_v26, %v2053_v24 }
 0x1cf   :  { %2827 = vset.pattern.permute.xlu0 %v3517_v16 }
 0x1f2   :  { %v2750_v11 = vpop.permute.xlu1 %2749 }
 0x1f3   :  { %v2752_v20 = vunpack.i.h.bf16 %v2750_v11  ;;  %v2751_v21 = vunpack.i.l.bf16 %v2750_v11 }
 0x1f5   :  { %v75_v22 = vsel %vm70_vm4, %v3882_v63, %v2752_v20  ;;  %v359_v25 = vsel %vm354_vm3, %v3882_v63, %v2751_v21 }
 0x1f6   :  { %v2755_v33 = vpop.permute.xlu1 %2754  ;;  %v2799_v28 = vpack.i.bf16 %v75_v22, %v359_v25 }
 0x1f7   :  { %v2757_v61 = vunpack.i.h.bf16 %v2755_v33  ;;  %v2756_v31 = vunpack.i.l.bf16 %v2755_v33 }
 0x1f8   :  { %2800 = vrot.lane.b32.xlu1 %v2799_v28, %s3509_s25 }
 0x1f9   :  { %v1145_v4 = vsel %vm1140_vm6, %v3882_v63, %v2757_v61  ;;  %v1407_v30 = vsel %vm1402_vm5, %v3882_v63, %v2756_v31 }
 0x1fa   :  { %v2804_v6 = vpack.i.bf16 %v1145_v4, %v1407_v30 }
 0x1fc   :  { %2805 = vrot.lane.b32.xlu1 %v2804_v6, %s3509_s25 }
 0x200   :  { %2810 = vrot.lane.b32.xlu1 %v2809_v36, %s3509_s25 }
 0x204   :  { %492 = vperm.xlu1 %2814, %v3801_v41  }
 0x207   :  { %v3903_v34 = vpop.permute.xlu1 %483 }
 0x208   :  { %2815 = vset.pattern.permute.xlu1 %v3505_v2  ;;  %vm485_vm14 = vcmp.eq.s32.totalorder %v3903_v34, 1 }
 0x209   :  { %370 = vperm.xlu1 %2815, %v3901_v62  }
 0x20c   :  { %v2763_v35 = vpop.permute.xlu0 %2762  ;;  %v3907_v27 = vpop.permute.xlu1 %361 }
 0x20d   :  { %v2765_v38 = vunpack.i.h.bf16 %v2763_v35  ;;  %v2764_v43 = vunpack.i.l.bf16 %v2763_v35  ;;  %2816 = vset.pattern.permute.xlu1 %v3506_v3  ;;  %vm363_vm4 = vcmp.eq.s32.totalorder %v3907_v27, 1 }
 0x20e   :  { %90 = vperm.xlu1 %2816, %v3901_v62  }
 0x20f   :  { %v621_v0 = vsel %vm616_vm11, %v3882_v63, %v2765_v38  ;;  %v883_v44 = vsel %vm878_vm10, %v3882_v63, %v2764_v43 }
 0x210   :  { %v2768_v45 = vpop.permute.xlu0 %2767  ;;  %v2817_v46 = vpack.i.bf16 %v621_v0, %v883_v44 }
 0x211   :  { %v2770_v47 = vunpack.i.h.bf16 %v2768_v45  ;;  %v2769_v48 = vunpack.i.l.bf16 %v2768_v45  ;;  %v3915_v49 = vpop.permute.xlu1 %79 }
 0x212   :  { %2818 = vrot.lane.b32.xlu0 %v2817_v46, %s3509_s25  ;;  %2828 = vset.pattern.permute.xlu1 %v3514_v13  ;;  %vm81_vm5 = vcmp.eq.s32.totalorder %v3915_v49, 1 }
 0x213   :  { %1278 = vperm.xlu1 %2828, %v3801_v41   ;;  %v1669_v32 = vsel %vm1664_vm12, %v3882_v63, %v2770_v47  ;;  %v1931_v23 = vsel %vm1926_vm13, %v3882_v63, %v2769_v48 }
 0x214   :  { %v2822_v37 = vpack.i.bf16 %v1669_v32, %v1931_v23 }
 0x216   :  { %2823 = vrot.lane.b32.xlu0 %v2822_v37, %s3509_s25  ;;  %v1270_v50 = vpop.permute.xlu1 %1269 }
 0x217   :  { %2829 = vset.pattern.permute.xlu1 %v3504_v1  ;;  %vm1271_vm2 = vcmp.eq.s32.totalorder %v1270_v50, 1 }
 0x218   :  { %1418 = vperm.xlu1 %2829, %v3901_v62  }
 0x21a   :  { %1540 = vperm.xlu0 %2827, %v3801_v41  }
 0x21b   :  { %v3928_v40 = vpop.permute.xlu1 %1409 }
 0x21c   :  { %2832 = vset.pattern.permute.xlu1 %v3518_v17  ;;  %vm1411_vm6 = vcmp.eq.s32.totalorder %v3928_v40, 1 }
 0x21d   :  { %754 = vperm.xlu1 %2832, %v3801_v41  }
 0x21e   :  { %2830 = vset.pattern.permute.xlu0 %v3507_v5 }
 0x21f   :  { %1156 = vperm.xlu0 %2830, %v3901_v62  }
 0x220   :  { %v746_v42 = vpop.permute.xlu1 %745 }
 0x221   :  { %2833 = vset.pattern.permute.xlu1 %v3508_v7  ;;  %v1532_v51 = vpop.permute.xlu0 %1531  ;;  %vm747_vm0 = vcmp.eq.s32.totalorder %v746_v42, 1 }
 0x222   :  { %894 = vperm.xlu1 %2833, %v3901_v62   ;;  %vm1533_vm3 = vcmp.eq.s32.totalorder %v1532_v51, 1  ;;  %v3994_v51 = vld [vmem:[%s4994_s0] sm:$0xff] }
 0x223   :  { %2831 = vset.pattern.permute.xlu0 %v3516_v15  ;;  %vm98_vm10 = vcmp.eq.s32.totalorder %v3994_v51, 7 }
 0x224   :  { %1016 = vperm.xlu0 %2831, %v3801_v41  }
 0x225   :  { %v3938_v52 = vpop.permute.xlu1 %885 }
 0x226   :  { %2835 = vset.pattern.permute.xlu1 %v3519_v18  ;;  %v3941_v53 = vpop.permute.xlu0 %1147  ;;  %vm887_vm11 = vcmp.eq.s32.totalorder %v3938_v52, 1 }
 0x227   :  { %2064 = vperm.xlu1 %2835, %v3801_v41   ;;  %vm1149_vm7 = vcmp.eq.s32.totalorder %v3941_v53, 1  ;;  %v3999_v53 = vsel %vm98_vm10, 1, %v3506_v3 }
 0x228   :  { %2834 = vset.pattern.permute.xlu0 %v3510_v8 }
 0x229   :  { %632 = vperm.xlu0 %2834, %v3901_v62  }
 0x22a   :  { %v3946_v55 = vpop.permute.xlu1 %2055 }
 0x22b   :  { %2836 = vset.pattern.permute.xlu1 %v3520_v19  ;;  %v1008_v54 = vpop.permute.xlu0 %1007  ;;  %vm2057_vm8 = vcmp.eq.s32.totalorder %v3946_v55, 1 }
 0x22c   :  { %1802 = vperm.xlu1 %2836, %v3801_v41   ;;  %vm1009_vm1 = vcmp.eq.s32.totalorder %v1008_v54, 1 }
 0x22d   :  { %2837 = vset.pattern.permute.xlu0 %v3512_v10 }
 0x22e   :  { %1942 = vperm.xlu0 %2837, %v3901_v62  }
 0x22f   :  { %v3952_v58 = vpop.permute.xlu1 %1793 }
 0x230   :  { %2838 = vset.pattern.permute.xlu1 %v3511_v9  ;;  %v3955_v39 = vpop.permute.xlu0 %623  ;;  %vm1795_vm9 = vcmp.eq.s32.totalorder %v3952_v58, 1 }
 0x231   :  { %1680 = vperm.xlu1 %2838, %v3901_v62   ;;  %vm625_vm12 = vcmp.eq.s32.totalorder %v3955_v39, 1 }
 0x232   :  { %2870 = vset.pattern.permute.xlu0 %v3515_v14 }
 0x234   :  { %v3959_v59 = vpop.permute.xlu1 %1671 }
 0x235   :  { %v3961_v56 = vpop.permute.xlu0 %1933  ;;  %2869 = vset.pattern.permute.xlu1 %v3513_v12  ;;  %vm1673_vm13 = vcmp.eq.s32.totalorder %v3959_v59, 1 }
 0x238   :  { %v2786_v41 = vpop.permute.xlu1 %2785 }
 0x239   :  { %v2788_v57 = vunpack.i.h.bf16 %v2786_v41  ;;  %v2787_v11 = vunpack.i.l.bf16 %v2786_v41 }
 0x23a   :  { %v222_v20 = vpop.permute.xlu0 %221 }
 0x23b   :  { %vm223_vm15 = vcmp.eq.s32.totalorder %v222_v20, 1  ;;  %v490_v21 = vsel %vm485_vm14, %v3882_v63, %v2787_v11  ;;  %vm1935_vm14 = vcmp.eq.s32.totalorder %v3961_v56, 1 }
 0x23c   :  { %v228_v22 = vsel %vm223_vm15, %v3882_v63, %v2788_v57  ;;  %v2796_v25 = vpop.permute.xlu1 %2795 }
 0x23d   :  { %v2839_v33 = vpack.i.bf16 %v228_v22, %v490_v21  ;;  %v2798_v28 = vunpack.i.h.bf16 %v2796_v25  ;;  %v2797_v29 = vunpack.i.l.bf16 %v2796_v25 }
 0x23e   :  { %v2791_v60 = vpop.permute.xlu0 %2790 }
 0x23f   :  { %v752_v61 = vsel %vm747_vm0, %v3882_v63, %v2798_v28  ;;  %v1014_v31 = vsel %vm1009_vm1, %v3882_v63, %v2797_v29  ;;  %v2793_v4 = vunpack.i.h.bf16 %v2791_v60  ;;  %v2792_v30 = vunpack.i.l.bf16 %v2791_v60  ;;  %2840 = vrot.lane.b32.xlu1 %v2839_v33, %s3509_s25 }
 0x240   :  { %v2849_v6 = vpack.i.bf16 %v752_v61, %v1014_v31 }
 0x241   :  { %v1276_v26 = vsel %vm1271_vm2, %v3882_v63, %v2793_v4  ;;  %v1538_v24 = vsel %vm1533_vm3, %v3882_v63, %v2792_v30 }
 0x242   :  { %v2844_v36 = vpack.i.bf16 %v1276_v26, %v1538_v24 }
 0x243   :  { %2850 = vrot.lane.b32.xlu1 %v2849_v6, %s3509_s25 }
 0x244   :  { %2845 = vrot.lane.b32.xlu0 %v2844_v36, %s3509_s25 }
 0x248   :  { %239 = vperm.xlu0 %2870, %v3901_v62  }
 0x24a   :  { %v4001_v55 = vpop.permute.xlu0 %230 }
 0x24b   :  { %vm232_vm15 = vcmp.eq.s32.totalorder %v4001_v55, 1 }
 0x24c   :  { %2883 = vset.pattern.permute.xlu0 %v3517_v16 }
 0x26a   :  { %v2801_v34 = vpop.permute.xlu1 %2800 }
 0x26b   :  { %v2803_v35 = vunpack.i.h.bf16 %v2801_v34  ;;  %v2802_v38 = vunpack.i.l.bf16 %v2801_v34 }
 0x26d   :  { %v86_v43 = vsel %vm81_vm5, %v3882_v63, %v2803_v35  ;;  %v368_v0 = vsel %vm363_vm4, %v3882_v63, %v2802_v38 }
 0x26e   :  { %v2806_v44 = vpop.permute.xlu1 %2805  ;;  %v2854_v45 = vpack.i.bf16 %v86_v43, %v368_v0 }
 0x26f   :  { %v2808_v46 = vunpack.i.h.bf16 %v2806_v44  ;;  %v2807_v47 = vunpack.i.l.bf16 %v2806_v44 }
 0x270   :  { %2855 = vrot.lane.b32.xlu1 %v2854_v45, %s3509_s25 }
 0x271   :  { %v1154_v48 = vsel %vm1149_vm7, %v3882_v63, %v2808_v46  ;;  %v1416_v27 = vsel %vm1411_vm6, %v3882_v63, %v2807_v47 }
 0x272   :  { %v2811_v32 = vpop.permute.xlu1 %2810  ;;  %v2859_v49 = vpack.i.bf16 %v1154_v48, %v1416_v27 }
 0x273   :  { %v2813_v23 = vunpack.i.h.bf16 %v2811_v32  ;;  %v2812_v37 = vunpack.i.l.bf16 %v2811_v32 }
 0x274   :  { %2860 = vrot.lane.b32.xlu1 %v2859_v49, %s3509_s25 }
 0x275   :  { %v1800_v50 = vsel %vm1795_vm9, %v3882_v63, %v2813_v23  ;;  %v2062_v40 = vsel %vm2057_vm8, %v3882_v63, %v2812_v37 }
 0x276   :  { %v2864_v42 = vpack.i.bf16 %v1800_v50, %v2062_v40 }
 0x278   :  { %2865 = vrot.lane.b32.xlu1 %v2864_v42, %s3509_s25 }
 0x27c   :  { %501 = vperm.xlu1 %2869, %v3901_v62  }
 0x280   :  { %2871 = vset.pattern.permute.xlu1 %v3505_v2 }
 0x281   :  { %379 = vperm.xlu1 %2871, %v3999_v53  }
 0x283   :  { %v4005_v54 = vpop.permute.xlu1 %492 }
 0x284   :  { %v2819_v58 = vpop.permute.xlu0 %2818  ;;  %vm494_vm0 = vcmp.eq.s32.totalorder %v4005_v54, 1  ;;  %v4078_v54 = vld [vmem:[%s4995_s1 + $0x18] sm:$0xff] }
 0x285   :  { %v2821_v41 = vunpack.i.h.bf16 %v2819_v58  ;;  %v2820_v57 = vunpack.i.l.bf16 %v2819_v58  ;;  %2872 = vset.pattern.permute.xlu1 %v3506_v3 }
 0x286   :  { %101 = vperm.xlu1 %2872, %v3999_v53  }
 0x287   :  { %v630_v11 = vsel %vm625_vm12, %v3882_v63, %v2821_v41  ;;  %v892_v20 = vsel %vm887_vm11, %v3882_v63, %v2820_v57  ;;  %vm109_vm11 = vcmp.eq.s32.totalorder %v3994_v51, 8 }
 0x288   :  { %v2824_v21 = vpop.permute.xlu0 %2823  ;;  %v2873_v22 = vpack.i.bf16 %v630_v11, %v892_v20  ;;  %v4013_v25 = vpop.permute.xlu1 %370 }
 0x289   :  { %v2826_v33 = vunpack.i.h.bf16 %v2824_v21  ;;  %v2825_v28 = vunpack.i.l.bf16 %v2824_v21  ;;  %vm372_vm5 = vcmp.eq.s32.totalorder %v4013_v25, 1 }
 0x28a   :  { %2874 = vrot.lane.b32.xlu0 %v2873_v22, %s3509_s25  ;;  %2884 = vset.pattern.permute.xlu1 %v3514_v13 }
 0x28b   :  { %1287 = vperm.xlu1 %2884, %v3901_v62   ;;  %v1678_v52 = vsel %vm1673_vm13, %v3882_v63, %v2826_v33  ;;  %v1940_v39 = vsel %vm1935_vm14, %v3882_v63, %v2825_v28 }
 0x28c   :  { %v2878_v29 = vpack.i.bf16 %v1678_v52, %v1940_v39 }
 0x28d   :  { %v4022_v60 = vpop.permute.xlu1 %90 }
 0x28e   :  { %2879 = vrot.lane.b32.xlu0 %v2878_v29, %s3509_s25  ;;  %vm92_vm6 = vcmp.eq.s32.totalorder %v4022_v60, 1 }
 0x28f   :  { %2885 = vset.pattern.permute.xlu1 %v3504_v1 }
 0x290   :  { %1427 = vperm.xlu1 %2885, %v3999_v53  }
 0x292   :  { %1549 = vperm.xlu0 %2883, %v3901_v62   ;;  %v1279_v59 = vpop.permute.xlu1 %1278 }
 0x293   :  { %vm1280_vm2 = vcmp.eq.s32.totalorder %v1279_v59, 1 }
 0x294   :  { %2888 = vset.pattern.permute.xlu1 %v3518_v17 }
 0x295   :  { %763 = vperm.xlu1 %2888, %v3901_v62  }
 0x296   :  { %2886 = vset.pattern.permute.xlu0 %v3507_v5 }
 0x297   :  { %1165 = vperm.xlu0 %2886, %v3999_v53   ;;  %v4032_v56 = vpop.permute.xlu1 %1418 }
 0x298   :  { %vm1420_vm7 = vcmp.eq.s32.totalorder %v4032_v56, 1 }
 0x299   :  { %2889 = vset.pattern.permute.xlu1 %v3508_v7  ;;  %v1541_v61 = vpop.permute.xlu0 %1540 }
 0x29a   :  { %903 = vperm.xlu1 %2889, %v3999_v53   ;;  %vm1542_vm1 = vcmp.eq.s32.totalorder %v1541_v61, 1 }
 0x29b   :  { %2887 = vset.pattern.permute.xlu0 %v3516_v15 }
 0x29c   :  { %v755_v31 = vpop.permute.xlu1 %754  ;;  %1025 = vperm.xlu0 %2887, %v3901_v62  }
 0x29d   :  { %vm756_vm4 = vcmp.eq.s32.totalorder %v755_v31, 1 }
 0x29e   :  { %2891 = vset.pattern.permute.xlu1 %v3519_v18  ;;  %v4039_v4 = vpop.permute.xlu0 %1156 }
 0x29f   :  { %2073 = vperm.xlu1 %2891, %v3901_v62   ;;  %vm1158_vm8 = vcmp.eq.s32.totalorder %v4039_v4, 1 }
 0x2a0   :  { %2890 = vset.pattern.permute.xlu0 %v3510_v8 }
 0x2a1   :  { %v4043_v30 = vpop.permute.xlu1 %894  ;;  %641 = vperm.xlu0 %2890, %v3999_v53  }
 0x2a2   :  { %vm896_vm12 = vcmp.eq.s32.totalorder %v4043_v30, 1 }
 0x2a3   :  { %2892 = vset.pattern.permute.xlu1 %v3520_v19  ;;  %v1017_v6 = vpop.permute.xlu0 %1016 }
 0x2a4   :  { %1811 = vperm.xlu1 %2892, %v3901_v62   ;;  %vm1018_vm3 = vcmp.eq.s32.totalorder %v1017_v6, 1  ;;  %v4099_v6 = vsel %vm109_vm11, 1, %v3506_v3 }
 0x2a5   :  { %2893 = vset.pattern.permute.xlu0 %v3512_v10 }
 0x2a6   :  { %v4049_v26 = vpop.permute.xlu1 %2064  ;;  %1951 = vperm.xlu0 %2893, %v3999_v53  }
 0x2a7   :  { %vm2066_vm9 = vcmp.eq.s32.totalorder %v4049_v26, 1 }
 0x2a8   :  { %2894 = vset.pattern.permute.xlu1 %v3511_v9  ;;  %v4054_v24 = vpop.permute.xlu0 %632 }
 0x2a9   :  { %1689 = vperm.xlu1 %2894, %v3999_v53   ;;  %vm634_vm13 = vcmp.eq.s32.totalorder %v4054_v24, 1 }
 0x2aa   :  { %2926 = vset.pattern.permute.xlu0 %v3515_v14 }
 0x2ab   :  { %v1803_v36 = vpop.permute.xlu1 %1802 }
 0x2ac   :  { %vm1804_vm10 = vcmp.eq.s32.totalorder %v1803_v36, 1 }
 0x2ad   :  { %2925 = vset.pattern.permute.xlu1 %v3513_v12  ;;  %v4060_v62 = vpop.permute.xlu0 %1942 }
 0x2b0   :  { %v4058_v34 = vpop.permute.xlu1 %1680 }
 0x2b1   :  { %vm1682_vm14 = vcmp.eq.s32.totalorder %v4058_v34, 1 }
 0x2b4   :  { %v2841_v35 = vpop.permute.xlu1 %2840 }
 0x2b5   :  { %v2843_v38 = vunpack.i.h.bf16 %v2841_v35  ;;  %v2842_v43 = vunpack.i.l.bf16 %v2841_v35 }
 0x2b6   :  { %v2846_v0 = vpop.permute.xlu0 %2845 }
 0x2b7   :  { %v237_v44 = vsel %vm232_vm15, %v3882_v63, %v2843_v38  ;;  %v499_v45 = vsel %vm494_vm0, %v3882_v63, %v2842_v43  ;;  %v2848_v46 = vunpack.i.h.bf16 %v2846_v0  ;;  %v2847_v47 = vunpack.i.l.bf16 %v2846_v0 }
 0x2b8   :  { %v2851_v48 = vpop.permute.xlu1 %2850  ;;  %v2895_v27 = vpack.i.bf16 %v237_v44, %v499_v45  ;;  %vm1944_vm15 = vcmp.eq.s32.totalorder %v4060_v62, 1 }
 0x2b9   :  { %v1285_v32 = vsel %vm1280_vm2, %v3882_v63, %v2848_v46  ;;  %v1547_v49 = vsel %vm1542_vm1, %v3882_v63, %v2847_v47  ;;  %v2853_v23 = vunpack.i.h.bf16 %v2851_v48  ;;  %v2852_v37 = vunpack.i.l.bf16 %v2851_v48 }
 0x2ba   :  { %2896 = vrot.lane.b32.xlu1 %v2895_v27, %s3509_s25  ;;  %v2900_v50 = vpack.i.bf16 %v1285_v32, %v1547_v49 }
 0x2bb   :  { %v761_v40 = vsel %vm756_vm4, %v3882_v63, %v2853_v23  ;;  %v1023_v42 = vsel %vm1018_vm3, %v3882_v63, %v2852_v37 }
 0x2bc   :  { %2901 = vrot.lane.b32.xlu0 %v2900_v50, %s3509_s25  ;;  %v2905_v55 = vpack.i.bf16 %v761_v40, %v1023_v42 }
 0x2be   :  { %2906 = vrot.lane.b32.xlu1 %v2905_v55, %s3509_s25 }
 0x2c0   :  { %248 = vperm.xlu0 %2926, %v3999_v53  }
 0x2c4   :  { %2939 = vset.pattern.permute.xlu0 %v3517_v16 }
 0x2c7   :  { %v4096_v4 = vpop.permute.xlu0 %239 }
 0x2c8   :  { %vm241_vm0 = vcmp.eq.s32.totalorder %v4096_v4, 1 }
 0x2e2   :  { %v2856_v58 = vpop.permute.xlu1 %2855 }
 0x2e3   :  { %v2858_v41 = vunpack.i.h.bf16 %v2856_v58  ;;  %v2857_v57 = vunpack.i.l.bf16 %v2856_v58 }
 0x2e5   :  { %v97_v11 = vsel %vm92_vm6, %v4078_v54, %v2858_v41  ;;  %v377_v20 = vsel %vm372_vm5, %v4078_v54, %v2857_v57 }
 0x2e6   :  { %v2861_v21 = vpop.permute.xlu1 %2860  ;;  %v2910_v22 = vpack.i.bf16 %v97_v11, %v377_v20 }
 0x2e7   :  { %v2863_v33 = vunpack.i.h.bf16 %v2861_v21  ;;  %v2862_v28 = vunpack.i.l.bf16 %v2861_v21 }
 0x2e8   :  { %2911 = vrot.lane.b32.xlu1 %v2910_v22, %s3509_s25 }
 0x2e9   :  { %v1163_v52 = vsel %vm1158_vm8, %v4078_v54, %v2863_v33  ;;  %v1425_v25 = vsel %vm1420_vm7, %v4078_v54, %v2862_v28 }
 0x2ea   :  { %v2866_v39 = vpop.permute.xlu1 %2865  ;;  %v2915_v29 = vpack.i.bf16 %v1163_v52, %v1425_v25 }
 0x2eb   :  { %v2868_v60 = vunpack.i.h.bf16 %v2866_v39  ;;  %v2867_v59 = vunpack.i.l.bf16 %v2866_v39 }
 0x2ec   :  { %2916 = vrot.lane.b32.xlu1 %v2915_v29, %s3509_s25 }
 0x2ed   :  { %v1809_v61 = vsel %vm1804_vm10, %v3882_v63, %v2868_v60  ;;  %v2071_v56 = vsel %vm2066_vm9, %v3882_v63, %v2867_v59 }
 0x2ee   :  { %v2920_v31 = vpack.i.bf16 %v1809_v61, %v2071_v56 }
 0x2f0   :  { %2921 = vrot.lane.b32.xlu1 %v2920_v31, %s3509_s25 }
 0x2f4   :  { %510 = vperm.xlu1 %2925, %v3999_v53  }
 0x2f8   :  { %2927 = vset.pattern.permute.xlu1 %v3505_v2 }
 0x2f9   :  { %388 = vperm.xlu1 %2927, %v4099_v6  }
 0x2fb   :  { %v4103_v26 = vpop.permute.xlu1 %501 }
 0x2fc   :  { %v2875_v36 = vpop.permute.xlu0 %2874  ;;  %vm503_vm1 = vcmp.eq.s32.totalorder %v4103_v26, 1 }
 0x2fd   :  { %v2877_v63 = vunpack.i.h.bf16 %v2875_v36  ;;  %v2876_v35 = vunpack.i.l.bf16 %v2875_v36  ;;  %2928 = vset.pattern.permute.xlu1 %v3506_v3 }
 0x2fe   :  { %112 = vperm.xlu1 %2928, %v4099_v6  }
 0x2ff   :  { %v639_v38 = vsel %vm634_vm13, %v4078_v54, %v2877_v63  ;;  %v901_v43 = vsel %vm896_vm12, %v4078_v54, %v2876_v35  ;;  %vm120_vm12 = vcmp.eq.s32.totalorder %v3994_v51, 9 }
 0x300   :  { %v2880_v0 = vpop.permute.xlu0 %2879  ;;  %v2929_v44 = vpack.i.bf16 %v639_v38, %v901_v43  ;;  %v4111_v45 = vpop.permute.xlu1 %379 }
 0x301   :  { %v2882_v46 = vunpack.i.h.bf16 %v2880_v0  ;;  %v2881_v47 = vunpack.i.l.bf16 %v2880_v0  ;;  %vm381_vm6 = vcmp.eq.s32.totalorder %v4111_v45, 1 }
 0x302   :  { %2930 = vrot.lane.b32.xlu0 %v2929_v44, %s3509_s25  ;;  %2940 = vset.pattern.permute.xlu1 %v3514_v13 }
 0x303   :  { %v1687_v30 = vsel %vm1682_vm14, %v4078_v54, %v2882_v46  ;;  %v1949_v24 = vsel %vm1944_vm15, %v4078_v54, %v2881_v47  ;;  %1296 = vperm.xlu1 %2940, %v3999_v53  }
 0x304   :  { %v2934_v48 = vpack.i.bf16 %v1687_v30, %v1949_v24 }
 0x305   :  { %v4120_v27 = vpop.permute.xlu1 %101 }
 0x306   :  { %2935 = vrot.lane.b32.xlu0 %v2934_v48, %s3509_s25  ;;  %vm103_vm7 = vcmp.eq.s32.totalorder %v4120_v27, 1 }
 0x307   :  { %2941 = vset.pattern.permute.xlu1 %v3504_v1 }
 0x308   :  { %1436 = vperm.xlu1 %2941, %v4099_v6  }
 0x30a   :  { %1558 = vperm.xlu0 %2939, %v3999_v53   ;;  %v1288_v34 = vpop.permute.xlu1 %1287 }
 0x30b   :  { %vm1289_vm3 = vcmp.eq.s32.totalorder %v1288_v34, 1 }
 0x30c   :  { %2944 = vset.pattern.permute.xlu1 %v3518_v17 }
 0x30d   :  { %772 = vperm.xlu1 %2944, %v3999_v53  }
 0x30e   :  { %2942 = vset.pattern.permute.xlu0 %v3507_v5 }
 0x30f   :  { %1174 = vperm.xlu0 %2942, %v4099_v6   ;;  %v4130_v62 = vpop.permute.xlu1 %1427 }
 0x310   :  { %vm1429_vm8 = vcmp.eq.s32.totalorder %v4130_v62, 1 }
 0x311   :  { %2945 = vset.pattern.permute.xlu1 %v3508_v7  ;;  %v1550_v32 = vpop.permute.xlu0 %1549 }
 0x312   :  { %912 = vperm.xlu1 %2945, %v4099_v6   ;;  %vm1551_vm2 = vcmp.eq.s32.totalorder %v1550_v32, 1 }
 0x313   :  { %2943 = vset.pattern.permute.xlu0 %v3516_v15 }
 0x314   :  { %v764_v49 = vpop.permute.xlu1 %763  ;;  %1034 = vperm.xlu0 %2943, %v3999_v53  }
 0x315   :  { %vm765_vm5 = vcmp.eq.s32.totalorder %v764_v49, 1 }
 0x316   :  { %2947 = vset.pattern.permute.xlu1 %v3519_v18  ;;  %v1166_v23 = vpop.permute.xlu0 %1165 }
 0x317   :  { %2082 = vperm.xlu1 %2947, %v3999_v53   ;;  %vm1167_vm9 = vcmp.eq.s32.totalorder %v1166_v23, 1  ;;  %v4187_v23 = vsel %vm120_vm12, 1, %v3506_v3 }
 0x318   :  { %2946 = vset.pattern.permute.xlu0 %v3510_v8 }
 0x319   :  { %v4139_v37 = vpop.permute.xlu1 %903  ;;  %650 = vperm.xlu0 %2946, %v4099_v6  }
 0x31a   :  { %vm905_vm13 = vcmp.eq.s32.totalorder %v4139_v37, 1 }
 0x31b   :  { %2948 = vset.pattern.permute.xlu1 %v3520_v19  ;;  %v1026_v50 = vpop.permute.xlu0 %1025 }
 0x31c   :  { %1820 = vperm.xlu1 %2948, %v3999_v53   ;;  %vm1027_vm4 = vcmp.eq.s32.totalorder %v1026_v50, 1 }
 0x31d   :  { %2949 = vset.pattern.permute.xlu0 %v3512_v10 }
 0x31e   :  { %v4145_v40 = vpop.permute.xlu1 %2073  ;;  %1960 = vperm.xlu0 %2949, %v4099_v6  }
 0x31f   :  { %vm2075_vm10 = vcmp.eq.s32.totalorder %v4145_v40, 1 }
 0x320   :  { %2950 = vset.pattern.permute.xlu1 %v3511_v9  ;;  %v4150_v42 = vpop.permute.xlu0 %641 }
 0x321   :  { %1698 = vperm.xlu1 %2950, %v4099_v6   ;;  %vm643_vm14 = vcmp.eq.s32.totalorder %v4150_v42, 1 }
 0x322   :  { %2992 = vset.pattern.permute.xlu0 %v3515_v14 }
 0x323   :  { %v1812_v55 = vpop.permute.xlu1 %1811 }
 0x324   :  { %vm1813_vm11 = vcmp.eq.s32.totalorder %v1812_v55, 1 }
 0x325   :  { %2981 = vset.pattern.permute.xlu1 %v3513_v12  ;;  %v4156_v53 = vpop.permute.xlu0 %1951 }
 0x328   :  { %v4154_v58 = vpop.permute.xlu1 %1689 }
 0x329   :  { %vm1691_vm15 = vcmp.eq.s32.totalorder %v4154_v58, 1 }
 0x32c   :  { %v2897_v41 = vpop.permute.xlu1 %2896 }
 0x32d   :  { %v2899_v57 = vunpack.i.h.bf16 %v2897_v41  ;;  %v2898_v11 = vunpack.i.l.bf16 %v2897_v41 }
 0x32e   :  { %v2902_v20 = vpop.permute.xlu0 %2901 }
 0x32f   :  { %v246_v21 = vsel %vm241_vm0, %v4078_v54, %v2899_v57  ;;  %v508_v22 = vsel %vm503_vm1, %v4078_v54, %v2898_v11  ;;  %v2904_v33 = vunpack.i.h.bf16 %v2902_v20  ;;  %v2903_v28 = vunpack.i.l.bf16 %v2902_v20 }
 0x330   :  { %v2907_v52 = vpop.permute.xlu1 %2906  ;;  %v2951_v25 = vpack.i.bf16 %v246_v21, %v508_v22  ;;  %vm1953_vm0 = vcmp.eq.s32.totalorder %v4156_v53, 1 }
 0x331   :  { %v1294_v39 = vsel %vm1289_vm3, %v4078_v54, %v2904_v33  ;;  %v1556_v29 = vsel %vm1551_vm2, %v4078_v54, %v2903_v28  ;;  %v2909_v60 = vunpack.i.h.bf16 %v2907_v52  ;;  %v2908_v59 = vunpack.i.l.bf16 %v2907_v52 }
 0x332   :  { %2952 = vrot.lane.b32.xlu1 %v2951_v25, %s3509_s25  ;;  %v2956_v61 = vpack.i.bf16 %v1294_v39, %v1556_v29 }
 0x333   :  { %v770_v56 = vsel %vm765_vm5, %v4078_v54, %v2909_v60  ;;  %v1032_v31 = vsel %vm1027_vm4, %v4078_v54, %v2908_v59 }
 0x334   :  { %2957 = vrot.lane.b32.xlu0 %v2956_v61, %s3509_s25  ;;  %v2961_v4 = vpack.i.bf16 %v770_v56, %v1032_v31 }
 0x336   :  { %2962 = vrot.lane.b32.xlu1 %v2961_v4, %s3509_s25 }
 0x33f   :  { %v4184_v49 = vpop.permute.xlu0 %248 }
 0x340   :  { %vm250_vm1 = vcmp.eq.s32.totalorder %v4184_v49, 1 }
 0x35a   :  { %v2912_v26 = vpop.permute.xlu1 %2911 }
 0x35b   :  { %v2914_v36 = vunpack.i.h.bf16 %v2912_v26  ;;  %v2913_v63 = vunpack.i.l.bf16 %v2912_v26 }
 0x35d   :  { %v108_v35 = vsel %vm103_vm7, %v4078_v54, %v2914_v36  ;;  %v386_v38 = vsel %vm381_vm6, %v4078_v54, %v2913_v63 }
 0x35e   :  { %v2917_v43 = vpop.permute.xlu1 %2916  ;;  %v2966_v0 = vpack.i.bf16 %v108_v35, %v386_v38 }
 0x35f   :  { %v2919_v44 = vunpack.i.h.bf16 %v2917_v43  ;;  %v2918_v46 = vunpack.i.l.bf16 %v2917_v43 }
 0x360   :  { %2967 = vrot.lane.b32.xlu1 %v2966_v0, %s3509_s25 }
 0x361   :  { %v1172_v47 = vsel %vm1167_vm9, %v4078_v54, %v2919_v44  ;;  %v1434_v30 = vsel %vm1429_vm8, %v4078_v54, %v2918_v46 }
 0x362   :  { %v2922_v45 = vpop.permute.xlu1 %2921  ;;  %v2971_v24 = vpack.i.bf16 %v1172_v47, %v1434_v30 }
 0x363   :  { %v2924_v48 = vunpack.i.h.bf16 %v2922_v45  ;;  %v2923_v27 = vunpack.i.l.bf16 %v2922_v45 }
 0x364   :  { %2972 = vrot.lane.b32.xlu1 %v2971_v24, %s3509_s25 }
 0x365   :  { %v1818_v34 = vsel %vm1813_vm11, %v4078_v54, %v2924_v48  ;;  %v2080_v62 = vsel %vm2075_vm10, %v4078_v54, %v2923_v27  ;;  %v4261_v27 = vld [vmem:[%s4995_s1 + $0x20] sm:$0xff] }
 0x366   :  { %v2976_v32 = vpack.i.bf16 %v1818_v34, %v2080_v62 }
 0x368   :  { %2977 = vrot.lane.b32.xlu1 %v2976_v32, %s3509_s25 }
 0x36c   :  { %519 = vperm.xlu1 %2981, %v4099_v6  }
 0x370   :  { %2993 = vset.pattern.permute.xlu1 %v3505_v2 }
 0x371   :  { %397 = vperm.xlu1 %2993, %v4187_v23  }
 0x373   :  { %v4191_v50 = vpop.permute.xlu1 %510 }
 0x374   :  { %v2931_v40 = vpop.permute.xlu0 %2930  ;;  %vm512_vm2 = vcmp.eq.s32.totalorder %v4191_v50, 1 }
 0x375   :  { %v2933_v55 = vunpack.i.h.bf16 %v2931_v40  ;;  %v2932_v41 = vunpack.i.l.bf16 %v2931_v40  ;;  %2994 = vset.pattern.permute.xlu1 %v3506_v3 }
 0x376   :  { %123 = vperm.xlu1 %2994, %v4187_v23  }
 0x377   :  { %v648_v57 = vsel %vm643_vm14, %v4078_v54, %v2933_v55  ;;  %v910_v11 = vsel %vm905_vm13, %v4078_v54, %v2932_v41  ;;  %vm131_vm13 = vcmp.eq.s32.totalorder %v3994_v51, 10 }
 0x378   :  { %v2936_v20 = vpop.permute.xlu0 %2935  ;;  %v2982_v21 = vpack.i.bf16 %v648_v57, %v910_v11  ;;  %v4199_v22 = vpop.permute.xlu1 %388 }
 0x379   :  { %v2938_v33 = vunpack.i.h.bf16 %v2936_v20  ;;  %v2937_v28 = vunpack.i.l.bf16 %v2936_v20  ;;  %vm390_vm5 = vcmp.eq.s32.totalorder %v4199_v22, 1 }
 0x37a   :  { %2983 = vrot.lane.b32.xlu0 %v2982_v21, %s3509_s25  ;;  %2996 = vset.pattern.permute.xlu1 %v3514_v13 }
 0x37b   :  { %v1696_v37 = vsel %vm1691_vm15, %v4078_v54, %v2938_v33  ;;  %v1958_v42 = vsel %vm1953_vm0, %v4078_v54, %v2937_v28  ;;  %1305 = vperm.xlu1 %2996, %v4099_v6  }
 0x37c   :  { %v2987_v52 = vpack.i.bf16 %v1696_v37, %v1958_v42 }
 0x37d   :  { %v4208_v25 = vpop.permute.xlu1 %112 }
 0x37e   :  { %2988 = vrot.lane.b32.xlu0 %v2987_v52, %s3509_s25  ;;  %vm114_vm6 = vcmp.eq.s32.totalorder %v4208_v25, 1 }
 0x37f   :  { %2997 = vset.pattern.permute.xlu1 %v3504_v1 }
 0x380   :  { %1445 = vperm.xlu1 %2997, %v4187_v23  }
 0x382   :  { %257 = vperm.xlu0 %2992, %v4099_v6   ;;  %v1297_v58 = vpop.permute.xlu1 %1296 }
 0x383   :  { %vm1298_vm4 = vcmp.eq.s32.totalorder %v1297_v58, 1 }
 0x384   :  { %3000 = vset.pattern.permute.xlu1 %v3518_v17 }
 0x385   :  { %781 = vperm.xlu1 %3000, %v4099_v6  }
 0x386   :  { %2995 = vset.pattern.permute.xlu0 %v3517_v16 }
 0x387   :  { %1567 = vperm.xlu0 %2995, %v4099_v6   ;;  %v4218_v53 = vpop.permute.xlu1 %1436 }
 0x388   :  { %vm1438_vm7 = vcmp.eq.s32.totalorder %v4218_v53, 1 }
 0x389   :  { %3001 = vset.pattern.permute.xlu1 %v3508_v7  ;;  %v1559_v39 = vpop.permute.xlu0 %1558 }
 0x38a   :  { %921 = vperm.xlu1 %3001, %v4187_v23   ;;  %vm1560_vm3 = vcmp.eq.s32.totalorder %v1559_v39, 1 }
 0x38b   :  { %2998 = vset.pattern.permute.xlu0 %v3507_v5 }
 0x38c   :  { %1183 = vperm.xlu0 %2998, %v4187_v23   ;;  %v4224_v29 = vpop.permute.xlu1 %772 }
 0x38d   :  { %vm774_vm10 = vcmp.eq.s32.totalorder %v4224_v29, 1 }
 0x38e   :  { %3003 = vset.pattern.permute.xlu1 %v3519_v18  ;;  %v1175_v60 = vpop.permute.xlu0 %1174 }
 0x38f   :  { %2091 = vperm.xlu1 %3003, %v4099_v6   ;;  %vm1176_vm8 = vcmp.eq.s32.totalorder %v1175_v60, 1  ;;  %v4283_v60 = vsel %vm131_vm13, 1, %v3506_v3 }
 0x390   :  { %2999 = vset.pattern.permute.xlu0 %v3516_v15 }
 0x391   :  { %1043 = vperm.xlu0 %2999, %v4099_v6   ;;  %v4230_v59 = vpop.permute.xlu1 %912 }
 0x392   :  { %vm914_vm14 = vcmp.eq.s32.totalorder %v4230_v59, 1 }
 0x393   :  { %3004 = vset.pattern.permute.xlu1 %v3520_v19  ;;  %v1035_v61 = vpop.permute.xlu0 %1034 }
 0x394   :  { %1829 = vperm.xlu1 %3004, %v4099_v6   ;;  %vm1036_vm9 = vcmp.eq.s32.totalorder %v1035_v61, 1 }
 0x395   :  { %3002 = vset.pattern.permute.xlu0 %v3510_v8 }
 0x396   :  { %659 = vperm.xlu0 %3002, %v4187_v23   ;;  %v4236_v56 = vpop.permute.xlu1 %2082 }
 0x397   :  { %vm2084_vm11 = vcmp.eq.s32.totalorder %v4236_v56, 1 }
 0x398   :  { %3006 = vset.pattern.permute.xlu1 %v3511_v9  ;;  %v4241_v31 = vpop.permute.xlu0 %650 }
 0x399   :  { %1707 = vperm.xlu1 %3006, %v4187_v23   ;;  %vm652_vm15 = vcmp.eq.s32.totalorder %v4241_v31, 1 }
 0x39a   :  { %3005 = vset.pattern.permute.xlu0 %v3512_v10 }
 0x39b   :  { %1969 = vperm.xlu0 %3005, %v4187_v23   ;;  %v1821_v4 = vpop.permute.xlu1 %1820 }
 0x39c   :  { %vm1822_vm12 = vcmp.eq.s32.totalorder %v1821_v4, 1 }
 0x39d   :  { %3037 = vset.pattern.permute.xlu1 %v3513_v12  ;;  %v4248_v26 = vpop.permute.xlu0 %1960 }
 0x39f   :  { %3048 = vset.pattern.permute.xlu0 %v3515_v14 }
 0x3a0   :  { %v4246_v6 = vpop.permute.xlu1 %1698 }
 0x3a1   :  { %vm1700_vm0 = vcmp.eq.s32.totalorder %v4246_v6, 1 }
 0x3a4   :  { %v2953_v36 = vpop.permute.xlu1 %2952 }
 0x3a5   :  { %v2955_v63 = vunpack.i.h.bf16 %v2953_v36  ;;  %v2954_v35 = vunpack.i.l.bf16 %v2953_v36 }
 0x3a6   :  { %v2958_v38 = vpop.permute.xlu0 %2957 }
 0x3a7   :  { %v255_v43 = vsel %vm250_vm1, %v4078_v54, %v2955_v63  ;;  %v517_v0 = vsel %vm512_vm2, %v4078_v54, %v2954_v35  ;;  %v2960_v44 = vunpack.i.h.bf16 %v2958_v38  ;;  %v2959_v46 = vunpack.i.l.bf16 %v2958_v38 }
 0x3a8   :  { %v3007_v47 = vpack.i.bf16 %v255_v43, %v517_v0  ;;  %v2963_v48 = vpop.permute.xlu1 %2962  ;;  %vm1962_vm1 = vcmp.eq.s32.totalorder %v4248_v26, 1 }
 0x3a9   :  { %v1303_v30 = vsel %vm1298_vm4, %v4078_v54, %v2960_v44  ;;  %v1565_v45 = vsel %vm1560_vm3, %v4078_v54, %v2959_v46  ;;  %v2965_v41 = vunpack.i.h.bf16 %v2963_v48  ;;  %v2964_v57 = vunpack.i.l.bf16 %v2963_v48 }
 0x3aa   :  { %3008 = vrot.lane.b32.xlu1 %v3007_v47, %s3509_s25  ;;  %v3012_v24 = vpack.i.bf16 %v1303_v30, %v1565_v45 }
 0x3ab   :  { %v779_v37 = vsel %vm774_vm10, %v4078_v54, %v2965_v41  ;;  %v1041_v42 = vsel %vm1036_vm9, %v4078_v54, %v2964_v57 }
 0x3ac   :  { %3013 = vrot.lane.b32.xlu0 %v3012_v24, %s3509_s25  ;;  %v3027_v58 = vpack.i.bf16 %v779_v37, %v1041_v42 }
 0x3d2   :  { %v2968_v34 = vpop.permute.xlu1 %2967 }
 0x3d3   :  { %v2970_v62 = vunpack.i.h.bf16 %v2968_v34  ;;  %v2969_v32 = vunpack.i.l.bf16 %v2968_v34 }
 0x3d5   :  { %v119_v49 = vsel %vm114_vm6, %v4261_v27, %v2970_v62  ;;  %v395_v50 = vsel %vm390_vm5, %v4261_v27, %v2969_v32 }
 0x3d6   :  { %v2973_v40 = vpop.permute.xlu1 %2972  ;;  %v3017_v55 = vpack.i.bf16 %v119_v49, %v395_v50 }
 0x3d7   :  { %v2975_v11 = vunpack.i.h.bf16 %v2973_v40  ;;  %v2974_v20 = vunpack.i.l.bf16 %v2973_v40 }
 0x3d8   :  { %3018 = vrot.lane.b32.xlu1 %v3017_v55, %s3509_s25 }
 0x3d9   :  { %v1181_v21 = vsel %vm1176_vm8, %v4261_v27, %v2975_v11  ;;  %v1443_v22 = vsel %vm1438_vm7, %v4261_v27, %v2974_v20 }
 0x3da   :  { %v2978_v33 = vpop.permute.xlu1 %2977  ;;  %v3022_v28 = vpack.i.bf16 %v1181_v21, %v1443_v22 }
 0x3db   :  { %v2980_v52 = vunpack.i.h.bf16 %v2978_v33  ;;  %v2979_v25 = vunpack.i.l.bf16 %v2978_v33 }
 0x3dc   :  { %3023 = vrot.lane.b32.xlu1 %v3022_v28, %s3509_s25 }
 0x3dd   :  { %v1827_v53 = vsel %vm1822_vm12, %v4078_v54, %v2980_v52  ;;  %v2089_v39 = vsel %vm2084_vm11, %v4078_v54, %v2979_v25 }
 0x3de   :  { %v3032_v29 = vpack.i.bf16 %v1827_v53, %v2089_v39 }
 0x3e0   :  { %3028 = vrot.lane.b32.xlu1 %v3027_v58, %s3509_s25 }
 0x3e4   :  { %3033 = vrot.lane.b32.xlu1 %v3032_v29, %s3509_s25 }
 0x3e8   :  { %528 = vperm.xlu1 %3037, %v4187_v23  }
 0x3eb   :  { %v4285_v61 = vpop.permute.xlu1 %519 }
 0x3ec   :  { %v2984_v56 = vpop.permute.xlu0 %2983  ;;  %3049 = vset.pattern.permute.xlu1 %v3505_v2  ;;  %vm521_vm3 = vcmp.eq.s32.totalorder %v4285_v61, 1 }
 0x3ed   :  { %v2986_v4 = vunpack.i.h.bf16 %v2984_v56  ;;  %v2985_v36 = vunpack.i.l.bf16 %v2984_v56  ;;  %406 = vperm.xlu1 %3049, %v4283_v60  }
 0x3ef   :  { %v657_v54 = vsel %vm652_vm15, %v4261_v27, %v2986_v4  ;;  %v919_v63 = vsel %vm914_vm14, %v4261_v27, %v2985_v36  ;;  %vm142_vm14 = vcmp.eq.s32.totalorder %v3994_v51, 11 }
 0x3f0   :  { %v2989_v35 = vpop.permute.xlu0 %2988  ;;  %v3038_v38 = vpack.i.bf16 %v657_v54, %v919_v63  ;;  %v4293_v43 = vpop.permute.xlu1 %397 }
 0x3f1   :  { %v2991_v0 = vunpack.i.h.bf16 %v2989_v35  ;;  %v2990_v44 = vunpack.i.l.bf16 %v2989_v35  ;;  %3050 = vset.pattern.permute.xlu1 %v3506_v3  ;;  %vm399_vm6 = vcmp.eq.s32.totalorder %v4293_v43, 1 }
 0x3f2   :  { %3039 = vrot.lane.b32.xlu0 %v3038_v38, %s3509_s25  ;;  %134 = vperm.xlu1 %3050, %v4283_v60  }
 0x3f3   :  { %v1705_v59 = vsel %vm1700_vm0, %v4261_v27, %v2991_v0  ;;  %v1967_v31 = vsel %vm1962_vm1, %v4261_v27, %v2990_v44 }
 0x3f4   :  { %v3043_v46 = vpack.i.bf16 %v1705_v59, %v1967_v31 }
 0x3f5   :  { %v4302_v47 = vpop.permute.xlu1 %123 }
 0x3f6   :  { %3044 = vrot.lane.b32.xlu0 %v3043_v46, %s3509_s25  ;;  %3052 = vset.pattern.permute.xlu1 %v3514_v13  ;;  %vm125_vm7 = vcmp.eq.s32.totalorder %v4302_v47, 1 }
 0x3f7   :  { %1314 = vperm.xlu1 %3052, %v4187_v23  }
 0x3fa   :  { %266 = vperm.xlu0 %3048, %v4187_v23   ;;  %v1306_v6 = vpop.permute.xlu1 %1305 }
 0x3fb   :  { %3053 = vset.pattern.permute.xlu1 %v3504_v1  ;;  %vm1307_vm5 = vcmp.eq.s32.totalorder %v1306_v6, 1 }
 0x3fc   :  { %1454 = vperm.xlu1 %3053, %v4283_v60  }
 0x3fe   :  { %3051 = vset.pattern.permute.xlu0 %v3517_v16 }
 0x3ff   :  { %1576 = vperm.xlu0 %3051, %v4187_v23   ;;  %v4312_v26 = vpop.permute.xlu1 %1445 }
 0x400   :  { %3056 = vset.pattern.permute.xlu1 %v3518_v17  ;;  %vm1447_vm8 = vcmp.eq.s32.totalorder %v4312_v26, 1 }
 0x401   :  { %790 = vperm.xlu1 %3056, %v4187_v23   ;;  %v258_v30 = vpop.permute.xlu0 %257 }
 0x402   :  { %vm259_vm2 = vcmp.eq.s32.totalorder %v258_v30, 1 }
 0x403   :  { %3054 = vset.pattern.permute.xlu0 %v3507_v5 }
 0x404   :  { %1192 = vperm.xlu0 %3054, %v4283_v60   ;;  %v4318_v45 = vpop.permute.xlu1 %781 }
 0x405   :  { %3057 = vset.pattern.permute.xlu1 %v3508_v7  ;;  %vm783_vm10 = vcmp.eq.s32.totalorder %v4318_v45, 1 }
 0x406   :  { %930 = vperm.xlu1 %3057, %v4283_v60   ;;  %v1568_v24 = vpop.permute.xlu0 %1567 }
 0x407   :  { %vm1569_vm4 = vcmp.eq.s32.totalorder %v1568_v24, 1  ;;  %v4373_v24 = vsel %vm142_vm14, 1, %v3506_v3 }
 0x408   :  { %3055 = vset.pattern.permute.xlu0 %v3516_v15 }
 0x409   :  { %1052 = vperm.xlu0 %3055, %v4187_v23   ;;  %v4324_v48 = vpop.permute.xlu1 %921 }
 0x40a   :  { %3059 = vset.pattern.permute.xlu1 %v3519_v18  ;;  %vm923_vm15 = vcmp.eq.s32.totalorder %v4324_v48, 1 }
 0x40b   :  { %2100 = vperm.xlu1 %3059, %v4187_v23   ;;  %v1184_v34 = vpop.permute.xlu0 %1183 }
 0x40c   :  { %vm1185_vm9 = vcmp.eq.s32.totalorder %v1184_v34, 1 }
 0x40d   :  { %3058 = vset.pattern.permute.xlu0 %v3510_v8 }
 0x40e   :  { %668 = vperm.xlu0 %3058, %v4283_v60   ;;  %v4330_v62 = vpop.permute.xlu1 %2091 }
 0x40f   :  { %3060 = vset.pattern.permute.xlu1 %v3520_v19  ;;  %vm2093_vm12 = vcmp.eq.s32.totalorder %v4330_v62, 1 }
 0x410   :  { %1838 = vperm.xlu1 %3060, %v4187_v23   ;;  %v1044_v32 = vpop.permute.xlu0 %1043 }
 0x411   :  { %vm1045_vm11 = vcmp.eq.s32.totalorder %v1044_v32, 1 }
 0x412   :  { %3061 = vset.pattern.permute.xlu0 %v3512_v10 }
 0x413   :  { %1978 = vperm.xlu0 %3061, %v4283_v60   ;;  %v1830_v49 = vpop.permute.xlu1 %1829 }
 0x414   :  { %3062 = vset.pattern.permute.xlu1 %v3511_v9  ;;  %vm1831_vm13 = vcmp.eq.s32.totalorder %v1830_v49, 1 }
 0x415   :  { %1716 = vperm.xlu1 %3062, %v4283_v60   ;;  %v4338_v50 = vpop.permute.xlu0 %659 }
 0x416   :  { %vm661_vm0 = vcmp.eq.s32.totalorder %v4338_v50, 1 }
 0x417   :  { %3104 = vset.pattern.permute.xlu0 %v3515_v14 }
 0x418   :  { %v4341_v40 = vpop.permute.xlu1 %1707 }
 0x419   :  { %3093 = vset.pattern.permute.xlu1 %v3513_v12  ;;  %vm1709_vm1 = vcmp.eq.s32.totalorder %v4341_v40, 1 }
 0x41a   :  { %v4344_v55 = vpop.permute.xlu0 %1969 }
 0x41c   :  { %v3009_v23 = vpop.permute.xlu1 %3008 }
 0x41d   :  { %v3011_v41 = vunpack.i.h.bf16 %v3009_v23  ;;  %v3010_v57 = vunpack.i.l.bf16 %v3009_v23 }
 0x41e   :  { %v3014_v11 = vpop.permute.xlu0 %3013 }
 0x41f   :  { %v264_v20 = vsel %vm259_vm2, %v4261_v27, %v3011_v41  ;;  %v526_v21 = vsel %vm521_vm3, %v4261_v27, %v3010_v57  ;;  %v3016_v22 = vunpack.i.h.bf16 %v3014_v11  ;;  %v3015_v33 = vunpack.i.l.bf16 %v3014_v11 }
 0x420   :  { %v3063_v28 = vpack.i.bf16 %v264_v20, %v526_v21  ;;  %vm1971_vm2 = vcmp.eq.s32.totalorder %v4344_v55, 1 }
 0x421   :  { %v1312_v37 = vsel %vm1307_vm5, %v4261_v27, %v3016_v22  ;;  %v1574_v42 = vsel %vm1569_vm4, %v4261_v27, %v3015_v33 }
 0x422   :  { %3064 = vrot.lane.b32.xlu1 %v3063_v28, %s3509_s25  ;;  %v3068_v52 = vpack.i.bf16 %v1312_v37, %v1574_v42 }
 0x424   :  { %3069 = vrot.lane.b32.xlu0 %v3068_v52, %s3509_s25 }
 0x44a   :  { %v3019_v25 = vpop.permute.xlu1 %3018 }
 0x44b   :  { %v3021_v58 = vunpack.i.h.bf16 %v3019_v25  ;;  %v3020_v53 = vunpack.i.l.bf16 %v3019_v25 }
 0x44d   :  { %v130_v39 = vsel %vm125_vm7, %v4261_v27, %v3021_v58  ;;  %v404_v29 = vsel %vm399_vm6, %v4261_v27, %v3020_v53 }
 0x44e   :  { %v3024_v61 = vpop.permute.xlu1 %3023  ;;  %v3073_v56 = vpack.i.bf16 %v130_v39, %v404_v29 }
 0x44f   :  { %v3026_v4 = vunpack.i.h.bf16 %v3024_v61  ;;  %v3025_v36 = vunpack.i.l.bf16 %v3024_v61 }
 0x450   :  { %3074 = vrot.lane.b32.xlu1 %v3073_v56, %s3509_s25 }
 0x451   :  { %v1190_v54 = vsel %vm1185_vm9, %v4261_v27, %v3026_v4  ;;  %v1452_v63 = vsel %vm1447_vm8, %v4261_v27, %v3025_v36 }
 0x452   :  { %v3029_v35 = vpop.permute.xlu1 %3028  ;;  %v3078_v38 = vpack.i.bf16 %v1190_v54, %v1452_v63 }
 0x453   :  { %v3031_v43 = vunpack.i.h.bf16 %v3029_v35  ;;  %v3030_v0 = vunpack.i.l.bf16 %v3029_v35 }
 0x454   :  { %3079 = vrot.lane.b32.xlu1 %v3078_v38, %s3509_s25 }
 0x455   :  { %v788_v44 = vsel %vm783_vm10, %v4261_v27, %v3031_v43  ;;  %v1050_v59 = vsel %vm1045_vm11, %v4261_v27, %v3030_v0 }
 0x456   :  { %v3034_v31 = vpop.permute.xlu1 %3033  ;;  %v3083_v46 = vpack.i.bf16 %v788_v44, %v1050_v59 }
 0x457   :  { %v3036_v47 = vunpack.i.h.bf16 %v3034_v31  ;;  %v3035_v6 = vunpack.i.l.bf16 %v3034_v31 }
 0x458   :  { %3084 = vrot.lane.b32.xlu1 %v3083_v46, %s3509_s25  ;;  %v4446_v46 = vld [vmem:[%s4995_s1 + $0x28] sm:$0xff] }
 0x459   :  { %v1836_v26 = vsel %vm1831_vm13, %v4261_v27, %v3036_v47  ;;  %v2098_v30 = vsel %vm2093_vm12, %v4261_v27, %v3035_v6 }
 0x45a   :  { %v3088_v45 = vpack.i.bf16 %v1836_v26, %v2098_v30 }
 0x45c   :  { %3089 = vrot.lane.b32.xlu1 %v3088_v45, %s3509_s25 }
 0x460   :  { %537 = vperm.xlu1 %3093, %v4283_v60  }
 0x464   :  { %v3040_v34 = vpop.permute.xlu0 %3039  ;;  %3105 = vset.pattern.permute.xlu1 %v3505_v2 }
 0x465   :  { %v3042_v62 = vunpack.i.h.bf16 %v3040_v34  ;;  %v3041_v32 = vunpack.i.l.bf16 %v3040_v34  ;;  %415 = vperm.xlu1 %3105, %v4373_v24  }
 0x467   :  { %v666_v49 = vsel %vm661_vm0, %v4261_v27, %v3042_v62  ;;  %v928_v51 = vsel %vm923_vm15, %v4261_v27, %v3041_v32  ;;  %v4381_v23 = vpop.permute.xlu1 %528 }
 0x468   :  { %v3045_v41 = vpop.permute.xlu0 %3044  ;;  %v3094_v57 = vpack.i.bf16 %v666_v49, %v928_v51  ;;  %vm530_vm6 = vcmp.eq.s32.totalorder %v4381_v23, 1 }
 0x469   :  { %v3047_v11 = vunpack.i.h.bf16 %v3045_v41  ;;  %v3046_v20 = vunpack.i.l.bf16 %v3045_v41  ;;  %3106 = vset.pattern.permute.xlu1 %v3506_v3 }
 0x46a   :  { %3095 = vrot.lane.b32.xlu0 %v3094_v57, %s3509_s25  ;;  %145 = vperm.xlu1 %3106, %v4373_v24  }
 0x46b   :  { %v1714_v48 = vsel %vm1709_vm1, %v4261_v27, %v3047_v11  ;;  %v1976_v50 = vsel %vm1971_vm2, %v4261_v27, %v3046_v20 }
 0x46c   :  { %v3099_v21 = vpack.i.bf16 %v1714_v48, %v1976_v50  ;;  %v4390_v22 = vpop.permute.xlu1 %406 }
 0x46d   :  { %vm408_vm7 = vcmp.eq.s32.totalorder %v4390_v22, 1 }
 0x46e   :  { %3100 = vrot.lane.b32.xlu0 %v3099_v21, %s3509_s25  ;;  %3108 = vset.pattern.permute.xlu1 %v3514_v13 }
 0x46f   :  { %1323 = vperm.xlu1 %3108, %v4283_v60  }
 0x471   :  { %v4395_v40 = vpop.permute.xlu1 %134 }
 0x472   :  { %275 = vperm.xlu0 %3104, %v4283_v60   ;;  %vm136_vm8 = vcmp.eq.s32.totalorder %v4395_v40, 1 }
 0x473   :  { %3109 = vset.pattern.permute.xlu1 %v3504_v1 }
 0x474   :  { %1463 = vperm.xlu1 %3109, %v4373_v24  }
 0x476   :  { %3107 = vset.pattern.permute.xlu0 %v3517_v16  ;;  %v1315_v55 = vpop.permute.xlu1 %1314 }
 0x477   :  { %1585 = vperm.xlu0 %3107, %v4283_v60   ;;  %vm1316_vm4 = vcmp.eq.s32.totalorder %v1315_v55, 1 }
 0x478   :  { %3112 = vset.pattern.permute.xlu1 %v3518_v17 }
 0x479   :  { %v267_v33 = vpop.permute.xlu0 %266  ;;  %799 = vperm.xlu1 %3112, %v4283_v60  }
 0x47a   :  { %vm268_vm5 = vcmp.eq.s32.totalorder %v267_v33, 1 }
 0x47b   :  { %3110 = vset.pattern.permute.xlu0 %v3507_v5  ;;  %v4405_v28 = vpop.permute.xlu1 %1454 }
 0x47c   :  { %1201 = vperm.xlu0 %3110, %v4373_v24   ;;  %vm1456_vm9 = vcmp.eq.s32.totalorder %v4405_v28, 1 }
 0x47d   :  { %3113 = vset.pattern.permute.xlu1 %v3508_v7 }
 0x47e   :  { %v1577_v37 = vpop.permute.xlu0 %1576  ;;  %939 = vperm.xlu1 %3113, %v4373_v24  }
 0x47f   :  { %vm1578_vm3 = vcmp.eq.s32.totalorder %v1577_v37, 1 }
 0x480   :  { %v4410_v42 = vpop.permute.xlu1 %790  ;;  %3111 = vset.pattern.permute.xlu0 %v3516_v15 }
 0x481   :  { %1061 = vperm.xlu0 %3111, %v4283_v60   ;;  %vm792_vm11 = vcmp.eq.s32.totalorder %v4410_v42, 1  ;;  %v4468_v42 = vld [vmem:[%s4994_s0] sm:$0xff] }
 0x482   :  { %3115 = vset.pattern.permute.xlu1 %v3519_v18  ;;  %vm153_vm15 = vcmp.eq.s32.totalorder %v4468_v42, 12 }
 0x483   :  { %v1193_v52 = vpop.permute.xlu0 %1192  ;;  %2109 = vperm.xlu1 %3115, %v4283_v60  }
 0x484   :  { %vm1194_vm10 = vcmp.eq.s32.totalorder %v1193_v52, 1  ;;  %v4473_v52 = vsel %vm153_vm15, 1, %v3506_v3 }
 0x485   :  { %v4416_v25 = vpop.permute.xlu1 %930  ;;  %3114 = vset.pattern.permute.xlu0 %v3510_v8 }
 0x486   :  { %677 = vperm.xlu0 %3114, %v4373_v24   ;;  %vm932_vm0 = vcmp.eq.s32.totalorder %v4416_v25, 1 }
 0x487   :  { %3116 = vset.pattern.permute.xlu1 %v3520_v19 }
 0x488   :  { %v1053_v58 = vpop.permute.xlu0 %1052  ;;  %1847 = vperm.xlu1 %3116, %v4283_v60  }
 0x489   :  { %vm1054_vm12 = vcmp.eq.s32.totalorder %v1053_v58, 1 }
 0x48a   :  { %v4422_v53 = vpop.permute.xlu1 %2100  ;;  %3127 = vset.pattern.permute.xlu0 %v3512_v10 }
 0x48b   :  { %vm2102_vm13 = vcmp.eq.s32.totalorder %v4422_v53, 1 }
 0x48c   :  { %3128 = vset.pattern.permute.xlu1 %v3511_v9 }
 0x48d   :  { %v4426_v39 = vpop.permute.xlu0 %668 }
 0x48e   :  { %vm670_vm1 = vcmp.eq.s32.totalorder %v4426_v39, 1 }
 0x48f   :  { %v1839_v29 = vpop.permute.xlu1 %1838 }
 0x490   :  { %vm1840_vm14 = vcmp.eq.s32.totalorder %v1839_v29, 1 }
 0x492   :  { %v4428_v61 = vpop.permute.xlu0 %1978 }
 0x493   :  { %vm1980_vm2 = vcmp.eq.s32.totalorder %v4428_v61, 1 }
 0x494   :  { %v4430_v56 = vpop.permute.xlu1 %1716 }
 0x496   :  { %v3070_v4 = vpop.permute.xlu0 %3069 }
 0x497   :  { %v3072_v36 = vunpack.i.h.bf16 %v3070_v4  ;;  %v3071_v54 = vunpack.i.l.bf16 %v3070_v4 }
 0x498   :  { %v3065_v60 = vpop.permute.xlu1 %3064 }
 0x499   :  { %v1321_v63 = vsel %vm1316_vm4, %v4261_v27, %v3072_v36  ;;  %v1583_v35 = vsel %vm1578_vm3, %v4261_v27, %v3071_v54  ;;  %v3067_v38 = vunpack.i.h.bf16 %v3065_v60  ;;  %v3066_v43 = vunpack.i.l.bf16 %v3065_v60 }
 0x49a   :  { %v3122_v0 = vpack.i.bf16 %v1321_v63, %v1583_v35  ;;  %vm1718_vm3 = vcmp.eq.s32.totalorder %v4430_v56, 1 }
 0x49b   :  { %v273_v44 = vsel %vm268_vm5, %v4261_v27, %v3067_v38  ;;  %v535_v59 = vsel %vm530_vm6, %v4261_v27, %v3066_v43 }
 0x49c   :  { %3123 = vrot.lane.b32.xlu0 %v3122_v0, %s3509_s25  ;;  %v3117_v31 = vpack.i.bf16 %v273_v44, %v535_v59 }
 0x49e   :  { %3118 = vrot.lane.b32.xlu1 %v3117_v31, %s3509_s25 }
 0x4a0   :  { %1987 = vperm.xlu0 %3127, %v4373_v24  }
 0x4a2   :  { %1725 = vperm.xlu1 %3128, %v4373_v24  }
 0x4a4   :  { %3160 = vset.pattern.permute.xlu0 %v3515_v14 }
 0x4a6   :  { %3149 = vset.pattern.permute.xlu1 %v3513_v12 }
 0x4c2   :  { %v3075_v47 = vpop.permute.xlu1 %3074 }
 0x4c3   :  { %v3077_v6 = vunpack.i.h.bf16 %v3075_v47  ;;  %v3076_v26 = vunpack.i.l.bf16 %v3075_v47 }
 0x4c5   :  { %v141_v30 = vsel %vm136_vm8, %v4446_v46, %v3077_v6  ;;  %v413_v45 = vsel %vm408_vm7, %v4446_v46, %v3076_v26 }
 0x4c6   :  { %v3080_v34 = vpop.permute.xlu1 %3079  ;;  %v3129_v62 = vpack.i.bf16 %v141_v30, %v413_v45 }
 0x4c7   :  { %v3082_v32 = vunpack.i.h.bf16 %v3080_v34  ;;  %v3081_v49 = vunpack.i.l.bf16 %v3080_v34 }
 0x4c8   :  { %3130 = vrot.lane.b32.xlu1 %v3129_v62, %s3509_s25 }
 0x4c9   :  { %v1199_v51 = vsel %vm1194_vm10, %v4446_v46, %v3082_v32  ;;  %v1461_v23 = vsel %vm1456_vm9, %v4446_v46, %v3081_v49 }
 0x4ca   :  { %v3085_v41 = vpop.permute.xlu1 %3084  ;;  %v3134_v57 = vpack.i.bf16 %v1199_v51, %v1461_v23 }
 0x4cb   :  { %v3087_v11 = vunpack.i.h.bf16 %v3085_v41  ;;  %v3086_v20 = vunpack.i.l.bf16 %v3085_v41 }
 0x4cc   :  { %3135 = vrot.lane.b32.xlu1 %v3134_v57, %s3509_s25 }
 0x4cd   :  { %v797_v48 = vsel %vm792_vm11, %v4261_v27, %v3087_v11  ;;  %v1059_v50 = vsel %vm1054_vm12, %v4261_v27, %v3086_v20 }
 0x4ce   :  { %v3090_v21 = vpop.permute.xlu1 %3089  ;;  %v3139_v22 = vpack.i.bf16 %v797_v48, %v1059_v50 }
 0x4cf   :  { %v3092_v40 = vunpack.i.h.bf16 %v3090_v21  ;;  %v3091_v55 = vunpack.i.l.bf16 %v3090_v21 }
 0x4d0   :  { %3140 = vrot.lane.b32.xlu1 %v3139_v22, %s3509_s25 }
 0x4d1   :  { %v1845_v33 = vsel %vm1840_vm14, %v4261_v27, %v3092_v40  ;;  %v2107_v28 = vsel %vm2102_vm13, %v4261_v27, %v3091_v55 }
 0x4d2   :  { %v3144_v37 = vpack.i.bf16 %v1845_v33, %v2107_v28 }
 0x4d4   :  { %3145 = vrot.lane.b32.xlu1 %v3144_v37, %s3509_s25 }
 0x4d8   :  { %546 = vperm.xlu1 %3149, %v4373_v24  }
 0x4dc   :  { %v3096_v58 = vpop.permute.xlu0 %3095  ;;  %3161 = vset.pattern.permute.xlu1 %v3505_v2 }
 0x4dd   :  { %v3098_v53 = vunpack.i.h.bf16 %v3096_v58  ;;  %v3097_v27 = vunpack.i.l.bf16 %v3096_v58  ;;  %424 = vperm.xlu1 %3161, %v4473_v52  }
 0x4df   :  { %v675_v29 = vsel %vm670_vm1, %v4446_v46, %v3098_v53  ;;  %v937_v4 = vsel %vm932_vm0, %v4446_v46, %v3097_v27  ;;  %v4481_v36 = vpop.permute.xlu1 %537  ;;  %vm164_vm0 = vcmp.eq.s32.totalorder %v4468_v42, 13 }
 0x4e0   :  { %v3101_v54 = vpop.permute.xlu0 %3100  ;;  %v3150_v60 = vpack.i.bf16 %v675_v29, %v937_v4  ;;  %vm539_vm7 = vcmp.eq.s32.totalorder %v4481_v36, 1 }
 0x4e1   :  { %v3103_v63 = vunpack.i.h.bf16 %v3101_v54  ;;  %v3102_v35 = vunpack.i.l.bf16 %v3101_v54  ;;  %3162 = vset.pattern.permute.xlu1 %v3506_v3 }
 0x4e2   :  { %3151 = vrot.lane.b32.xlu0 %v3150_v60, %s3509_s25  ;;  %156 = vperm.xlu1 %3162, %v4473_v52  }
 0x4e3   :  { %v1723_v25 = vsel %vm1718_vm3, %v4446_v46, %v3103_v63  ;;  %v1985_v39 = vsel %vm1980_vm2, %v4446_v46, %v3102_v35 }
 0x4e4   :  { %v3155_v38 = vpack.i.bf16 %v1723_v25, %v1985_v39  ;;  %v4490_v43 = vpop.permute.xlu1 %415 }
 0x4e5   :  { %vm417_vm8 = vcmp.eq.s32.totalorder %v4490_v43, 1 }
 0x4e6   :  { %3156 = vrot.lane.b32.xlu0 %v3155_v38, %s3509_s25  ;;  %3164 = vset.pattern.permute.xlu1 %v3514_v13 }
 0x4e7   :  { %1332 = vperm.xlu1 %3164, %v4373_v24  }
 0x4e9   :  { %v4495_v61 = vpop.permute.xlu1 %145 }
 0x4ea   :  { %284 = vperm.xlu0 %3160, %v4373_v24   ;;  %vm147_vm9 = vcmp.eq.s32.totalorder %v4495_v61, 1 }
 0x4eb   :  { %3165 = vset.pattern.permute.xlu1 %v3504_v1 }
 0x4ec   :  { %1472 = vperm.xlu1 %3165, %v4473_v52  }
 0x4ee   :  { %3163 = vset.pattern.permute.xlu0 %v3517_v16  ;;  %v1324_v56 = vpop.permute.xlu1 %1323 }
 0x4ef   :  { %1594 = vperm.xlu0 %3163, %v4373_v24   ;;  %vm1325_vm5 = vcmp.eq.s32.totalorder %v1324_v56, 1 }
 0x4f0   :  { %3168 = vset.pattern.permute.xlu1 %v3518_v17 }
 0x4f1   :  { %808 = vperm.xlu1 %3168, %v4373_v24   ;;  %v276_v0 = vpop.permute.xlu0 %275 }
 0x4f2   :  { %vm277_vm6 = vcmp.eq.s32.totalorder %v276_v0, 1 }
 0x4f3   :  { %3166 = vset.pattern.permute.xlu0 %v3507_v5  ;;  %v1464_v44 = vpop.permute.xlu1 %1463 }
 0x4f4   :  { %1210 = vperm.xlu0 %3166, %v4473_v52   ;;  %vm1465_vm10 = vcmp.eq.s32.totalorder %v1464_v44, 1 }
 0x4f5   :  { %3169 = vset.pattern.permute.xlu1 %v3508_v7 }
 0x4f6   :  { %948 = vperm.xlu1 %3169, %v4473_v52   ;;  %v1586_v59 = vpop.permute.xlu0 %1585 }
 0x4f7   :  { %vm1587_vm4 = vcmp.eq.s32.totalorder %v1586_v59, 1 }
 0x4f8   :  { %3167 = vset.pattern.permute.xlu0 %v3516_v15  ;;  %v4509_v31 = vpop.permute.xlu1 %799 }
 0x4f9   :  { %1070 = vperm.xlu0 %3167, %v4373_v24   ;;  %vm801_vm12 = vcmp.eq.s32.totalorder %v4509_v31, 1  ;;  %v4553_v31 = vsel %vm164_vm0, 1, %v3506_v3 }
 0x4fa   :  { %3171 = vset.pattern.permute.xlu1 %v3519_v18 }
 0x4fb   :  { %2118 = vperm.xlu1 %3171, %v4373_v24   ;;  %v1202_v47 = vpop.permute.xlu0 %1201 }
 0x4fc   :  { %vm1203_vm11 = vcmp.eq.s32.totalorder %v1202_v47, 1 }
 0x4fd   :  { %3170 = vset.pattern.permute.xlu0 %v3510_v8  ;;  %v4516_v6 = vpop.permute.xlu1 %939 }
 0x4fe   :  { %686 = vperm.xlu0 %3170, %v4473_v52   ;;  %vm941_vm1 = vcmp.eq.s32.totalorder %v4516_v6, 1 }
 0x4ff   :  { %3172 = vset.pattern.permute.xlu1 %v3520_v19 }
 0x500   :  { %1856 = vperm.xlu1 %3172, %v4373_v24   ;;  %v1062_v26 = vpop.permute.xlu0 %1061 }
 0x501   :  { %vm1063_vm13 = vcmp.eq.s32.totalorder %v1062_v26, 1 }
 0x502   :  { %3183 = vset.pattern.permute.xlu0 %v3512_v10  ;;  %v2110_v30 = vpop.permute.xlu1 %2109 }
 0x503   :  { %vm2111_vm14 = vcmp.eq.s32.totalorder %v2110_v30, 1 }
 0x504   :  { %3184 = vset.pattern.permute.xlu1 %v3511_v9 }
 0x505   :  { %v4522_v45 = vpop.permute.xlu0 %677 }
 0x506   :  { %vm679_vm2 = vcmp.eq.s32.totalorder %v4522_v45, 1 }
 0x507   :  { %v1848_v34 = vpop.permute.xlu1 %1847 }
 0x508   :  { %vm1849_vm15 = vcmp.eq.s32.totalorder %v1848_v34, 1 }
 0x50e   :  { %v3124_v62 = vpop.permute.xlu0 %3123 }
 0x50f   :  { %v3126_v32 = vunpack.i.h.bf16 %v3124_v62  ;;  %v3125_v49 = vunpack.i.l.bf16 %v3124_v62 }
 0x510   :  { %v3119_v51 = vpop.permute.xlu1 %3118 }
 0x511   :  { %v1330_v23 = vsel %vm1325_vm5, %v4446_v46, %v3126_v32  ;;  %v1592_v24 = vsel %vm1587_vm4, %v4446_v46, %v3125_v49  ;;  %v3121_v41 = vunpack.i.h.bf16 %v3119_v51  ;;  %v3120_v57 = vunpack.i.l.bf16 %v3119_v51 }
 0x512   :  { %v3178_v11 = vpack.i.bf16 %v1330_v23, %v1592_v24 }
 0x513   :  { %v282_v20 = vsel %vm277_vm6, %v4446_v46, %v3121_v41  ;;  %v544_v48 = vsel %vm539_vm7, %v4446_v46, %v3120_v57 }
 0x514   :  { %3179 = vrot.lane.b32.xlu0 %v3178_v11, %s3509_s25  ;;  %v3173_v50 = vpack.i.bf16 %v282_v20, %v544_v48 }
 0x516   :  { %3174 = vrot.lane.b32.xlu1 %v3173_v50, %s3509_s25 }
 0x518   :  { %1996 = vperm.xlu0 %3183, %v4473_v52  }
 0x51a   :  { %1734 = vperm.xlu1 %3184, %v4473_v52  }
 0x51c   :  { %3216 = vset.pattern.permute.xlu0 %v3515_v14 }
 0x51e   :  { %3205 = vset.pattern.permute.xlu1 %v3513_v12 }
 0x51f   :  { %v1988_v59 = vpop.permute.xlu0 %1987 }
 0x520   :  { %vm1989_vm4 = vcmp.eq.s32.totalorder %v1988_v59, 1 }
 0x521   :  { %v1726_v21 = vpop.permute.xlu1 %1725 }
 0x522   :  { %vm1727_vm3 = vcmp.eq.s32.totalorder %v1726_v21, 1 }
 0x53a   :  { %v3131_v22 = vpop.permute.xlu1 %3130 }
 0x53b   :  { %v3133_v40 = vunpack.i.h.bf16 %v3131_v22  ;;  %v3132_v55 = vunpack.i.l.bf16 %v3131_v22 }
 0x53d   :  { %v152_v33 = vsel %vm147_vm9, %v4446_v46, %v3133_v40  ;;  %v422_v28 = vsel %vm417_vm8, %v4446_v46, %v3132_v55 }
 0x53e   :  { %v3136_v37 = vpop.permute.xlu1 %3135  ;;  %v3185_v58 = vpack.i.bf16 %v152_v33, %v422_v28 }
 0x53f   :  { %v3138_v53 = vunpack.i.h.bf16 %v3136_v37  ;;  %v3137_v27 = vunpack.i.l.bf16 %v3136_v37 }
 0x540   :  { %3186 = vrot.lane.b32.xlu1 %v3185_v58, %s3509_s25 }
 0x541   :  { %v1208_v29 = vsel %vm1203_vm11, %v4446_v46, %v3138_v53  ;;  %v1470_v4 = vsel %vm1465_vm10, %v4446_v46, %v3137_v27 }
 0x542   :  { %v3141_v36 = vpop.permute.xlu1 %3140  ;;  %v3190_v54 = vpack.i.bf16 %v1208_v29, %v1470_v4 }
 0x543   :  { %v3143_v60 = vunpack.i.h.bf16 %v3141_v36  ;;  %v3142_v63 = vunpack.i.l.bf16 %v3141_v36 }
 0x544   :  { %3191 = vrot.lane.b32.xlu1 %v3190_v54, %s3509_s25 }
 0x545   :  { %v806_v35 = vsel %vm801_vm12, %v4446_v46, %v3143_v60  ;;  %v1068_v25 = vsel %vm1063_vm13, %v4446_v46, %v3142_v63 }
 0x546   :  { %v3146_v39 = vpop.permute.xlu1 %3145  ;;  %v3195_v38 = vpack.i.bf16 %v806_v35, %v1068_v25 }
 0x547   :  { %v3148_v43 = vunpack.i.h.bf16 %v3146_v39  ;;  %v3147_v61 = vunpack.i.l.bf16 %v3146_v39 }
 0x548   :  { %3196 = vrot.lane.b32.xlu1 %v3195_v38, %s3509_s25 }
 0x549   :  { %v1854_v56 = vsel %vm1849_vm15, %v4446_v46, %v3148_v43  ;;  %v2116_v0 = vsel %vm2111_vm14, %v4446_v46, %v3147_v61  ;;  %v4614_v43 = vld [vmem:[%s4995_s1 + $0x30] sm:$0xff] }
 0x54a   :  { %v3200_v44 = vpack.i.bf16 %v1854_v56, %v2116_v0 }
 0x54c   :  { %3201 = vrot.lane.b32.xlu1 %v3200_v44, %s3509_s25 }
 0x550   :  { %555 = vperm.xlu1 %3205, %v4473_v52  }
 0x554   :  { %v3152_v47 = vpop.permute.xlu0 %3151  ;;  %3217 = vset.pattern.permute.xlu1 %v3505_v2 }
 0x555   :  { %v3154_v26 = vunpack.i.h.bf16 %v3152_v47  ;;  %v3153_v30 = vunpack.i.l.bf16 %v3152_v47  ;;  %433 = vperm.xlu1 %3217, %v4553_v31  }
 0x557   :  { %v684_v34 = vsel %vm679_vm2, %v4446_v46, %v3154_v26  ;;  %v946_v62 = vsel %vm941_vm1, %v4446_v46, %v3153_v30  ;;  %v4561_v32 = vpop.permute.xlu1 %546  ;;  %vm175_vm1 = vcmp.eq.s32.totalorder %v4468_v42, 14 }
 0x558   :  { %v3157_v49 = vpop.permute.xlu0 %3156  ;;  %v3206_v51 = vpack.i.bf16 %v684_v34, %v946_v62  ;;  %vm548_vm8 = vcmp.eq.s32.totalorder %v4561_v32, 1 }
 0x559   :  { %v3159_v23 = vunpack.i.h.bf16 %v3157_v49  ;;  %v3158_v24 = vunpack.i.l.bf16 %v3157_v49  ;;  %3218 = vset.pattern.permute.xlu1 %v3506_v3 }
 0x55a   :  { %3207 = vrot.lane.b32.xlu0 %v3206_v51, %s3509_s25  ;;  %167 = vperm.xlu1 %3218, %v4553_v31  }
 0x55b   :  { %v1732_v6 = vsel %vm1727_vm3, %v4446_v46, %v3159_v23  ;;  %v1994_v45 = vsel %vm1989_vm4, %v4446_v46, %v3158_v24 }
 0x55c   :  { %v3211_v41 = vpack.i.bf16 %v1732_v6, %v1994_v45  ;;  %v4568_v57 = vpop.permute.xlu1 %424 }
 0x55d   :  { %vm426_vm9 = vcmp.eq.s32.totalorder %v4568_v57, 1 }
 0x55e   :  { %3212 = vrot.lane.b32.xlu0 %v3211_v41, %s3509_s25  ;;  %3220 = vset.pattern.permute.xlu1 %v3514_v13 }
 0x55f   :  { %1341 = vperm.xlu1 %3220, %v4473_v52  }
 0x561   :  { %v157_v11 = vpop.permute.xlu1 %156 }
 0x562   :  { %293 = vperm.xlu0 %3216, %v4473_v52   ;;  %vm158_vm10 = vcmp.eq.s32.totalorder %v157_v11, 1 }
 0x563   :  { %3221 = vset.pattern.permute.xlu1 %v3504_v1 }
 0x564   :  { %1481 = vperm.xlu1 %3221, %v4553_v31  }
 0x566   :  { %3219 = vset.pattern.permute.xlu0 %v3517_v16  ;;  %v1333_v20 = vpop.permute.xlu1 %1332 }
 0x567   :  { %1603 = vperm.xlu0 %3219, %v4473_v52   ;;  %vm1334_vm5 = vcmp.eq.s32.totalorder %v1333_v20, 1 }
 0x568   :  { %3224 = vset.pattern.permute.xlu1 %v3518_v17 }
 0x569   :  { %817 = vperm.xlu1 %3224, %v4473_v52   ;;  %v285_v48 = vpop.permute.xlu0 %284 }
 0x56a   :  { %vm286_vm7 = vcmp.eq.s32.totalorder %v285_v48, 1 }
 0x56b   :  { %3222 = vset.pattern.permute.xlu0 %v3507_v5  ;;  %v1473_v50 = vpop.permute.xlu1 %1472 }
 0x56c   :  { %1219 = vperm.xlu0 %3222, %v4553_v31   ;;  %vm1474_vm11 = vcmp.eq.s32.totalorder %v1473_v50, 1 }
 0x56d   :  { %3225 = vset.pattern.permute.xlu1 %v3508_v7 }
 0x56e   :  { %957 = vperm.xlu1 %3225, %v4553_v31   ;;  %v1595_v21 = vpop.permute.xlu0 %1594 }
 0x56f   :  { %vm1596_vm6 = vcmp.eq.s32.totalorder %v1595_v21, 1 }
 0x570   :  { %3223 = vset.pattern.permute.xlu0 %v3516_v15  ;;  %v4585_v22 = vpop.permute.xlu1 %808 }
 0x571   :  { %1079 = vperm.xlu0 %3223, %v4473_v52   ;;  %vm810_vm13 = vcmp.eq.s32.totalorder %v4585_v22, 1 }
 0x572   :  { %3227 = vset.pattern.permute.xlu1 %v3519_v18 }
 0x573   :  { %2127 = vperm.xlu1 %3227, %v4473_v52   ;;  %v1211_v40 = vpop.permute.xlu0 %1210 }
 0x574   :  { %vm1212_vm12 = vcmp.eq.s32.totalorder %v1211_v40, 1 }
 0x575   :  { %3226 = vset.pattern.permute.xlu0 %v3510_v8  ;;  %v4592_v55 = vpop.permute.xlu1 %948 }
 0x576   :  { %695 = vperm.xlu0 %3226, %v4553_v31   ;;  %vm950_vm2 = vcmp.eq.s32.totalorder %v4592_v55, 1 }
 0x577   :  { %3228 = vset.pattern.permute.xlu1 %v3520_v19 }
 0x578   :  { %1865 = vperm.xlu1 %3228, %v4473_v52   ;;  %v1071_v33 = vpop.permute.xlu0 %1070 }
 0x579   :  { %vm1072_vm14 = vcmp.eq.s32.totalorder %v1071_v33, 1 }
 0x57a   :  { %3239 = vset.pattern.permute.xlu0 %v3512_v10  ;;  %v2119_v28 = vpop.permute.xlu1 %2118 }
 0x57b   :  { %vm2120_vm15 = vcmp.eq.s32.totalorder %v2119_v28, 1 }
 0x57c   :  { %3250 = vset.pattern.permute.xlu1 %v3511_v9 }
 0x57d   :  { %v4598_v37 = vpop.permute.xlu0 %686 }
 0x57e   :  { %vm688_vm3 = vcmp.eq.s32.totalorder %v4598_v37, 1 }
 0x57f   :  { %v1857_v58 = vpop.permute.xlu1 %1856 }
 0x580   :  { %vm1858_vm0 = vcmp.eq.s32.totalorder %v1857_v58, 1 }
 0x586   :  { %v3180_v53 = vpop.permute.xlu0 %3179 }
 0x587   :  { %v3182_v27 = vunpack.i.h.bf16 %v3180_v53  ;;  %v3181_v29 = vunpack.i.l.bf16 %v3180_v53 }
 0x588   :  { %v3175_v4 = vpop.permute.xlu1 %3174 }
 0x589   :  { %v1339_v36 = vsel %vm1334_vm5, %v4446_v46, %v3182_v27  ;;  %v1601_v52 = vsel %vm1596_vm6, %v4446_v46, %v3181_v29  ;;  %v3177_v54 = vunpack.i.h.bf16 %v3175_v4  ;;  %v3176_v60 = vunpack.i.l.bf16 %v3175_v4 }
 0x58a   :  { %v3234_v63 = vpack.i.bf16 %v1339_v36, %v1601_v52 }
 0x58b   :  { %v291_v35 = vsel %vm286_vm7, %v4446_v46, %v3177_v54  ;;  %v553_v25 = vsel %vm548_vm8, %v4446_v46, %v3176_v60 }
 0x58c   :  { %3235 = vrot.lane.b32.xlu0 %v3234_v63, %s3509_s25  ;;  %v3229_v39 = vpack.i.bf16 %v291_v35, %v553_v25 }
 0x58e   :  { %3230 = vrot.lane.b32.xlu1 %v3229_v39, %s3509_s25 }
 0x590   :  { %2005 = vperm.xlu0 %3239, %v4553_v31  }
 0x594   :  { %3272 = vset.pattern.permute.xlu0 %v3515_v14 }
 0x597   :  { %v1997_v21 = vpop.permute.xlu0 %1996 }
 0x598   :  { %vm1998_vm5 = vcmp.eq.s32.totalorder %v1997_v21, 1 }
 0x599   :  { %v4609_v38 = vpop.permute.xlu1 %1734 }
 0x59a   :  { %vm1736_vm4 = vcmp.eq.s32.totalorder %v4609_v38, 1 }
 0x5b2   :  { %v3187_v61 = vpop.permute.xlu1 %3186 }
 0x5b3   :  { %v3189_v56 = vunpack.i.h.bf16 %v3187_v61  ;;  %v3188_v0 = vunpack.i.l.bf16 %v3187_v61 }
 0x5b5   :  { %v163_v44 = vsel %vm158_vm10, %v4614_v43, %v3189_v56  ;;  %v431_v59 = vsel %vm426_vm9, %v4614_v43, %v3188_v0 }
 0x5b6   :  { %v3192_v47 = vpop.permute.xlu1 %3191  ;;  %v3240_v26 = vpack.i.bf16 %v163_v44, %v431_v59 }
 0x5b7   :  { %v3194_v30 = vunpack.i.h.bf16 %v3192_v47  ;;  %v3193_v34 = vunpack.i.l.bf16 %v3192_v47 }
 0x5b8   :  { %3241 = vrot.lane.b32.xlu1 %v3240_v26, %s3509_s25 }
 0x5b9   :  { %v1217_v62 = vsel %vm1212_vm12, %v4614_v43, %v3194_v30  ;;  %v1479_v32 = vsel %vm1474_vm11, %v4614_v43, %v3193_v34 }
 0x5ba   :  { %v3197_v49 = vpop.permute.xlu1 %3196  ;;  %v3245_v51 = vpack.i.bf16 %v1217_v62, %v1479_v32 }
 0x5bb   :  { %v3199_v23 = vunpack.i.h.bf16 %v3197_v49  ;;  %v3198_v24 = vunpack.i.l.bf16 %v3197_v49 }
 0x5bc   :  { %3246 = vrot.lane.b32.xlu1 %v3245_v51, %s3509_s25 }
 0x5bd   :  { %v815_v45 = vsel %vm810_vm13, %v4446_v46, %v3199_v23  ;;  %v1077_v41 = vsel %vm1072_vm14, %v4446_v46, %v3198_v24 }
 0x5be   :  { %v3202_v6 = vpop.permute.xlu1 %3201  ;;  %v3251_v20 = vpack.i.bf16 %v815_v45, %v1077_v41 }
 0x5bf   :  { %v3204_v57 = vunpack.i.h.bf16 %v3202_v6  ;;  %v3203_v11 = vunpack.i.l.bf16 %v3202_v6 }
 0x5c0   :  { %1743 = vperm.xlu1 %3250, %v4553_v31  }
 0x5c1   :  { %v1863_v48 = vsel %vm1858_vm0, %v4446_v46, %v3204_v57  ;;  %v2125_v50 = vsel %vm2120_vm15, %v4446_v46, %v3203_v11  ;;  %v4637_v46 = vsel %vm175_vm1, 1, %v3506_v3 }
 0x5c2   :  { %v3256_v22 = vpack.i.bf16 %v1863_v48, %v2125_v50 }
 0x5c4   :  { %3252 = vrot.lane.b32.xlu1 %v3251_v20, %s3509_s25 }
 0x5c5   :  { %3261 = vset.pattern.permute.xlu1 %v3513_v12 }
 0x5c8   :  { %3257 = vrot.lane.b32.xlu1 %v3256_v22, %s3509_s25 }
 0x5cc   :  { %v3208_v40 = vpop.permute.xlu0 %3207  ;;  %564 = vperm.xlu1 %3261, %v4553_v31  }
 0x5cd   :  { %v3210_v33 = vunpack.i.h.bf16 %v3208_v40  ;;  %v3209_v28 = vunpack.i.l.bf16 %v3208_v40 }
 0x5cf   :  { %v693_v58 = vsel %vm688_vm3, %v4614_v43, %v3210_v33  ;;  %v955_v53 = vsel %vm950_vm2, %v4614_v43, %v3209_v28  ;;  %v4641_v27 = vpop.permute.xlu1 %555 }
 0x5d0   :  { %v3262_v29 = vpack.i.bf16 %v693_v58, %v955_v53  ;;  %v3213_v4 = vpop.permute.xlu0 %3212  ;;  %3273 = vset.pattern.permute.xlu1 %v3505_v2  ;;  %vm557_vm9 = vcmp.eq.s32.totalorder %v4641_v27, 1 }
 0x5d1   :  { %v3215_v36 = vunpack.i.h.bf16 %v3213_v4  ;;  %v3214_v52 = vunpack.i.l.bf16 %v3213_v4  ;;  %442 = vperm.xlu1 %3273, %v4637_v46  }
 0x5d2   :  { %3263 = vrot.lane.b32.xlu0 %v3262_v29, %s3509_s25 }
 0x5d3   :  { %v1741_v55 = vsel %vm1736_vm4, %v4614_v43, %v3215_v36  ;;  %v2003_v37 = vsel %vm1998_vm5, %v4614_v43, %v3214_v52 }
 0x5d4   :  { %v3267_v54 = vpack.i.bf16 %v1741_v55, %v2003_v37  ;;  %v4649_v60 = vpop.permute.xlu1 %433 }
 0x5d5   :  { %3274 = vset.pattern.permute.xlu1 %v3506_v3  ;;  %vm435_vm10 = vcmp.eq.s32.totalorder %v4649_v60, 1 }
 0x5d6   :  { %3268 = vrot.lane.b32.xlu0 %v3267_v54, %s3509_s25  ;;  %178 = vperm.xlu1 %3274, %v4637_v46  }
 0x5d9   :  { %v168_v63 = vpop.permute.xlu1 %167 }
 0x5da   :  { %3276 = vset.pattern.permute.xlu1 %v3514_v13  ;;  %302 = vperm.xlu0 %3272, %v4553_v31   ;;  %vm169_vm11 = vcmp.eq.s32.totalorder %v168_v63, 1 }
 0x5db   :  { %1350 = vperm.xlu1 %3276, %v4553_v31  }
 0x5de   :  { %3275 = vset.pattern.permute.xlu0 %v3517_v16  ;;  %v1342_v35 = vpop.permute.xlu1 %1341 }
 0x5df   :  { %3277 = vset.pattern.permute.xlu1 %v3504_v1  ;;  %1612 = vperm.xlu0 %3275, %v4553_v31   ;;  %vm1343_vm6 = vcmp.eq.s32.totalorder %v1342_v35, 1 }
 0x5e0   :  { %1490 = vperm.xlu1 %3277, %v4637_v46  }
 0x5e1   :  { %v294_v25 = vpop.permute.xlu0 %293 }
 0x5e2   :  { %vm295_vm8 = vcmp.eq.s32.totalorder %v294_v25, 1 }
 0x5e3   :  { %3278 = vset.pattern.permute.xlu0 %v3507_v5  ;;  %v1482_v39 = vpop.permute.xlu1 %1481 }
 0x5e4   :  { %3280 = vset.pattern.permute.xlu1 %v3518_v17  ;;  %1228 = vperm.xlu0 %3278, %v4637_v46   ;;  %vm1483_vm12 = vcmp.eq.s32.totalorder %v1482_v39, 1 }
 0x5e5   :  { %826 = vperm.xlu1 %3280, %v4553_v31  }
 0x5e6   :  { %v1604_v38 = vpop.permute.xlu0 %1603 }
 0x5e7   :  { %vm1605_vm7 = vcmp.eq.s32.totalorder %v1604_v38, 1 }
 0x5e8   :  { %3279 = vset.pattern.permute.xlu0 %v3516_v15  ;;  %v4666_v61 = vpop.permute.xlu1 %817 }
 0x5e9   :  { %3281 = vset.pattern.permute.xlu1 %v3508_v7  ;;  %1088 = vperm.xlu0 %3279, %v4553_v31   ;;  %vm819_vm14 = vcmp.eq.s32.totalorder %v4666_v61, 1 }
 0x5ea   :  { %966 = vperm.xlu1 %3281, %v4637_v46  }
 0x5eb   :  { %v1220_v56 = vpop.permute.xlu0 %1219 }
 0x5ec   :  { %vm1221_vm13 = vcmp.eq.s32.totalorder %v1220_v56, 1 }
 0x5ed   :  { %3282 = vset.pattern.permute.xlu0 %v3510_v8  ;;  %v4674_v0 = vpop.permute.xlu1 %957 }
 0x5ee   :  { %3283 = vset.pattern.permute.xlu1 %v3519_v18  ;;  %704 = vperm.xlu0 %3282, %v4637_v46   ;;  %vm959_vm0 = vcmp.eq.s32.totalorder %v4674_v0, 1 }
 0x5ef   :  { %2136 = vperm.xlu1 %3283, %v4553_v31  }
 0x5f0   :  { %v4677_v44 = vpop.permute.xlu0 %1079 }
 0x5f1   :  { %vm1081_vm15 = vcmp.eq.s32.totalorder %v4677_v44, 1 }
 0x5f2   :  { %3295 = vset.pattern.permute.xlu0 %v3512_v10  ;;  %v4682_v59 = vpop.permute.xlu1 %2127 }
 0x5f3   :  { %3284 = vset.pattern.permute.xlu1 %v3520_v19  ;;  %vm2129_vm2 = vcmp.eq.s32.totalorder %v4682_v59, 1 }
 0x5f4   :  { %1874 = vperm.xlu1 %3284, %v4553_v31  }
 0x5f5   :  { %v696_v47 = vpop.permute.xlu0 %695 }
 0x5f6   :  { %vm697_vm1 = vcmp.eq.s32.totalorder %v696_v47, 1 }
 0x5f7   :  { %v4685_v26 = vpop.permute.xlu1 %1865 }
 0x5f8   :  { %3306 = vset.pattern.permute.xlu1 %v3511_v9  ;;  %vm1867_vm3 = vcmp.eq.s32.totalorder %v4685_v26, 1 }
 0x5fe   :  { %v3236_v30 = vpop.permute.xlu0 %3235 }
 0x5ff   :  { %v3238_v34 = vunpack.i.h.bf16 %v3236_v30  ;;  %v3237_v62 = vunpack.i.l.bf16 %v3236_v30 }
 0x600   :  { %v3231_v32 = vpop.permute.xlu1 %3230 }
 0x601   :  { %v1348_v49 = vsel %vm1343_vm6, %v4614_v43, %v3238_v34  ;;  %v1610_v51 = vsel %vm1605_vm7, %v4614_v43, %v3237_v62  ;;  %v3233_v23 = vunpack.i.h.bf16 %v3231_v32  ;;  %v3232_v31 = vunpack.i.l.bf16 %v3231_v32 }
 0x602   :  { %v3290_v24 = vpack.i.bf16 %v1348_v49, %v1610_v51  ;;  %vm186_vm6 = vcmp.eq.s32.totalorder %v4468_v42, 15 }
 0x603   :  { %v300_v6 = vsel %vm295_vm8, %v4614_v43, %v3233_v23  ;;  %v562_v45 = vsel %vm557_vm9, %v4614_v43, %v3232_v31  ;;  %v4728_v31 = vsel %vm186_vm6, 1, %v3506_v3 }
 0x604   :  { %3291 = vrot.lane.b32.xlu0 %v3290_v24, %s3509_s25  ;;  %v3285_v41 = vpack.i.bf16 %v300_v6, %v562_v45 }
 0x606   :  { %3286 = vrot.lane.b32.xlu1 %v3285_v41, %s3509_s25 }
 0x608   :  { %2014 = vperm.xlu0 %3295, %v4637_v46  }
 0x60c   :  { %3328 = vset.pattern.permute.xlu0 %v3515_v14 }
 0x60f   :  { %v2006_v27 = vpop.permute.xlu0 %2005 }
 0x610   :  { %vm2007_vm5 = vcmp.eq.s32.totalorder %v2006_v27, 1 }
 0x62a   :  { %v3242_v57 = vpop.permute.xlu1 %3241 }
 0x62b   :  { %v3244_v11 = vunpack.i.h.bf16 %v3242_v57  ;;  %v3243_v20 = vunpack.i.l.bf16 %v3242_v57 }
 0x62d   :  { %v174_v48 = vsel %vm169_vm11, %v4614_v43, %v3244_v11  ;;  %v440_v50 = vsel %vm435_vm10, %v4614_v43, %v3243_v20 }
 0x62e   :  { %v3296_v21 = vpack.i.bf16 %v174_v48, %v440_v50  ;;  %v3247_v22 = vpop.permute.xlu1 %3246 }
 0x62f   :  { %v3249_v40 = vunpack.i.h.bf16 %v3247_v22  ;;  %v3248_v33 = vunpack.i.l.bf16 %v3247_v22 }
 0x630   :  { %3297 = vrot.lane.b32.xlu1 %v3296_v21, %s3509_s25 }
 0x631   :  { %v1226_v28 = vsel %vm1221_vm13, %v4614_v43, %v3249_v40  ;;  %v1488_v58 = vsel %vm1483_vm12, %v4614_v43, %v3248_v33 }
 0x632   :  { %v3301_v53 = vpack.i.bf16 %v1226_v28, %v1488_v58 }
 0x634   :  { %3302 = vrot.lane.b32.xlu1 %v3301_v53, %s3509_s25 }
 0x638   :  { %1752 = vperm.xlu1 %3306, %v4637_v46  }
 0x63c   :  { %3317 = vset.pattern.permute.xlu1 %v3513_v12 }
 0x63f   :  { %v1744_v29 = vpop.permute.xlu1 %1743 }
 0x640   :  { %vm1745_vm4 = vcmp.eq.s32.totalorder %v1744_v29, 1 }
 0x643   :  { %v3253_v4 = vpop.permute.xlu1 %3252 }
 0x644   :  { %v3255_v36 = vunpack.i.h.bf16 %v3253_v4  ;;  %v3254_v52 = vunpack.i.l.bf16 %v3253_v4  ;;  %v3264_v55 = vpop.permute.xlu0 %3263 }
 0x645   :  { %v3266_v37 = vunpack.i.h.bf16 %v3264_v55  ;;  %v3265_v54 = vunpack.i.l.bf16 %v3264_v55 }
 0x646   :  { %v824_v60 = vsel %vm819_vm14, %v4614_v43, %v3255_v36  ;;  %v1086_v63 = vsel %vm1081_vm15, %v4614_v43, %v3254_v52 }
 0x647   :  { %v3307_v35 = vpack.i.bf16 %v824_v60, %v1086_v63  ;;  %v702_v25 = vsel %vm697_vm1, %v4614_v43, %v3266_v37  ;;  %v964_v39 = vsel %vm959_vm0, %v4614_v43, %v3265_v54  ;;  %v3258_v38 = vpop.permute.xlu1 %3257 }
 0x648   :  { %v3318_v56 = vpack.i.bf16 %v702_v25, %v964_v39  ;;  %v3260_v30 = vunpack.i.h.bf16 %v3258_v38  ;;  %v3259_v61 = vunpack.i.l.bf16 %v3258_v38  ;;  %v3269_v34 = vpop.permute.xlu0 %3268 }
 0x649   :  { %v3271_v0 = vunpack.i.h.bf16 %v3269_v34  ;;  %v3270_v44 = vunpack.i.l.bf16 %v3269_v34  ;;  %3308 = vrot.lane.b32.xlu1 %v3307_v35, %s3509_s25 }
 0x64a   :  { %v1872_v47 = vsel %vm1867_vm3, %v4614_v43, %v3260_v30  ;;  %v2134_v62 = vsel %vm2129_vm2, %v4614_v43, %v3259_v61  ;;  %3319 = vrot.lane.b32.xlu0 %v3318_v56, %s3509_s25 }
 0x64b   :  { %v3312_v32 = vpack.i.bf16 %v1872_v47, %v2134_v62  ;;  %v1750_v49 = vsel %vm1745_vm4, %v4614_v43, %v3271_v0  ;;  %v2012_v51 = vsel %vm2007_vm5, %v4614_v43, %v3270_v44  ;;  %v565_v59 = vpop.permute.xlu1 %564 }
 0x64c   :  { %v3323_v23 = vpack.i.bf16 %v1750_v49, %v2012_v51  ;;  %vm566_vm10 = vcmp.eq.s32.totalorder %v565_v59, 1 }
 0x64d   :  { %3313 = vrot.lane.b32.xlu1 %v3312_v32, %s3509_s25 }
 0x64e   :  { %3324 = vrot.lane.b32.xlu0 %v3323_v23, %s3509_s25 }
 0x650   :  { %v4723_v26 = vpop.permute.xlu1 %442 }
 0x651   :  { %573 = vperm.xlu1 %3317, %v4637_v46   ;;  %vm444_vm11 = vcmp.eq.s32.totalorder %v4723_v26, 1 }
 0x652   :  { %311 = vperm.xlu0 %3328, %v4637_v46  }
 0x655   :  { %3329 = vset.pattern.permute.xlu1 %v3505_v2  ;;  %v4731_v24 = vpop.permute.xlu1 %178 }
 0x656   :  { %451 = vperm.xlu1 %3329, %v4728_v31   ;;  %3331 = vset.pattern.permute.xlu0 %v3517_v16  ;;  %vm180_vm12 = vcmp.eq.s32.totalorder %v4731_v24, 1 }
 0x657   :  { %1621 = vperm.xlu0 %3331, %v4637_v46  }
 0x659   :  { %v303_v42 = vpop.permute.xlu0 %302 }
 0x65a   :  { %3330 = vset.pattern.permute.xlu1 %v3506_v3  ;;  %v1351_v6 = vpop.permute.xlu1 %1350  ;;  %vm304_vm9 = vcmp.eq.s32.totalorder %v303_v42, 1 }
 0x65b   :  { %189 = vperm.xlu1 %3330, %v4728_v31   ;;  %3334 = vset.pattern.permute.xlu0 %v3507_v5  ;;  %vm1352_vm7 = vcmp.eq.s32.totalorder %v1351_v6, 1 }
 0x65c   :  { %1237 = vperm.xlu0 %3334, %v4728_v31  }
 0x65e   :  { %v1613_v45 = vpop.permute.xlu0 %1612 }
 0x65f   :  { %3332 = vset.pattern.permute.xlu1 %v3514_v13  ;;  %v4741_v2 = vpop.permute.xlu1 %1490  ;;  %vm1614_vm8 = vcmp.eq.s32.totalorder %v1613_v45, 1 }
 0x660   :  { %1359 = vperm.xlu1 %3332, %v4637_v46   ;;  %3335 = vset.pattern.permute.xlu0 %v3516_v15  ;;  %vm1492_vm13 = vcmp.eq.s32.totalorder %v4741_v2, 1 }
 0x661   :  { %1097 = vperm.xlu0 %3335, %v4637_v46  }
 0x663   :  { %v1229_v41 = vpop.permute.xlu0 %1228 }
 0x664   :  { %3333 = vset.pattern.permute.xlu1 %v3504_v1  ;;  %v4747_v3 = vpop.permute.xlu1 %826  ;;  %vm1230_vm14 = vcmp.eq.s32.totalorder %v1229_v41, 1 }
 0x665   :  { %1499 = vperm.xlu1 %3333, %v4728_v31   ;;  %3338 = vset.pattern.permute.xlu0 %v3510_v8  ;;  %vm828_vm15 = vcmp.eq.s32.totalorder %v4747_v3, 1 }
 0x666   :  { %713 = vperm.xlu0 %3338, %v4728_v31  }
 0x668   :  { %v4756_v57 = vpop.permute.xlu0 %1088 }
 0x669   :  { %3336 = vset.pattern.permute.xlu1 %v3518_v17  ;;  %v4753_v5 = vpop.permute.xlu1 %966  ;;  %vm1090_vm0 = vcmp.eq.s32.totalorder %v4756_v57, 1 }
 0x66a   :  { %835 = vperm.xlu1 %3336, %v4637_v46   ;;  %3351 = vset.pattern.permute.xlu0 %v3512_v10  ;;  %vm968_vm1 = vcmp.eq.s32.totalorder %v4753_v5, 1 }
 0x66d   :  { %v4763_v11 = vpop.permute.xlu0 %704 }
 0x66e   :  { %3337 = vset.pattern.permute.xlu1 %v3508_v7  ;;  %v4760_v1 = vpop.permute.xlu1 %2136  ;;  %vm706_vm2 = vcmp.eq.s32.totalorder %v4763_v11, 1 }
 0x66f   :  { %975 = vperm.xlu1 %3337, %v4728_v31   ;;  %vm2138_vm3 = vcmp.eq.s32.totalorder %v4760_v1, 1 }
 0x673   :  { %3339 = vset.pattern.permute.xlu1 %v3519_v18  ;;  %v4766_v8 = vpop.permute.xlu1 %1874 }
 0x674   :  { %2145 = vperm.xlu1 %3339, %v4637_v46   ;;  %vm1876_vm4 = vcmp.eq.s32.totalorder %v4766_v8, 1 }
 0x676   :  { %v3292_v20 = vpop.permute.xlu0 %3291 }
 0x677   :  { %v3294_v48 = vunpack.i.h.bf16 %v3292_v20  ;;  %v3293_v50 = vunpack.i.l.bf16 %v3292_v20 }
 0x678   :  { %v3287_v10 = vpop.permute.xlu1 %3286  ;;  %3340 = vset.pattern.permute.xlu1 %v3520_v19 }
 0x679   :  { %v1357_v7 = vsel %vm1352_vm7, %v4614_v43, %v3294_v48  ;;  %v1619_v21 = vsel %vm1614_vm8, %v4614_v43, %v3293_v50  ;;  %v3289_v22 = vunpack.i.h.bf16 %v3287_v10  ;;  %v3288_v40 = vunpack.i.l.bf16 %v3287_v10  ;;  %1883 = vperm.xlu1 %3340, %v4637_v46   ;;  %v4783_v46 = vld [vmem:[%s4995_s1 + $0x38] sm:$0xff] }
 0x67a   :  { %v3346_v33 = vpack.i.bf16 %v1357_v7, %v1619_v21 }
 0x67b   :  { %v309_v28 = vsel %vm304_vm9, %v4614_v43, %v3289_v22  ;;  %v571_v58 = vsel %vm566_vm10, %v4614_v43, %v3288_v40 }
 0x67c   :  { %v3341_v53 = vpack.i.bf16 %v309_v28, %v571_v58  ;;  %3347 = vrot.lane.b32.xlu0 %v3346_v33, %s3509_s25 }
 0x67d   :  { %3362 = vset.pattern.permute.xlu1 %v3511_v9 }
 0x67e   :  { %3342 = vrot.lane.b32.xlu1 %v3341_v53, %s3509_s25 }
 0x680   :  { %2023 = vperm.xlu0 %3351, %v4728_v31  }
 0x684   :  { %3384 = vset.pattern.permute.xlu0 %v3515_v14 }
 0x687   :  { %v2015_v35 = vpop.permute.xlu0 %2014 }
 0x688   :  { %vm2016_vm6 = vcmp.eq.s32.totalorder %v2015_v35, 1 }
 0x6a2   :  { %v3298_v27 = vpop.permute.xlu1 %3297 }
 0x6a3   :  { %v3300_v29 = vunpack.i.h.bf16 %v3298_v27  ;;  %v3299_v4 = vunpack.i.l.bf16 %v3298_v27 }
 0x6a5   :  { %v185_v9 = vsel %vm180_vm12, %v4783_v46, %v3300_v29  ;;  %v449_v36 = vsel %vm444_vm11, %v4783_v46, %v3299_v4  ;;  %v2213_v4 = vld [vmem:[%s4996_s2 + $0x10] sm:$0xff] }
 0x6a6   :  { %v3352_v52 = vpack.i.bf16 %v185_v9, %v449_v36  ;;  %v3303_v55 = vpop.permute.xlu1 %3302  ;;  %v2217_v9 = vld [vmem:[%s4996_s2 + $0x30] sm:$0xff] }
 0x6a7   :  { %v3305_v37 = vunpack.i.h.bf16 %v3303_v55  ;;  %v3304_v14 = vunpack.i.l.bf16 %v3303_v55  ;;  %v2571_v36 = vcombine.high %v2213_v4, %v2217_v9 }
 0x6a8   :  { %3353 = vrot.lane.b32.xlu1 %v3352_v52, %s3509_s25  ;;  %v2570_v52 = vcombine.low %v2213_v4, %v2217_v9 }
 0x6a9   :  { %v1235_v54 = vsel %vm1230_vm14, %v4783_v46, %v3305_v37  ;;  %v1497_v60 = vsel %vm1492_vm13, %v4783_v46, %v3304_v14  ;;  %2348 = vmatprep.subr.bf16.mxu0 %v2571_v36 }
 0x6aa   :  { %v3357_v63 = vpack.i.bf16 %v1235_v54, %v1497_v60  ;;  %2349 = vmatpush1.bf16.xpose.msra.mxu0 %v2570_v52 }
 0x6ac   :  { %3358 = vrot.lane.b32.xlu1 %v3357_v63, %s3509_s25 }
 0x6b0   :  { %1761 = vperm.xlu1 %3362, %v4728_v31  }
 0x6b4   :  { %3383 = vset.pattern.permute.xlu1 %v3513_v12 }
 0x6b7   :  { %v1753_v25 = vpop.permute.xlu1 %1752 }
 0x6b8   :  { %vm1754_vm5 = vcmp.eq.s32.totalorder %v1753_v25, 1 }
 0x6bb   :  { %v3309_v39 = vpop.permute.xlu1 %3308 }
 0x6bc   :  { %v3311_v38 = vunpack.i.h.bf16 %v3309_v39  ;;  %v3310_v56 = vunpack.i.l.bf16 %v3309_v39  ;;  %v3320_v30 = vpop.permute.xlu0 %3319 }
 0x6bd   :  { %v3322_v61 = vunpack.i.h.bf16 %v3320_v30  ;;  %v3321_v34 = vunpack.i.l.bf16 %v3320_v30  ;;  %v4864_v30 = vld [vmem:[%s4996_s2 + $0x28] sm:$0xff] }
 0x6be   :  { %v833_v0 = vsel %vm828_vm15, %v4614_v43, %v3311_v38  ;;  %v1095_v12 = vsel %vm1090_vm0, %v4614_v43, %v3310_v56  ;;  %v4859_v56 = vld [vmem:[%s4996_s2 + $0x8] sm:$0xff] }
 0x6bf   :  { %v3363_v44 = vpack.i.bf16 %v833_v0, %v1095_v12  ;;  %v711_v47 = vsel %vm706_vm2, %v4783_v46, %v3322_v61  ;;  %v973_v62 = vsel %vm968_vm1, %v4783_v46, %v3321_v34  ;;  %v3314_v32 = vpop.permute.xlu1 %3313  ;;  %v2568_v12 = vcombine.low %v4859_v56, %v4864_v30 }
 0x6c0   :  { %v3373_v49 = vpack.i.bf16 %v711_v47, %v973_v62  ;;  %v3316_v51 = vunpack.i.h.bf16 %v3314_v32  ;;  %v3315_v59 = vunpack.i.l.bf16 %v3314_v32  ;;  %v3325_v23 = vpop.permute.xlu0 %3324 }
 0x6c1   :  { %v3327_v26 = vunpack.i.h.bf16 %v3325_v23  ;;  %v3326_v24 = vunpack.i.l.bf16 %v3325_v23  ;;  %3364 = vrot.lane.b32.xlu1 %v3363_v44, %s3509_s25  ;;  %v2569_v44 = vcombine.high %v4859_v56, %v4864_v30  ;;  %v4880_v23 = vld [vmem:[%s4996_s2 + $0x18] sm:$0xff] }
 0x6c2   :  { %v1881_v42 = vsel %vm1876_vm4, %v4614_v43, %v3316_v51  ;;  %v2143_v6 = vsel %vm2138_vm3, %v4614_v43, %v3315_v59  ;;  %3374 = vrot.lane.b32.xlu0 %v3373_v49, %s3509_s25 }
 0x6c3   :  { %v3368_v45 = vpack.i.bf16 %v1881_v42, %v2143_v6  ;;  %v1759_v2 = vsel %vm1754_vm5, %v4783_v46, %v3327_v26  ;;  %v2021_v3 = vsel %vm2016_vm6, %v4783_v46, %v3326_v24  ;;  %v4885_v26 = vld [vmem:[%s4996_s2 + $0x38] sm:$0xff] }
 0x6c4   :  { %v3378_v41 = vpack.i.bf16 %v1759_v2, %v2021_v3  ;;  %v2572_v42 = vcombine.low %v4880_v23, %v4885_v26 }
 0x6c5   :  { %3369 = vrot.lane.b32.xlu1 %v3368_v45, %s3509_s25 }
 0x6c6   :  { %3379 = vrot.lane.b32.xlu0 %v3378_v41, %s3509_s25 }
 0x6c9   :  { %582 = vperm.xlu1 %3383, %v4728_v31  }
 0x6ca   :  { %320 = vperm.xlu0 %3384, %v4728_v31  }
 0x6cd   :  { %3385 = vset.pattern.permute.xlu1 %v3517_v16 }
 0x6ce   :  { %3387 = vset.pattern.permute.xlu0 %v3516_v15  ;;  %1630 = vperm.xlu1 %3385, %v4728_v31  }
 0x6cf   :  { %1106 = vperm.xlu0 %3387, %v4728_v31  }
 0x6d0   :  { %v574_v5 = vpop.permute.xlu1 %573 }
 0x6d1   :  { %v312_v20 = vpop.permute.xlu0 %311  ;;  %vm575_vm8 = vcmp.eq.s32.totalorder %v574_v5, 1 }
 0x6d2   :  { %3386 = vset.pattern.permute.xlu1 %v3514_v13  ;;  %vm313_vm7 = vcmp.eq.s32.totalorder %v312_v20, 1 }
 0x6d3   :  { %1368 = vperm.xlu1 %3386, %v4728_v31   ;;  %3405 = vset.pattern.permute.xlu0 %v3520_v19  ;;  %v2211_v19 = vld [vmem:[%s4996_s2] sm:$0xff] }
 0x6d5   :  { %v452_v57 = vpop.permute.xlu1 %451 }
 0x6d6   :  { %v1622_v40 = vpop.permute.xlu0 %1621  ;;  %vm453_vm11 = vcmp.eq.s32.totalorder %v452_v57, 1 }
 0x6d7   :  { %3388 = vset.pattern.permute.xlu1 %v3518_v17  ;;  %v2215_v17 = vld [vmem:[%s4996_s2 + $0x20] sm:$0xff]  ;;  %vm1623_vm9 = vcmp.eq.s32.totalorder %v1622_v40, 1 }
 0x6d8   :  { %844 = vperm.xlu1 %3388, %v4728_v31   ;;  %v2567_v50 = vcombine.high %v2211_v19, %v2215_v17  ;;  %v2566_v10 = vcombine.low %v2211_v19, %v2215_v17 }
 0x6da   :  { %v190_v1 = vpop.permute.xlu1 %189  ;;  %2266 = vmatprep.subr.bf16.mxu1 %v2567_v50 }
 0x6db   :  { %2267 = vmatpush1.bf16.xpose.msra.mxu1 %v2566_v10  ;;  %v1238_v53 = vpop.permute.xlu0 %1237  ;;  %vm191_vm12 = vcmp.eq.s32.totalorder %v190_v1, 1 }
 0x6dc   :  { %3389 = vset.pattern.permute.xlu1 %v3519_v18  ;;  %vm1239_vm13 = vcmp.eq.s32.totalorder %v1238_v53, 1  ;;  %2307 = vmatprep.subr.bf16.mxu1 %v2569_v44  ;;  %v3451_v44 = vld [vmem:[%s4995_s1] sm:$0xff] }
 0x6dd   :  { %2154 = vperm.xlu1 %3389, %v4728_v31  }
 0x6df   :  { %v1360_v15 = vpop.permute.xlu1 %1359 }
 0x6e0   :  { %v1098_v27 = vpop.permute.xlu0 %1097  ;;  %vm1361_vm10 = vcmp.eq.s32.totalorder %v1360_v15, 1 }
 0x6e1   :  { %vm1099_vm15 = vcmp.eq.s32.totalorder %v1098_v27, 1 }
 0x6e4   :  { %v1500_v16 = vpop.permute.xlu1 %1499 }
 0x6e5   :  { %v4844_v29 = vpop.permute.xlu0 %713  ;;  %vm1501_vm14 = vcmp.eq.s32.totalorder %v1500_v16, 1 }
 0x6e6   :  { %vm715_vm1 = vcmp.eq.s32.totalorder %v4844_v29, 1 }
 0x6e9   :  { %v4827_v11 = vpop.permute.xlu1 %835 }
 0x6ea   :  { %vm837_vm0 = vcmp.eq.s32.totalorder %v4827_v11, 1 }
 0x6ee   :  { %v4829_v8 = vpop.permute.xlu1 %975  ;;  %v3348_v55 = vpop.permute.xlu0 %3347 }
 0x6ef   :  { %v3350_v37 = vunpack.i.h.bf16 %v3348_v55  ;;  %v3349_v14 = vunpack.i.l.bf16 %v3348_v55  ;;  %vm977_vm2 = vcmp.eq.s32.totalorder %v4829_v8, 1 }
 0x6f1   :  { %v1366_v35 = vsel %vm1361_vm10, %v4783_v46, %v3350_v37  ;;  %v1628_v25 = vsel %vm1623_vm9, %v4783_v46, %v3349_v14  ;;  %vm2194_vm9 = vcmask 523264  }
 0x6f3   :  { %v4831_v13 = vpop.permute.xlu1 %2145 }
 0x6f4   :  { %vm2147_vm3 = vcmp.eq.s32.totalorder %v4831_v13, 1 }
 0x6f8   :  { %v4839_v48 = vpop.permute.xlu1 %1883 }
 0x6f9   :  { %vm1885_vm4 = vcmp.eq.s32.totalorder %v4839_v48, 1 }
 0x6fc   :  { %v3343_v7 = vpop.permute.xlu1 %3342 }
 0x6fd   :  { %v3345_v21 = vunpack.i.h.bf16 %v3343_v7  ;;  %v3344_v22 = vunpack.i.l.bf16 %v3343_v7 }
 0x6ff   :  { %v318_v33 = vsel %vm313_vm7, %v4783_v46, %v3345_v21  ;;  %v580_v28 = vsel %vm575_vm8, %v4783_v46, %v3344_v22  ;;  %v2024_v59 = vpop.permute.xlu0 %2023 }
 0x700   :  { %v3390_v58 = vpack.i.bf16 %v318_v33, %v580_v28  ;;  %vm2025_vm6 = vcmp.eq.s32.totalorder %v2024_v59, 1 }
 0x702   :  { %3391 = vrot.lane.b32.xlu0 %v3390_v58, %s3509_s25 }
 0x71a   :  { %v3354_v54 = vpop.permute.xlu1 %3353 }
 0x71b   :  { %v3356_v60 = vunpack.i.h.bf16 %v3354_v54  ;;  %v3355_v63 = vunpack.i.l.bf16 %v3354_v54 }
 0x71d   :  { %v196_v39 = vsel %vm191_vm12, %v4783_v46, %v3356_v60  ;;  %v458_v38 = vsel %vm453_vm11, %v4783_v46, %v3355_v63 }
 0x71e   :  { %v3400_v61 = vpack.i.bf16 %v1366_v35, %v196_v39  ;;  %v3395_v34 = vpack.i.bf16 %v1628_v25, %v458_v38  ;;  %v3359_v0 = vpop.permute.xlu1 %3358 }
 0x71f   :  { %v3361_v47 = vunpack.i.h.bf16 %v3359_v0  ;;  %v3360_v62 = vunpack.i.l.bf16 %v3359_v0 }
 0x720   :  { %3401 = vrot.lane.b32.xlu0 %v3400_v61, %s3509_s25  ;;  %3396 = vrot.lane.b32.xlu1 %v3395_v34, %s3509_s25  ;;  %v3450_v34 = vld [vmem:[%s4995_s1 + $0x8] sm:$0xff] }
 0x721   :  { %v1244_v32 = vsel %vm1239_vm13, %v4783_v46, %v3361_v47  ;;  %v1506_v49 = vsel %vm1501_vm14, %v4783_v46, %v3360_v62 }
 0x722   :  { %v3406_v51 = vpack.i.bf16 %v1244_v32, %v1506_v49 }
 0x724   :  { %3407 = vrot.lane.b32.xlu1 %v3406_v51, %s3509_s25  ;;  %1892 = vperm.xlu0 %3405, %v4728_v31   ;;  %v2573_v31 = vcombine.high %v4880_v23, %v4885_v26  ;;  %v3454_v26 = vld [vmem:[%s4995_s1 + $0x10] sm:$0xff] }
 0x726   :  { %2389 = vmatprep.subr.bf16.mxu0 %v2573_v31  ;;  %v3452_v31 = vld [vmem:[%s4995_s1 + $0x28] sm:$0xff] }
 0x728   :  { %3431 = vset.pattern.permute.xlu0 %v3519_v18 }
 0x72f   :  { %v1762_v24 = vpop.permute.xlu1 %1761 }
 0x730   :  { %vm1763_vm5 = vcmp.eq.s32.totalorder %v1762_v24, 1 }
 0x733   :  { %v3365_v18 = vpop.permute.xlu1 %3364 }
 0x734   :  { %v3367_v6 = vunpack.i.h.bf16 %v3365_v18  ;;  %v3366_v45 = vunpack.i.l.bf16 %v3365_v18  ;;  %v3375_v2 = vpop.permute.xlu0 %3374 }
 0x735   :  { %v3377_v5 = vunpack.i.h.bf16 %v3375_v2  ;;  %v3376_v57 = vunpack.i.l.bf16 %v3375_v2 }
 0x736   :  { %v842_v3 = vsel %vm837_vm0, %v4783_v46, %v3367_v6  ;;  %v1104_v41 = vsel %vm1099_vm15, %v4783_v46, %v3366_v45  ;;  %v3453_v6 = vld [vmem:[%s4995_s1 + $0x20] sm:$0xff]  ;;  %vm2430_vm0 = vcmask 130048  }
 0x737   :  { %v3411_v1 = vpack.i.bf16 %v842_v3, %v1104_v41  ;;  %v3370_v15 = vpop.permute.xlu1 %3369  ;;  %v720_v50 = vsel %vm715_vm1, %v4783_v46, %v3377_v5  ;;  %v982_v10 = vsel %vm977_vm2, %v4783_v46, %v3376_v57 }
 0x738   :  { %v3372_v16 = vunpack.i.h.bf16 %v3370_v15  ;;  %v3371_v19 = vunpack.i.l.bf16 %v3370_v15  ;;  %v3380_v17 = vpop.permute.xlu0 %3379 }
 0x739   :  { %v3382_v11 = vunpack.i.h.bf16 %v3380_v17  ;;  %v3381_v20 = vunpack.i.l.bf16 %v3380_v17  ;;  %3412 = vrot.lane.b32.xlu1 %v3411_v1, %s3509_s25 }
 0x73a   :  { %v1890_v7 = vsel %vm1885_vm4, %v4783_v46, %v3372_v16  ;;  %v2152_v21 = vsel %vm2147_vm3, %v4783_v46, %v3371_v19  ;;  %vm2501_vm4 = vcmask 7168  }
 0x73b   :  { %v3421_v8 = vpack.i.bf16 %v1890_v7, %v720_v50  ;;  %v3416_v22 = vpack.i.bf16 %v2152_v21, %v982_v10  ;;  %v1768_v13 = vsel %vm1763_vm5, %v4783_v46, %v3382_v11  ;;  %v2030_v48 = vsel %vm2025_vm6, %v4783_v46, %v3381_v20  ;;  %v3455_v20 = vld [vmem:[%s4995_s1 + $0x18] sm:$0xff] }
 0x73c   :  { %v3426_v40 = vpack.i.bf16 %v1768_v13, %v2030_v48 }
 0x73d   :  { %3422 = vrot.lane.b32.xlu0 %v3421_v8, %s3509_s25  ;;  %3417 = vrot.lane.b32.xlu1 %v3416_v22, %s3509_s25 }
 0x741   :  { %3427 = vrot.lane.b32.xlu1 %v3426_v40, %s3509_s25 }
 0x748   :  { %v583_v33 = vpop.permute.xlu1 %582 }
 0x749   :  { %v321_v53 = vpop.permute.xlu0 %320  ;;  %vm584_vm8 = vcmp.eq.s32.totalorder %v583_v33, 1  ;;  %v2565_v33 = vld [vmem:[%s4997_s3] ss:$0 sm:$0xff] }
 0x74a   :  { %vm322_vm7 = vcmp.eq.s32.totalorder %v321_v53, 1 }
 0x74d   :  { %v1631_v28 = vpop.permute.xlu1 %1630 }
 0x74e   :  { %v1107_v29 = vpop.permute.xlu0 %1106  ;;  %vm1632_vm11 = vcmp.eq.s32.totalorder %v1631_v28, 1 }
 0x74f   :  { %vm1108_vm12 = vcmp.eq.s32.totalorder %v1107_v29, 1 }
 0x752   :  { %v1369_v58 = vpop.permute.xlu1 %1368 }
 0x753   :  { %vm1370_vm10 = vcmp.eq.s32.totalorder %v1369_v58, 1 }
 0x757   :  { %v845_v27 = vpop.permute.xlu1 %844 }
 0x758   :  { %vm846_vm13 = vcmp.eq.s32.totalorder %v845_v27, 1 }
 0x75c   :  { %v4908_v4 = vpop.permute.xlu1 %2154 }
 0x75d   :  { %vm2156_vm14 = vcmp.eq.s32.totalorder %v4908_v4, 1 }
 0x774   :  { %v3392_v9 = vpop.permute.xlu0 %3391 }
 0x775   :  { %v3394_v36 = vunpack.i.h.bf16 %v3392_v9  ;;  %v3393_v52 = vunpack.i.l.bf16 %v3392_v9 }
 0x777   :  { %v327_v60 = vsel %vm322_vm7, %v4783_v46, %v3394_v36  ;;  %v589_v63 = vsel %vm584_vm8, %v4783_v46, %v3393_v52 }
 0x792   :  { %v3402_v55 = vpop.permute.xlu0 %3401  ;;  %v3397_v37 = vpop.permute.xlu1 %3396 }
 0x793   :  { %v3403_v14 = vunpack.i.l.bf16 %v3402_v55  ;;  %v3398_v54 = vunpack.i.l.bf16 %v3397_v37  ;;  %v3404_v35 = vunpack.i.h.bf16 %v3402_v55  ;;  %v3399_v25 = vunpack.i.h.bf16 %v3397_v37 }
 0x795   :  { %v2196_v39 = vsel %vm2194_vm9, %v3398_v54, %v589_v63  ;;  %v2195_v38 = vsel %vm2194_vm9, %v3403_v14, %v327_v60  ;;  %v1375_v49 = vsel %vm1370_vm10, %v4783_v46, %v3404_v35  ;;  %v1637_v51 = vsel %vm1632_vm11, %v4783_v46, %v3399_v25 }
 0x796   :  { %v3408_v61 = vpop.permute.xlu1 %3407  ;;  %v2204_v0 = vpack.c.bf16 %v2196_v39, %v3450_v34  ;;  %v2203_v47 = vpack.c.bf16 %v2195_v38, %v3451_v44  ;;  %v2463_v54 = vlaneseq }
 0x797   :  { %v3410_v62 = vunpack.i.h.bf16 %v3408_v61  ;;  %v3409_v32 = vunpack.i.l.bf16 %v3408_v61 }
 0x798   :  { %2298 = vmatprep.mubr.bf16.mxu1 %v2204_v0  ;;  %v2464_v60 = vand.u32 127, %v2463_v54 }
 0x799   :  { %2299 = vmatmul.mubr.bf16.vlgmr.msra.gmra.mrb[0].mxu1 %v2203_v47  ;;  %v2200_v59 = vsel %vm2194_vm9, %v3409_v32, %v1637_v51  ;;  %v2199_v24 = vsel %vm2194_vm9, %v3410_v62, %v1375_v49 }
 0x79a   :  { %v2208_v18 = vpack.c.bf16 %v2200_v59, %v3452_v31  ;;  %v2207_v45 = vpack.c.bf16 %v2199_v24, %v3453_v6  ;;  %2308 = vmatpush1.bf16.xpose.msra.mxu1 %v2568_v12 }
 0x79c   :  { %2380 = vmatprep.mubr.bf16.mxu0 %v2208_v18 }
 0x79d   :  { %2381 = vmatmul.mubr.bf16.vlgmr.msra.gmra.mrb[0].mxu0 %v2207_v45 }
 0x79e   :  { %2390 = vmatpush1.bf16.xpose.msra.mxu0 %v2572_v42 }
 0x7a3   :  { %v1893_v2 = vpop.permute.xlu0 %1892 }
 0x7a4   :  { %vm1894_vm15 = vcmp.eq.s32.totalorder %v1893_v2, 1 }
 0x7ab   :  { %v3413_v3 = vpop.permute.xlu1 %3412 }
 0x7ac   :  { %v3415_v41 = vunpack.i.h.bf16 %v3413_v3  ;;  %v3414_v5 = vunpack.i.l.bf16 %v3413_v3 }
 0x7ae   :  { %v851_v19 = vsel %vm846_vm13, %v4783_v46, %v3415_v41  ;;  %v1113_v56 = vsel %vm1108_vm12, %v4783_v46, %v3414_v5 }
 0x7af   :  { %v3423_v57 = vpop.permute.xlu0 %3422  ;;  %v3418_v1 = vpop.permute.xlu1 %3417 }
 0x7b0   :  { %v3424_v15 = vunpack.i.l.bf16 %v3423_v57  ;;  %v3419_v16 = vunpack.i.l.bf16 %v3418_v1  ;;  %v3425_v30 = vunpack.i.h.bf16 %v3423_v57  ;;  %v3420_v12 = vunpack.i.h.bf16 %v3418_v1 }
 0x7b2   :  { %v2197_v17 = vsel %vm2194_vm9, %v3424_v15, %v851_v19  ;;  %v2198_v23 = vsel %vm2194_vm9, %v3419_v16, %v1113_v56  ;;  %v1899_v21 = vsel %vm1894_vm15, %v4783_v46, %v3425_v30  ;;  %v2161_v8 = vsel %vm2156_vm14, %v4783_v46, %v3420_v12 }
 0x7b3   :  { %v2205_v42 = vpack.c.bf16 %v2197_v17, %v3454_v26  ;;  %v3428_v11 = vpop.permute.xlu1 %3427  ;;  %v2206_v50 = vpack.c.bf16 %v2198_v23, %v3455_v20 }
 0x7b4   :  { %v3430_v10 = vunpack.i.h.bf16 %v3428_v11  ;;  %v3429_v7 = vunpack.i.l.bf16 %v3428_v11 }
 0x7b5   :  { %2339 = vmatprep.mubr.bf16.mxu1 %v2206_v50 }
 0x7b6   :  { %v2201_v22 = vsel %vm2194_vm9, %v3430_v10, %v1899_v21  ;;  %2340 = vmatmul.mubr.bf16.vlgmr.msra.gmra.mrb[0].mxu1 %v2205_v42  ;;  %v2202_v13 = vsel %vm2194_vm9, %v3429_v7, %v2161_v8  ;;  %v3521_v42 = vmov 0.0  }
 0x7b7   :  { %v2209_v48 = vpack.c.bf16 %v2201_v22, %v4614_v43  ;;  %v2210_v40 = vpack.c.bf16 %v2202_v13, %v4783_v46 }
 0x7b9   :  { %2421 = vmatprep.mubr.bf16.mxu0 %v2210_v40 }
 0x7ba   :  { %2422 = vmatmul.mubr.bf16.vlgmr.msra.gmra.mrb[0].mxu0 %v2209_v48 }
 0x889   :  { %v2341_v28 = vpop.f32.mrb[0].mxu1 }
 0x88a   :  { %v2343_v58 = vpop.f32.mrb[1].mxu1  ;;  %v2576_v27 = vadd.f32 %v2565_v33, %v2341_v28 }
 0x88b   :  { %v2344_v53 = vpop.f32.mrb[2].mxu1 }
 0x88c   :  { %v2346_v29 = vpop.f32.mrb[3].mxu1  ;;  %v2578_v9 = vadd.f32 %v2565_v33, %v2344_v53 }
 0x88d   :  { %v2423_v4 = vpop.f32.mrb[0].mxu0 }
 0x88e   :  { %v2577_v36 = vadd.f32 %v2576_v27, %v2423_v4  ;;  %v2425_v52 = vpop.f32.mrb[1].mxu0 }
 0x88f   :  { %v2426_v55 = vpop.f32.mrb[2].mxu0 }
 0x890   :  { %v2579_v43 = vadd.f32 %v2578_v9, %v2426_v55  ;;  %v2428_v37 = vpop.f32.mrb[3].mxu0  ;;  %v2432_v46 = vsel %vm2430_vm0, %v2577_v36, -inf  ;;  %2431 = vst.msk [vmem:[#allocation2] sm:$0xff] %vm2430_vm0, %v2577_v36 }
 0x891   :  { %2433 = vmax.xlane.f32.xlu0 %v2432_v46 }
 0x892   :  { %v2435_v14 = vsel %vm2430_vm0, %v2579_v43, -inf }
 0x893   :  { %2436 = vmax.xlane.f32.xlu1 %v2435_v14 }
 0x91e   :  { %v2434_v63 = vpop.xlane.xlu0 %2433 }
 0x91f   :  { %v2438_v35 = vsub.f32 %v2577_v36, %v2434_v63  ;;  %vm2465_vm1 = vcmp.eq.f32.partialorder %v2577_v36, %v2434_v63 }
 0x920   :  { %v2466_v25 = vsel %vm2465_vm1, %v2464_v60, 16  ;;  %v2437_v39 = vpop.xlane.xlu1 %2436 }
 0x921   :  { %v2440_v38 = vmul.f32 1.442695, %v2438_v35  ;;  %v2467_v61 = vsel %vm2430_vm0, %v2466_v25, 2147483647  ;;  %v2439_v34 = vsub.f32 %v2579_v43, %v2437_v39 }
 0x922   :  { %v2469_v0 = vshra.s32 %v2467_v61, 16  ;;  %v2468_v59 = vand.u32 65535, %v2467_v61 }
 0x923   :  { %3432 = vpow2.f32 %v2440_v38  ;;  %v2442_v44 = vmul.f32 1.442695, %v2439_v34 }
 0x924   :  { %v2471_v47 = vcvt.s32.f32 %v2469_v0  ;;  %v2470_v31 = vcvt.s32.f32 %v2468_v59 }
 0x925   :  { %3434 = vpow2.f32 %v2442_v44 }
 0x926   :  { %2472 = vmin.xlane.f32.xlu0 %v2471_v47 }
 0x92d   :  { %v3433_v62 = vpop.eup %3432 }
 0x92e   :  { %v2444_v32 = vsel %vm2430_vm0, %v3433_v62, 0.0 }
 0x92f   :  { %v3435_v49 = vpop.eup %3434  ;;  %2445 = vadd.xlane.f32.xlu0 %v2444_v32 }
 0x930   :  { %v2447_v51 = vsel %vm2430_vm0, %v3435_v49, 0.0 }
 0x931   :  { %2448 = vadd.xlane.f32.xlu1 %v2447_v51 }
 0x9b3   :  { %v2473_v24 = vpop.xlane.xlu0 %2472 }
 0x9b4   :  { %vm2474_vm2 = vcmp.eq.f32.partialorder %v2471_v47, %v2473_v24  ;;  %v2479_v16 = vcvt.f32.s32 %v2473_v24 }
 0x9b5   :  { %v2475_v18 = vsel %vm2474_vm2, %v2470_v31, inf }
 0x9b6   :  { %2476 = vmin.xlane.f32.xlu0 %v2475_v18  ;;  %v2480_v30 = vshll.u32 %v2479_v16, 16 }
 0x9bc   :  { %v2446_v6 = vpop.xlane.xlu0 %2445 }
 0x9bd   :  { %3436 = vrcp.f32 %v2446_v6 }
 0x9be   :  { %3438 = vlog2.f32 %v2446_v6  ;;  %v2449_v15 = vpop.xlane.xlu1 %2448 }
 0x9bf   :  { %3440 = vrcp.f32 %v2449_v15 }
 0x9c7   :  { %v3437_v45 = vpop.eup %3436 }
 0x9c8   :  { %v3439_v2 = vpop.eup %3438  ;;  %v2451_v41 = vmul.f32 %v3437_v45, %v3433_v62 }
 0x9c9   :  { %v2455_v3 = vmul.f32 0.6931472, %v3439_v2  ;;  %v3441_v19 = vpop.eup %3440 }
 0x9ca   :  { %v2453_v17 = vmul.f32 %v3441_v19, %v3435_v49 }
 0x9cb   :  { %v2456_v5 = vsub.f32 %v2438_v35, %v2455_v3 }
 0x9cc   :  { %v2485_v26 = vsub.f32 %v2451_v41, %v2453_v17 }
 0x9cd   :  { %v2457_v57 = vmul.f32 %v2456_v5, %v2451_v41 }
 0x9cf   :  { %v2458_v1 = vsel %vm2430_vm0, %v2457_v57, 0.0 }
 0x9d0   :  { %2459 = vadd.xlane.f32.xlu1 %v2458_v1 }
 0xa43   :  { %v2477_v56 = vpop.xlane.xlu0 %2476 }
 0xa44   :  { %v2478_v12 = vcvt.f32.s32 %v2477_v56 }
 0xa46   :  { %v2481_v23 = vadd.s32 %v2480_v30, %v2478_v12 }
 0xa48   :  { %vm2482_vm3 = vcmp.eq.s32.totalorder %v2464_v60, %v2481_v23 }
 0xa49   :  { %v2574_v11 = vsel %vm2482_vm3, 1.0, %v3521_v42 }
 0xa4a   :  { %v2486_v20 = vmul.f32 %v2574_v11, %v2485_v26 }
 0xa4c   :  { %v2487_v50 = vsel %vm2430_vm0, %v2486_v20, 0.0 }
 0xa4d   :  { %2488 = vadd.xlane.f32.xlu0 %v2487_v50 }
 0xa5d   :  { %v2460_v10 = vpop.xlane.xlu1 %2459 }
 0xa5e   :  { %v2461_v7 = vsub.f32 0.0, %v2460_v10 }
 0xa60   :  { %2532 = vst.msk [vmem:[%s4999_s5] sm:$0xff] %vm2501_vm4, %v2461_v7  ;;  %v2494_v21 = vsub.f32 2.763102, %v2461_v7  ;;  %vm2462_vm5 = vcmp.lt.f32.partialorder %v2461_v7, 3.4538777  ;;  %s3522_s5 = smov [#allocation2]  }
 0xa61   :  { %s2539_s23 = sshll.u32 %s3522_s5, 4  ;;  %s2540_s23 = int_to_ptr.vmem [resolvable:$true] %s2539_s23 }
 0xa62   :  { %v2495_v8 = vmul.f32 1.442695, %v2494_v21  ;;  %s3456_s24 = scalar_lea.vmem %s2540_s23, 128  ;;  %p3461_p1 = scmp.lt.s32.totalorder %s2540_s23, %s2540_s23 }
 0xa63   :  { %p3457_p0 = scmp.ne.s32.totalorder %s2540_s23, %s3456_s24  ;;  %p3462_p2 = scmp.lt.s32.totalorder %s3456_s24, %s3456_s24 }
 0xa64   :  { %3442 = vpow2.f32 %v2495_v8 }
 0xa65   :  { %p3463_p3 = por %p3462_p2, %p3461_p1 }
 0xa67   :  { %p3464_p4 = pnand %p3463_p3, %p3457_p0 }
 0xa6e   :  { %v3443_v33 = vpop.eup %3442 }
 0xada   :  { %v2489_v22 = vpop.xlane.xlu0 %2488 }
 0xadb   :  { %vm2490_vm6 = vcmp.gt.f32.partialorder %v2489_v22, 0.3  ;;  %v2497_v13 = vmul.f32 1.442695, %v2489_v22 }
 0xadc   :  { %vm2491_vm7 = vmand %vm2462_vm5, %vm2490_vm6 }
 0xadd   :  { %3444 = vpow2.f32 %v2497_v13  ;;  %v2575_v48 = vsel %vm2491_vm7, 1.0, %v3521_v42 }
 0xade   :  { %v2502_v40 = vsel %vm2501_vm4, %v2575_v48, 0.0 }
 0xadf   :  { %2503 = vadd.xlane.f32.xlu1 %v2502_v40 }
 0xae7   :  { %v3445_v28 = vpop.eup %3444 }
 0xae8   :  { %v2499_v58 = vadd.f32 %v3445_v28, %v3443_v33 }
 0xaea   :  { %v2500_v53 = vmul.f32 %v2499_v58, %v2461_v7 }
 0xaec   :  { %v2513_v27 = vmul.f32 %v2575_v48, %v2500_v53 }
 0xaee   :  { %v2514_v29 = vsel %vm2501_vm4, %v2513_v27, 0.0 }
 0xaef   :  { %2515 = vadd.xlane.f32.xlu0 %v2514_v29 }
 0xaf0   :  { %3467 = shalt.err (!%p3464_p4)
}
 0xaf1   :  { %s3468_s28 = scalar_lea.hbm %s4998_s4, 128 }
 0xaf2   :  { %p3469_p5 = scmp.ne.s32.totalorder %s4998_s4, %s3468_s28  ;;  %p3472_p6 = scmp.lt.u32.totalorder %s3468_s28, %s4998_s4 }
 0xaf4   :  { %p3474_p7 = pnand %p3472_p6, %p3469_p5 }
 0xaf6   :  { %3477 = shalt.err (!%p3474_p7)
}
 0xaf7   :  { %2542 = dma.vmem_to_hbm [thread:$0]  %s2540_s23, 128, %s4998_s4, [#allocation3]   ;;  %vm2530_vm8 = vcmask 0  }
 0xaf8   :  { %s3523_s2 = smov [#allocation4]  }
 0xaf9   :  { %s2551_s25 = sshll.u32 %s3523_s2, 4  ;;  %s2552_s25 = int_to_ptr.vmem [resolvable:$true] %s2551_s25 }
 0xafa   :  { %s3478_s12 = scalar_lea.vmem %s2552_s25, 16  ;;  %s3482_s13 = scalar_lea.vmem %s2552_s25, 32 }
 0xafb   :  { %p3479_p8 = scmp.ne.s32.totalorder %s2552_s25, %s3478_s12  ;;  %p3483_p9 = scmp.lt.s32.totalorder %s2552_s25, %s2552_s25 }
 0xafc   :  { %p3484_p10 = scmp.lt.s32.totalorder %s3482_s13, %s3478_s12 }
 0xafe   :  { %p3485_p11 = por %p3484_p10, %p3483_p9 }
 0xb00   :  { %p3486_p12 = pnand %p3485_p11, %p3479_p8 }
 0xb6c   :  { %v2504_v4 = vpop.xlane.xlu1 %2503 }
 0xb6d   :  { %v2505_v9 = vrot.slane %v2504_v4, 4 }
 0xb6f   :  { %v2506_v36 = vadd.f32 %v2505_v9, %v2504_v4 }
 0xb71   :  { %v2507_v52 = vrot.slane %v2506_v36, 2 }
 0xb73   :  { %v2508_v55 = vadd.f32 %v2507_v52, %v2506_v36 }
 0xb75   :  { %v2509_v43 = vrot.slane %v2508_v55, 1 }
 0xb77   :  { %v2510_v37 = vadd.f32 %v2509_v43, %v2508_v55 }
 0xb79   :  { %2588 = vpush %v2510_v37 }
 0xb7c   :  { %v2516_v46 = vpop.xlane.xlu0 %2515 }
 0xb7d   :  { %v2517_v14 = vrot.slane %v2516_v46, 4 }
 0xb7f   :  { %v2518_v54 = vadd.f32 %v2517_v14, %v2516_v46 }
 0xb81   :  { %v2519_v60 = vrot.slane %v2518_v54, 2 }
 0xb83   :  { %v2520_v63 = vadd.f32 %v2519_v60, %v2518_v54 }
 0xb85   :  { %v2521_v35 = vrot.slane %v2520_v63, 1 }
 0xb87   :  { %v2522_v25 = vadd.f32 %v2521_v35, %v2520_v63 }
 0xb89   :  { %2590 = vpush %v2522_v25 }
 0xbaa   :  { %s2589_s11 = spop %2588 }
 0xbab   :  { %v2512_v39 = vstv %s2589_s11 }
 0xbac   :  { %v2526_v38 = vmax.f32 %v2512_v39, 1.0  ;;  %vm2525_vm9 = vcmp.gt.f32.partialorder %v2512_v39, 0.0 }
 0xbae   :  { %3446 = vrcp.f32 %v2526_v38 }
 0xbb8   :  { %v3447_v61 = vpop.eup %3446 }
 0xbba   :  { %s2591_s4 = spop %2590 }
 0xbbb   :  { %v2524_v34 = vstv %s2591_s4 }
 0xbbc   :  { %v2528_v0 = vmul.f32 %v3447_v61, %v2524_v34 }
 0xbbe   :  { %v2529_v44 = vsel %vm2525_vm9, %v2528_v0, 0.0 }
 0xbbf   :  { %2531 = vst.msk [vmem:[#allocation4] sm:$0x1] %vm2530_vm8, %v2529_v44 }
 0xbc0   :  { %3489 = shalt.err (!%p3486_p12)
}
 0xbc1   :  { %s3490_s0 = scalar_lea.hbm %s5000_s6, 16 }
 0xbc2   :  { %p3491_p13 = scmp.ne.s32.totalorder %s5000_s6, %s3490_s0  ;;  %p3494_p0 = scmp.lt.u32.totalorder %s3490_s0, %s5000_s6 }
 0xbc4   :  { %p3496_p1 = pnand %p3494_p0, %p3491_p13 }
 0xbc6   :  { %3499 = shalt.err (!%p3496_p1)
}
 0xbc7   :  { %2554 = dma.vmem_to_hbm [thread:$0]  %s2552_s25, 16, %s5000_s6, [#allocation5]  }
 0xbc8   :  { %3500 = dma.done.wait [#allocation3], 128  }
 0xbc9   :  { %3501 = vsyncadd [#allocation3], 4294967168 }
 0xbca   :  { %3502 = dma.done.wait [#allocation5], 16  }
 0xbcb   :  { %3503 = vsyncadd [#allocation5], 4294967280 }
 0xbcc   :  { %2563 = vsyncpa [#allocation3], 1 }
 0xbcd   :  { %2564 = vsyncpa [#allocation5], 1 }

</bundles_post_ra>
